<compile_context>
chip_gen: v5e
topology: v5e:2x2
jax: 0.10.0
libtpu: 0.0.40
codegen_flags: <defaults>
</compile_context>

<pallas_src>
import functools

import jax
import jax.numpy as jnp
from jax import lax
from jax.experimental import pallas as pl
from jax.experimental.pallas import tpu as pltpu


def _round_up(x, m):
    return ((x + m - 1) // m) * m


def _attack_pgd_kernel(x0_ref, w_ref, wt_ref, b_ref, y_ref,
                       logits_pert_ref, probs_ref, x_adv_ref,
                       *, num_steps, step_size, epsilon, num_classes):
    x0 = x0_ref[...]                       # (TM, Dp)   float32
    w = w_ref[...]                         # (Dp, CPAD) bfloat16
    w_t = wt_ref[...]                      # (CPAD, Dp) bfloat16
    y = y_ref[...]                         # (TM, 1)    int32 (padding rows = -1)

    tm, _ = x0.shape
    cpad = w.shape[1]

    # ---- loop invariants, hoisted (JAX does not CSE these) -------------------
    b_b = jnp.broadcast_to(b_ref[...], (tm, cpad)).astype(jnp.float32)
    col = lax.broadcasted_iota(jnp.int32, (tm, cpad), 1)
    valid = col < num_classes                       # class-lane validity mask
    onehot = jnp.where(col == y, 1.0, 0.0).astype(jnp.float32)   # in-kernel one-hot
    neg_big = jnp.float32(-1e30)
    step = jnp.float32(step_size)
    eps = jnp.float32(epsilon)
    # eps-ball around inputs intersected with the [-1, 1] clamp, computed once.
    lo = jnp.maximum(x0 - eps, jnp.float32(-1.0))
    hi = jnp.minimum(x0 + eps, jnp.float32(1.0))

    # ---- natural forward: aux_net(inputs)[0] and targets_prob ----------------
    logits_nat = jnp.dot(x0.astype(jnp.bfloat16), w,
                         preferred_element_type=jnp.float32) + b_b
    masked = jnp.where(valid, logits_nat, neg_big)
    m = jnp.max(masked, axis=1, keepdims=True)
    e = jnp.where(valid, jnp.exp(masked - m), jnp.zeros_like(masked))
    probs = e / jnp.sum(e, axis=1, keepdims=True)    # exact (once-only) softmax
    probs_ref[...] = probs

    # TODO(synk): random_start (uniform_(-eps, eps) noise) omitted; this models
    # config['random_start']=False.  Use pltpu.prng_seed/prng_random_bits here
    # if a randomized start is ever required.

    def pgd_update(x, p):
        # d(mean CE)/d logits = (p - onehot)/B; the positive 1/B factor does
        # not change the sign, so it is dropped.
        g_logits = p - onehot
        # chain rule through the linear net: d loss / d x = g_logits @ W^T
        g_x = jnp.dot(g_logits.astype(jnp.bfloat16), w_t,
                      preferred_element_type=jnp.float32)
        # step_size * sign(g_x) as one compare + one select (2 VPU ops instead
        # of sign's multi-op expansion).  NOTE: differs from torch.sign only
        # where a gradient component is exactly 0 (a step is taken instead of
        # none); the lo/hi clamp keeps the iterate valid either way.
        x_new = x + jnp.where(g_x >= 0, step, -step)
        return jnp.minimum(jnp.maximum(x_new, lo), hi)

    # ---- peeled first PGD step: x == inputs, so reuse the natural softmax ----
    if num_steps >= 1:
        x = pgd_update(x0, probs)
    else:
        x = x0

    def body(_, x):
        logits = jnp.dot(x.astype(jnp.bfloat16), w,
                         preferred_element_type=jnp.float32) + b_b
        lm = jnp.where(valid, logits, neg_big)
        mx = jnp.max(lm, axis=1, keepdims=True)
        ex = jnp.where(valid, jnp.exp(lm - mx), jnp.zeros_like(lm))
        inv_s = pl.reciprocal(jnp.sum(ex, axis=1, keepdims=True), approx=True)
        return pgd_update(x, ex * inv_s)

    n_rem = num_steps - 1
    if n_rem > 0:
        # Full unroll only for short loops; partial unroll keeps LLO scheduling
        # visibility without blowing up instruction memory for long PGD runs.
        unroll = True if n_rem <= 6 else 2
        x = lax.fori_loop(0, n_rem, body, x, unroll=unroll)

    x_adv_ref[...] = x

    # logits_pert = basic_net(x_adv)[0]
    logits_pert_ref[...] = jnp.dot(x.astype(jnp.bfloat16), w,
                                   preferred_element_type=jnp.float32) + b_b


def attack_pgd_forward(inputs, targets, w, b, *, step_size, epsilon,
                       num_steps, num_classes):
    """Mirrors Attack_PGD.forward(inputs, targets, attack=True).

    Returns (logits_pert, targets_prob, True, x_adv, x_org).
    """
    B, C, H, W_sp = inputs.shape
    D = C * H * W_sp
    CPAD = 128                      # pad class dim to one full lane register
    Dp = _round_up(D, 128)

    try:
        vmem_cap = int(pltpu.get_tpu_info().vmem_capacity_bytes)
    except Exception:
        vmem_cap = 64 * 1024 * 1024     # conservative (v7x-sized) fallback

    # VMEM footprint model for one grid program at tile height `tm`
    # (inputs/outputs are double-buffered by the BlockSpec pipeline; W/W^T are
    # resident; live covers x/lo/hi/g_x carries plus class-width temporaries).
    def tile_bytes(tm):
        resident = 2 * Dp * CPAD * 2 + CPAD * 4
        tile_in = 2 * (tm * Dp * 4 + tm * 1 * 4)
        tile_out = 2 * (2 * tm * CPAD * 4 + tm * Dp * 4)
        live = 5 * tm * Dp * 4 + 6 * tm * CPAD * 4
        return resident + tile_in + tile_out + live

    # Batch tiling: small batches are split so the "parallel" grid gets >= 2
    # entries (both v7x TensorCores busy); large batches use 256-row tiles,
    # halved when the footprint would press on a 64 MiB-VMEM part.
    if B <= 256:
        TM = max(8, _round_up(-(-B // 2), 8))
    else:
        TM = 256
        while TM > 128 and tile_bytes(TM) > (3 * vmem_cap) // 4:
            TM //= 2
    Bp = _round_up(B, TM)
    grid = (Bp // TM,)

    # TODO(synk): for ImageNet-scale D the resident W/W^T (~512*Dp bytes) plus
    # the (TM, Dp) live arrays overflow VMEM; that regime needs a Dp-tiled
    # inner pipeline (pltpu.emit_pipeline) instead of whole-Dp blocks.
    assert tile_bytes(TM) <= (3 * vmem_cap) // 4, (
        "flattened feature dim too large for the whole-Dp resident-weight design")

    vmem_limit = int(min((3 * vmem_cap) // 4,
                         max(16 * 1024 * 1024, tile_bytes(TM))))

    # ---- host-side padding / packing -----------------------------------------
    x0 = jnp.zeros((Bp, Dp), jnp.float32)
    x0 = x0.at[:B, :D].set(inputs.reshape(B, D).astype(jnp.float32))
    y = jnp.full((Bp, 1), -1, jnp.int32)                 # -1 => all-zero one-hot
    y = y.at[:B, 0].set(targets.astype(jnp.int32))
    w_pad = jnp.zeros((Dp, CPAD), jnp.bfloat16)
    w_pad = w_pad.at[:D, :num_classes].set(w.astype(jnp.bfloat16))
    wt_pad = jnp.zeros((CPAD, Dp), jnp.bfloat16)
    wt_pad = wt_pad.at[:num_classes, :D].set(w.T.astype(jnp.bfloat16))
    b_pad = jnp.zeros((1, CPAD), jnp.float32)
    b_pad = b_pad.at[:, :num_classes].set(
        b.astype(jnp.float32).reshape(1, num_classes))

    kernel = functools.partial(_attack_pgd_kernel,
                               num_steps=num_steps,
                               step_size=float(step_size),
                               epsilon=float(epsilon),
                               num_classes=num_classes)

    in_specs = [
        pl.BlockSpec((TM, Dp), lambda i: (i, 0)),      # x0 tile
        pl.BlockSpec((Dp, CPAD), lambda i: (0, 0)),    # W   (resident)
        pl.BlockSpec((CPAD, Dp), lambda i: (0, 0)),    # W^T (resident)
        pl.BlockSpec((1, CPAD), lambda i: (0, 0)),     # bias
        pl.BlockSpec((TM, 1), lambda i: (i, 0)),       # int32 targets tile
    ]
    out_specs = (
        pl.BlockSpec((TM, CPAD), lambda i: (i, 0)),    # logits_pert
        pl.BlockSpec((TM, CPAD), lambda i: (i, 0)),    # targets_prob
        pl.BlockSpec((TM, Dp), lambda i: (i, 0)),      # x_adv
    )
    out_shapes = (
        jax.ShapeDtypeStruct((Bp, CPAD), jnp.float32),
        jax.ShapeDtypeStruct((Bp, CPAD), jnp.float32),
        jax.ShapeDtypeStruct((Bp, Dp), jnp.float32),
    )

    # matmuls: natural fwd + peeled bwd + 2*(num_steps-1) + final fwd
    n_mm = (2 * num_steps + 1) if num_steps >= 1 else 2
    flops = 2 * n_mm * Bp * Dp * CPAD
    transcendentals = num_steps * Bp * CPAD + max(num_steps - 1, 0) * Bp
    bytes_accessed = (Bp * Dp * 4 + Bp * 4 + 2 * Dp * CPAD * 2 + CPAD * 4
                      + 2 * Bp * CPAD * 4 + Bp * Dp * 4)

    logits_pert_p, probs_p, x_adv_f = pl.pallas_call(
        kernel,
        grid=grid,
        out_shape=out_shapes,
        in_specs=in_specs,
        out_specs=out_specs,
        compiler_params=pltpu.CompilerParams(
            dimension_semantics=("parallel",),
            vmem_limit_bytes=vmem_limit),
        cost_estimate=pl.CostEstimate(flops=int(flops),
                                      transcendentals=int(transcendentals),
                                      bytes_accessed=int(bytes_accessed)),
    )(x0, w_pad, wt_pad, b_pad, y)

    logits_pert = logits_pert_p[:B, :num_classes]
    targets_prob = probs_p[:B, :num_classes]
    x_adv = x_adv_f[:B, :D].reshape(B, C, H, W_sp)
    # random_start=False => x_org == inputs; returned from the wrapper to avoid
    # a redundant (B, D) kernel output / HBM writeback.
    x_org = inputs
    return logits_pert, targets_prob, True, x_adv, x_org


if __name__ == "__main__":
    # Config analogous to the PyTorch module's `config` dict.
    config = dict(random_start=False, step_size=2.0 / 255.0,
                  epsilon=8.0 / 255.0, num_steps=5)
    NUM_CLASSES = 10

    B, C, H, W = 2, 4, 16, 16
    D = C * H * W

    key = jax.random.PRNGKey(0)
    k_x, k_w, k_b, k_t = jax.random.split(key, 4)
    # inputs normalized to [-1, 1] (the attack clamps to that range)
    inputs = jax.random.uniform(k_x, (B, C, H, W), jnp.float32,
                                minval=-1.0, maxval=1.0)
    # deterministic synthetic linear "basic_net" parameters
    w = jax.random.normal(k_w, (D, NUM_CLASSES), jnp.float32) * 0.05
    b = jax.random.normal(k_b, (NUM_CLASSES,), jnp.float32) * 0.01
    targets = jax.random.randint(k_t, (B,), 0, NUM_CLASSES, jnp.int32)

    logits_pert, targets_prob, ok, x_adv, x_org = attack_pgd_forward(
        inputs, targets, w, b,
        step_size=config["step_size"], epsilon=config["epsilon"],
        num_steps=config["num_steps"], num_classes=NUM_CLASSES)

    jax.block_until_ready((logits_pert, targets_prob, x_adv, x_org))

    assert logits_pert.shape == (B, NUM_CLASSES)
    assert targets_prob.shape == (B, NUM_CLASSES)
    assert x_adv.shape == inputs.shape and x_org.shape == inputs.shape
    # softmax output is a valid probability distribution
    assert float(jnp.max(jnp.abs(jnp.sum(targets_prob, axis=1) - 1.0))) < 1e-4
    # perturbation respects the epsilon ball and the [-1, 1] clamp
    assert float(jnp.max(jnp.abs(x_adv - inputs))) <= config["epsilon"] + 1e-5
    assert float(jnp.max(jnp.abs(x_adv))) <= 1.0 + 1e-6

    print("KERNEL_OK")
</pallas_src>

<mosaic_0001>
module attributes {stable_mosaic.version = 11 : i64} {
  func.func @_attack_pgd_kernel(%arg0: i32, %arg1: memref<8x1024xf32, #tpu.memory_space<vmem>>, %arg2: memref<1024x128xbf16, #tpu.memory_space<vmem>>, %arg3: memref<128x1024xbf16, #tpu.memory_space<vmem>>, %arg4: memref<1x128xf32, #tpu.memory_space<vmem>>, %arg5: memref<8x1xi32, #tpu.memory_space<vmem>>, %arg6: memref<8x128xf32, #tpu.memory_space<vmem>>, %arg7: memref<8x128xf32, #tpu.memory_space<vmem>>, %arg8: memref<8x1024xf32, #tpu.memory_space<vmem>>) attributes {dimension_semantics = [#tpu.dimension_semantics<parallel>], iteration_bounds = array<i64: 1>, scalar_prefetch = 0 : i64, scratch_operands = 0 : i64, tpu.core_type = #tpu.core_type<tc>, window_params = [{transform_indices = @transform_0, window_bounds = array<i64: 8, 1024>}, {pipeline_mode = #tpu.pipeline_mode<synchronous>, transform_indices = @transform_1, window_bounds = array<i64: 1024, 128>}, {pipeline_mode = #tpu.pipeline_mode<synchronous>, transform_indices = @transform_2, window_bounds = array<i64: 128, 1024>}, {pipeline_mode = #tpu.pipeline_mode<synchronous>, transform_indices = @transform_3, window_bounds = array<i64: 1, 128>}, {transform_indices = @transform_4, window_bounds = array<i64: 8, 1>}, {transform_indices = @transform_5, window_bounds = array<i64: 8, 128>}, {transform_indices = @transform_6, window_bounds = array<i64: 8, 128>}, {transform_indices = @transform_7, window_bounds = array<i64: 8, 1024>}]} {
    %c0 = arith.constant 0 : index
    %c0_0 = arith.constant 0 : index
    %0 = vector.load %arg1[%c0, %c0_0] : memref<8x1024xf32, #tpu.memory_space<vmem>>, vector<8x1024xf32>
    %c0_1 = arith.constant 0 : index
    %c0_2 = arith.constant 0 : index
    %1 = vector.load %arg2[%c0_1, %c0_2] : memref<1024x128xbf16, #tpu.memory_space<vmem>>, vector<1024x128xbf16>
    %c0_3 = arith.constant 0 : index
    %c0_4 = arith.constant 0 : index
    %2 = vector.load %arg3[%c0_3, %c0_4] : memref<128x1024xbf16, #tpu.memory_space<vmem>>, vector<128x1024xbf16>
    %c0_5 = arith.constant 0 : index
    %c0_6 = arith.constant 0 : index
    %3 = vector.load %arg5[%c0_5, %c0_6] : memref<8x1xi32, #tpu.memory_space<vmem>>, vector<8x1xi32>
    %c0_7 = arith.constant 0 : index
    %c0_8 = arith.constant 0 : index
    %4 = vector.load %arg4[%c0_7, %c0_8] : memref<1x128xf32, #tpu.memory_space<vmem>>, vector<1x128xf32>
    %5 = vector.shape_cast %4 : vector<1x128xf32> to vector<1x128xf32>
    %6 = vector.broadcast %5 : vector<1x128xf32> to vector<8x128xf32>
    %7 = tpu.iota {dimensions = array<i32: 1>} : vector<8x128xi32>
    %c10_i32 = arith.constant 10 : i32
    %8 = vector.broadcast %c10_i32 : i32 to vector<8x128xi32>
    %9 = arith.cmpi slt, %7, %8 : vector<8x128xi32>
    %10 = vector.broadcast %3 : vector<8x1xi32> to vector<8x128xi32>
    %11 = arith.cmpi eq, %7, %10 : vector<8x128xi32>
    %cst = arith.constant 1.000000e+00 : f32
    %cst_9 = arith.constant 0.000000e+00 : f32
    %12 = vector.broadcast %cst : f32 to vector<8x128xf32>
    %13 = vector.broadcast %cst_9 : f32 to vector<8x128xf32>
    %14 = arith.select %11, %12, %13 : vector<8x128xi1>, vector<8x128xf32>
    %cst_10 = arith.constant 0.0313725509 : f32
    %15 = vector.broadcast %cst_10 : f32 to vector<8x1024xf32>
    %16 = arith.subf %0, %15 : vector<8x1024xf32>
    %cst_11 = arith.constant -1.000000e+00 : f32
    %17 = vector.broadcast %cst_11 : f32 to vector<8x1024xf32>
    %18 = arith.maximumf %16, %17 : vector<8x1024xf32>
    %cst_12 = arith.constant 0.0313725509 : f32
    %19 = vector.broadcast %cst_12 : f32 to vector<8x1024xf32>
    %20 = arith.addf %0, %19 : vector<8x1024xf32>
    %cst_13 = arith.constant 1.000000e+00 : f32
    %21 = vector.broadcast %cst_13 : f32 to vector<8x1024xf32>
    %22 = arith.minimumf %20, %21 : vector<8x1024xf32>
    %23 = arith.truncf %0 : vector<8x1024xf32> to vector<8x1024xbf16>
    %cst_14 = arith.constant dense<0.000000e+00> : vector<8x128xf32>
    %24 = tpu.matmul %23, %1, %cst_14 {dimension_numbers = #tpu.dot_dimension_numbers<[1], [0], [0], [1], [0, 0, 1, 1], [], []>} : vector<8x1024xbf16>, vector<1024x128xbf16>, vector<8x128xf32> -> vector<8x128xf32>
    %25 = arith.addf %24, %6 : vector<8x128xf32>
    %cst_15 = arith.constant -1.000000e+30 : f32
    %26 = vector.broadcast %cst_15 : f32 to vector<8x128xf32>
    %27 = arith.select %9, %25, %26 : vector<8x128xi1>, vector<8x128xf32>
    %cst_16 = arith.constant dense<0xFF800000> : vector<8xf32>
    %28 = vector.multi_reduction <maximumf>, %27, %cst_16 [1] : vector<8x128xf32> to vector<8xf32>
    %29 = vector.shape_cast %28 : vector<8xf32> to vector<8x1xf32>
    %30 = vector.broadcast %29 : vector<8x1xf32> to vector<8x128xf32>
    %31 = arith.subf %27, %30 : vector<8x128xf32>
    %32 = math.exp %31 : vector<8x128xf32>
    %cst_17 = arith.constant 0.000000e+00 : f32
    %33 = vector.broadcast %cst_17 : f32 to vector<8x128xf32>
    %34 = arith.select %9, %32, %33 : vector<8x128xi1>, vector<8x128xf32>
    %cst_18 = arith.constant dense<0.000000e+00> : vector<8xf32>
    %35 = vector.multi_reduction <add>, %34, %cst_18 [1] : vector<8x128xf32> to vector<8xf32>
    %36 = vector.shape_cast %35 : vector<8xf32> to vector<8x1xf32>
    %37 = vector.broadcast %36 : vector<8x1xf32> to vector<8x128xf32>
    %38 = arith.divf %34, %37 : vector<8x128xf32>
    %c0_19 = arith.constant 0 : index
    %c0_20 = arith.constant 0 : index
    %39 = vector.load %arg7[%c0_19, %c0_20] : memref<8x128xf32, #tpu.memory_space<vmem>>, vector<8x128xf32>
    tpu.vector_store %arg7[%c0_19, %c0_20], %38 {strides = array<i32>} : memref<8x128xf32, #tpu.memory_space<vmem>>, vector<8x128xf32>,
    %40 = arith.subf %38, %14 : vector<8x128xf32>
    %41 = arith.truncf %40 : vector<8x128xf32> to vector<8x128xbf16>
    %cst_21 = arith.constant dense<0.000000e+00> : vector<8x1024xf32>
    %42 = tpu.matmul %41, %2, %cst_21 {dimension_numbers = #tpu.dot_dimension_numbers<[1], [0], [0], [1], [0, 0, 1, 1], [], []>} : vector<8x128xbf16>, vector<128x1024xbf16>, vector<8x1024xf32> -> vector<8x1024xf32>
    %cst_22 = arith.constant 0.000000e+00 : f32
    %43 = vector.broadcast %cst_22 : f32 to vector<8x1024xf32>
    %44 = arith.cmpf oge, %42, %43 : vector<8x1024xf32>
    %cst_23 = arith.constant 0.000000e+00 : f32
    %cst_24 = arith.constant 0.00784313772 : f32
    %45 = arith.subf %cst_23, %cst_24 : f32
    %cst_25 = arith.constant 0.00784313772 : f32
    %46 = vector.broadcast %cst_25 : f32 to vector<8x1024xf32>
    %47 = vector.broadcast %45 : f32 to vector<8x1024xf32>
    %48 = arith.select %44, %46, %47 : vector<8x1024xi1>, vector<8x1024xf32>
    %49 = arith.addf %0, %48 : vector<8x1024xf32>
    %50 = arith.maximumf %49, %18 : vector<8x1024xf32>
    %51 = arith.minimumf %50, %22 : vector<8x1024xf32>
    %cst_26 = arith.constant -1.000000e+30 : f32
    %cst_27 = arith.constant 0.00784313772 : f32
    %c0_i32 = arith.constant 0 : i32
    %52 = arith.truncf %51 : vector<8x1024xf32> to vector<8x1024xbf16>
    %cst_28 = arith.constant dense<0.000000e+00> : vector<8x128xf32>
    %53 = tpu.matmul %52, %1, %cst_28 {dimension_numbers = #tpu.dot_dimension_numbers<[1], [0], [0], [1], [0, 0, 1, 1], [], []>} : vector<8x1024xbf16>, vector<1024x128xbf16>, vector<8x128xf32> -> vector<8x128xf32>
    %54 = arith.addf %53, %6 : vector<8x128xf32>
    %55 = vector.broadcast %cst_26 : f32 to vector<8x128xf32>
    %56 = arith.select %9, %54, %55 : vector<8x128xi1>, vector<8x128xf32>
    %cst_29 = arith.constant dense<0xFF800000> : vector<8xf32>
    %57 = vector.multi_reduction <maximumf>, %56, %cst_29 [1] : vector<8x128xf32> to vector<8xf32>
    %58 = vector.shape_cast %57 : vector<8xf32> to vector<8x1xf32>
    %59 = vector.broadcast %58 : vector<8x1xf32> to vector<8x128xf32>
    %60 = arith.subf %56, %59 : vector<8x128xf32>
    %61 = math.exp %60 : vector<8x128xf32>
    %cst_30 = arith.constant 0.000000e+00 : f32
    %62 = vector.broadcast %cst_30 : f32 to vector<8x128xf32>
    %63 = arith.select %9, %61, %62 : vector<8x128xi1>, vector<8x128xf32>
    %cst_31 = arith.constant dense<0.000000e+00> : vector<8xf32>
    %64 = vector.multi_reduction <add>, %63, %cst_31 [1] : vector<8x128xf32> to vector<8xf32>
    %65 = vector.shape_cast %64 : vector<8xf32> to vector<8x1xf32>
    %66 = tpu.reciprocal %65 {approx = true} : vector<8x1xf32> -> vector<8x1xf32>
    %67 = vector.broadcast %66 : vector<8x1xf32> to vector<8x128xf32>
    %68 = arith.mulf %63, %67 : vector<8x128xf32>
    %69 = arith.subf %68, %14 : vector<8x128xf32>
    %70 = arith.truncf %69 : vector<8x128xf32> to vector<8x128xbf16>
    %cst_32 = arith.constant dense<0.000000e+00> : vector<8x1024xf32>
    %71 = tpu.matmul %70, %2, %cst_32 {dimension_numbers = #tpu.dot_dimension_numbers<[1], [0], [0], [1], [0, 0, 1, 1], [], []>} : vector<8x128xbf16>, vector<128x1024xbf16>, vector<8x1024xf32> -> vector<8x1024xf32>
    %cst_33 = arith.constant 0.000000e+00 : f32
    %72 = vector.broadcast %cst_33 : f32 to vector<8x1024xf32>
    %73 = arith.cmpf oge, %71, %72 : vector<8x1024xf32>
    %cst_34 = arith.constant 0.000000e+00 : f32
    %74 = arith.subf %cst_34, %cst_27 : f32
    %75 = vector.broadcast %cst_27 : f32 to vector<8x1024xf32>
    %76 = vector.broadcast %74 : f32 to vector<8x1024xf32>
    %77 = arith.select %73, %75, %76 : vector<8x1024xi1>, vector<8x1024xf32>
    %78 = arith.addf %51, %77 : vector<8x1024xf32>
    %79 = arith.maximumf %78, %18 : vector<8x1024xf32>
    %80 = arith.minimumf %79, %22 : vector<8x1024xf32>
    %c1_i32 = arith.constant 1 : i32
    %81 = arith.truncf %80 : vector<8x1024xf32> to vector<8x1024xbf16>
    %cst_35 = arith.constant dense<0.000000e+00> : vector<8x128xf32>
    %82 = tpu.matmul %81, %1, %cst_35 {dimension_numbers = #tpu.dot_dimension_numbers<[1], [0], [0], [1], [0, 0, 1, 1], [], []>} : vector<8x1024xbf16>, vector<1024x128xbf16>, vector<8x128xf32> -> vector<8x128xf32>
    %83 = arith.addf %82, %6 : vector<8x128xf32>
    %84 = vector.broadcast %cst_26 : f32 to vector<8x128xf32>
    %85 = arith.select %9, %83, %84 : vector<8x128xi1>, vector<8x128xf32>
    %cst_36 = arith.constant dense<0xFF800000> : vector<8xf32>
    %86 = vector.multi_reduction <maximumf>, %85, %cst_36 [1] : vector<8x128xf32> to vector<8xf32>
    %87 = vector.shape_cast %86 : vector<8xf32> to vector<8x1xf32>
    %88 = vector.broadcast %87 : vector<8x1xf32> to vector<8x128xf32>
    %89 = arith.subf %85, %88 : vector<8x128xf32>
    %90 = math.exp %89 : vector<8x128xf32>
    %cst_37 = arith.constant 0.000000e+00 : f32
    %91 = vector.broadcast %cst_37 : f32 to vector<8x128xf32>
    %92 = arith.select %9, %90, %91 : vector<8x128xi1>, vector<8x128xf32>
    %cst_38 = arith.constant dense<0.000000e+00> : vector<8xf32>
    %93 = vector.multi_reduction <add>, %92, %cst_38 [1] : vector<8x128xf32> to vector<8xf32>
    %94 = vector.shape_cast %93 : vector<8xf32> to vector<8x1xf32>
    %95 = tpu.reciprocal %94 {approx = true} : vector<8x1xf32> -> vector<8x1xf32>
    %96 = vector.broadcast %95 : vector<8x1xf32> to vector<8x128xf32>
    %97 = arith.mulf %92, %96 : vector<8x128xf32>
    %98 = arith.subf %97, %14 : vector<8x128xf32>
    %99 = arith.truncf %98 : vector<8x128xf32> to vector<8x128xbf16>
    %cst_39 = arith.constant dense<0.000000e+00> : vector<8x1024xf32>
    %100 = tpu.matmul %99, %2, %cst_39 {dimension_numbers = #tpu.dot_dimension_numbers<[1], [0], [0], [1], [0, 0, 1, 1], [], []>} : vector<8x128xbf16>, vector<128x1024xbf16>, vector<8x1024xf32> -> vector<8x1024xf32>
    %cst_40 = arith.constant 0.000000e+00 : f32
    %101 = vector.broadcast %cst_40 : f32 to vector<8x1024xf32>
    %102 = arith.cmpf oge, %100, %101 : vector<8x1024xf32>
    %cst_41 = arith.constant 0.000000e+00 : f32
    %103 = arith.subf %cst_41, %cst_27 : f32
    %104 = vector.broadcast %cst_27 : f32 to vector<8x1024xf32>
    %105 = vector.broadcast %103 : f32 to vector<8x1024xf32>
    %106 = arith.select %102, %104, %105 : vector<8x1024xi1>, vector<8x1024xf32>
    %107 = arith.addf %80, %106 : vector<8x1024xf32>
    %108 = arith.maximumf %107, %18 : vector<8x1024xf32>
    %109 = arith.minimumf %108, %22 : vector<8x1024xf32>
    %c2_i32 = arith.constant 2 : i32
    %110 = arith.truncf %109 : vector<8x1024xf32> to vector<8x1024xbf16>
    %cst_42 = arith.constant dense<0.000000e+00> : vector<8x128xf32>
    %111 = tpu.matmul %110, %1, %cst_42 {dimension_numbers = #tpu.dot_dimension_numbers<[1], [0], [0], [1], [0, 0, 1, 1], [], []>} : vector<8x1024xbf16>, vector<1024x128xbf16>, vector<8x128xf32> -> vector<8x128xf32>
    %112 = arith.addf %111, %6 : vector<8x128xf32>
    %113 = vector.broadcast %cst_26 : f32 to vector<8x128xf32>
    %114 = arith.select %9, %112, %113 : vector<8x128xi1>, vector<8x128xf32>
    %cst_43 = arith.constant dense<0xFF800000> : vector<8xf32>
    %115 = vector.multi_reduction <maximumf>, %114, %cst_43 [1] : vector<8x128xf32> to vector<8xf32>
    %116 = vector.shape_cast %115 : vector<8xf32> to vector<8x1xf32>
    %117 = vector.broadcast %116 : vector<8x1xf32> to vector<8x128xf32>
    %118 = arith.subf %114, %117 : vector<8x128xf32>
    %119 = math.exp %118 : vector<8x128xf32>
    %cst_44 = arith.constant 0.000000e+00 : f32
    %120 = vector.broadcast %cst_44 : f32 to vector<8x128xf32>
    %121 = arith.select %9, %119, %120 : vector<8x128xi1>, vector<8x128xf32>
    %cst_45 = arith.constant dense<0.000000e+00> : vector<8xf32>
    %122 = vector.multi_reduction <add>, %121, %cst_45 [1] : vector<8x128xf32> to vector<8xf32>
    %123 = vector.shape_cast %122 : vector<8xf32> to vector<8x1xf32>
    %124 = tpu.reciprocal %123 {approx = true} : vector<8x1xf32> -> vector<8x1xf32>
    %125 = vector.broadcast %124 : vector<8x1xf32> to vector<8x128xf32>
    %126 = arith.mulf %121, %125 : vector<8x128xf32>
    %127 = arith.subf %126, %14 : vector<8x128xf32>
    %128 = arith.truncf %127 : vector<8x128xf32> to vector<8x128xbf16>
    %cst_46 = arith.constant dense<0.000000e+00> : vector<8x1024xf32>
    %129 = tpu.matmul %128, %2, %cst_46 {dimension_numbers = #tpu.dot_dimension_numbers<[1], [0], [0], [1], [0, 0, 1, 1], [], []>} : vector<8x128xbf16>, vector<128x1024xbf16>, vector<8x1024xf32> -> vector<8x1024xf32>
    %cst_47 = arith.constant 0.000000e+00 : f32
    %130 = vector.broadcast %cst_47 : f32 to vector<8x1024xf32>
    %131 = arith.cmpf oge, %129, %130 : vector<8x1024xf32>
    %cst_48 = arith.constant 0.000000e+00 : f32
    %132 = arith.subf %cst_48, %cst_27 : f32
    %133 = vector.broadcast %cst_27 : f32 to vector<8x1024xf32>
    %134 = vector.broadcast %132 : f32 to vector<8x1024xf32>
    %135 = arith.select %131, %133, %134 : vector<8x1024xi1>, vector<8x1024xf32>
    %136 = arith.addf %109, %135 : vector<8x1024xf32>
    %137 = arith.maximumf %136, %18 : vector<8x1024xf32>
    %138 = arith.minimumf %137, %22 : vector<8x1024xf32>
    %c3_i32 = arith.constant 3 : i32
    %139 = arith.truncf %138 : vector<8x1024xf32> to vector<8x1024xbf16>
    %cst_49 = arith.constant dense<0.000000e+00> : vector<8x128xf32>
    %140 = tpu.matmul %139, %1, %cst_49 {dimension_numbers = #tpu.dot_dimension_numbers<[1], [0], [0], [1], [0, 0, 1, 1], [], []>} : vector<8x1024xbf16>, vector<1024x128xbf16>, vector<8x128xf32> -> vector<8x128xf32>
    %141 = arith.addf %140, %6 : vector<8x128xf32>
    %142 = vector.broadcast %cst_26 : f32 to vector<8x128xf32>
    %143 = arith.select %9, %141, %142 : vector<8x128xi1>, vector<8x128xf32>
    %cst_50 = arith.constant dense<0xFF800000> : vector<8xf32>
    %144 = vector.multi_reduction <maximumf>, %143, %cst_50 [1] : vector<8x128xf32> to vector<8xf32>
    %145 = vector.shape_cast %144 : vector<8xf32> to vector<8x1xf32>
    %146 = vector.broadcast %145 : vector<8x1xf32> to vector<8x128xf32>
    %147 = arith.subf %143, %146 : vector<8x128xf32>
    %148 = math.exp %147 : vector<8x128xf32>
    %cst_51 = arith.constant 0.000000e+00 : f32
    %149 = vector.broadcast %cst_51 : f32 to vector<8x128xf32>
    %150 = arith.select %9, %148, %149 : vector<8x128xi1>, vector<8x128xf32>
    %cst_52 = arith.constant dense<0.000000e+00> : vector<8xf32>
    %151 = vector.multi_reduction <add>, %150, %cst_52 [1] : vector<8x128xf32> to vector<8xf32>
    %152 = vector.shape_cast %151 : vector<8xf32> to vector<8x1xf32>
    %153 = tpu.reciprocal %152 {approx = true} : vector<8x1xf32> -> vector<8x1xf32>
    %154 = vector.broadcast %153 : vector<8x1xf32> to vector<8x128xf32>
    %155 = arith.mulf %150, %154 : vector<8x128xf32>
    %156 = arith.subf %155, %14 : vector<8x128xf32>
    %157 = arith.truncf %156 : vector<8x128xf32> to vector<8x128xbf16>
    %cst_53 = arith.constant dense<0.000000e+00> : vector<8x1024xf32>
    %158 = tpu.matmul %157, %2, %cst_53 {dimension_numbers = #tpu.dot_dimension_numbers<[1], [0], [0], [1], [0, 0, 1, 1], [], []>} : vector<8x128xbf16>, vector<128x1024xbf16>, vector<8x1024xf32> -> vector<8x1024xf32>
    %cst_54 = arith.constant 0.000000e+00 : f32
    %159 = vector.broadcast %cst_54 : f32 to vector<8x1024xf32>
    %160 = arith.cmpf oge, %158, %159 : vector<8x1024xf32>
    %cst_55 = arith.constant 0.000000e+00 : f32
    %161 = arith.subf %cst_55, %cst_27 : f32
    %162 = vector.broadcast %cst_27 : f32 to vector<8x1024xf32>
    %163 = vector.broadcast %161 : f32 to vector<8x1024xf32>
    %164 = arith.select %160, %162, %163 : vector<8x1024xi1>, vector<8x1024xf32>
    %165 = arith.addf %138, %164 : vector<8x1024xf32>
    %166 = arith.maximumf %165, %18 : vector<8x1024xf32>
    %167 = arith.minimumf %166, %22 : vector<8x1024xf32>
    %c0_56 = arith.constant 0 : index
    %c0_57 = arith.constant 0 : index
    %168 = vector.load %arg8[%c0_56, %c0_57] : memref<8x1024xf32, #tpu.memory_space<vmem>>, vector<8x1024xf32>
    tpu.vector_store %arg8[%c0_56, %c0_57], %167 {strides = array<i32>} : memref<8x1024xf32, #tpu.memory_space<vmem>>, vector<8x1024xf32>,
    %169 = arith.truncf %167 : vector<8x1024xf32> to vector<8x1024xbf16>
    %cst_58 = arith.constant dense<0.000000e+00> : vector<8x128xf32>
    %170 = tpu.matmul %169, %1, %cst_58 {dimension_numbers = #tpu.dot_dimension_numbers<[1], [0], [0], [1], [0, 0, 1, 1], [], []>} : vector<8x1024xbf16>, vector<1024x128xbf16>, vector<8x128xf32> -> vector<8x128xf32>
    %171 = arith.addf %170, %6 : vector<8x128xf32>
    %c0_59 = arith.constant 0 : index
    %c0_60 = arith.constant 0 : index
    %172 = vector.load %arg6[%c0_59, %c0_60] : memref<8x128xf32, #tpu.memory_space<vmem>>, vector<8x128xf32>
    tpu.vector_store %arg6[%c0_59, %c0_60], %171 {strides = array<i32>} : memref<8x128xf32, #tpu.memory_space<vmem>>, vector<8x128xf32>,
    return
  }
  func.func @transform_0(%arg0: i32) -> (i32, i32) {
    %c0_i32 = arith.constant 0 : i32
    %c0_i32_0 = arith.constant 0 : i32
    return %arg0, %c0_i32 : i32, i32
  }
  func.func @transform_1(%arg0: i32) -> (i32, i32) {
    %c0_i32 = arith.constant 0 : i32
    %c0_i32_0 = arith.constant 0 : i32
    %c0_i32_1 = arith.constant 0 : i32
    return %c0_i32, %c0_i32_0 : i32, i32
  }
  func.func @transform_2(%arg0: i32) -> (i32, i32) {
    %c0_i32 = arith.constant 0 : i32
    %c0_i32_0 = arith.constant 0 : i32
    %c0_i32_1 = arith.constant 0 : i32
    return %c0_i32, %c0_i32_0 : i32, i32
  }
  func.func @transform_3(%arg0: i32) -> (i32, i32) {
    %c0_i32 = arith.constant 0 : i32
    %c0_i32_0 = arith.constant 0 : i32
    %c0_i32_1 = arith.constant 0 : i32
    return %c0_i32, %c0_i32_0 : i32, i32
  }
  func.func @transform_4(%arg0: i32) -> (i32, i32) {
    %c0_i32 = arith.constant 0 : i32
    %c0_i32_0 = arith.constant 0 : i32
    return %arg0, %c0_i32 : i32, i32
  }
  func.func @transform_5(%arg0: i32) -> (i32, i32) {
    %c0_i32 = arith.constant 0 : i32
    %c0_i32_0 = arith.constant 0 : i32
    return %arg0, %c0_i32 : i32, i32
  }
  func.func @transform_6(%arg0: i32) -> (i32, i32) {
    %c0_i32 = arith.constant 0 : i32
    %c0_i32_0 = arith.constant 0 : i32
    return %arg0, %c0_i32 : i32, i32
  }
  func.func @transform_7(%arg0: i32) -> (i32, i32) {
    %c0_i32 = arith.constant 0 : i32
    %c0_i32_0 = arith.constant 0 : i32
    return %arg0, %c0_i32 : i32, i32
  }
}

</mosaic_0001>

<bundles_post_ra>
// kernel: tpu_custom_call.1
= control target key start
LH: loop header
LB: loop body
LE: loop exit
PB: predicated region body
PF: predicated region fallthrough
CT: control target
= control target key end

     0   :  { %13 = vsyncpa [#allocation3], 0  ;;  %s5037_s0 = inlined_call_operand.hbm [shape: f32[8,1024], index: 0, kind: input, shape index: {}]   ;;  %s5038_s1 = inlined_call_operand.hbm [shape: bf16[1024,128], index: 1, kind: input, shape index: {}]   ;;  %s5039_s2 = inlined_call_operand.hbm [shape: bf16[128,1024], index: 2, kind: input, shape index: {}]   ;;  %s5040_s3 = inlined_call_operand.vmem [shape: f32[1,128], index: 3, kind: input, shape index: {}]   ;;  %s5041_s4 = inlined_call_operand.vmem [shape: s32[8,1], index: 4, kind: input, shape index: {}]   ;;  %s5042_s5 = inlined_call_operand.hbm [shape: f32[8,128], index: 5, kind: output, shape index: {0}]   ;;  %s5043_s6 = inlined_call_operand.hbm [shape: f32[8,128], index: 6, kind: output, shape index: {1}]   ;;  %s5044_s7 = inlined_call_operand.hbm [shape: f32[8,1024], index: 7, kind: output, shape index: {2}]  }
   0x1   :  { %14 = vsyncpa [#allocation6], 0 }
   0x2   :  { %15 = vsyncpa [#allocation4], 0  ;;  %s32_s26 = sshll.u32 %s5038_s1, 4  ;;  %s33_s26 = int_to_ptr.hbm [resolvable:$true] %s32_s26 }
   0x3   :  { %16 = vsyncpa [#allocation10], 0  ;;  %s3516_s27 = smov [#allocation5]   ;;  %s22_s8 = sshll.u32 %s5037_s0, 4  ;;  %s23_s8 = int_to_ptr.hbm [resolvable:$true] %s22_s8 }
   0x4   :  { %s34_s28 = sshll.u32 %s3516_s27, 4  ;;  %s3517_s9 = smov 64   ;;  %s35_s28 = int_to_ptr.vmem [resolvable:$true] %s34_s28 }
   0x5   :  { %s3518_s10 = smov 4   ;;  %s3519_s11 = smov [#allocation2]  }
   0x6   :  { %40 = dma.hbm_to_vmem [thread:$0]  %s33_s26, 8192, %s35_s28, [#allocation6], %s3517_s9, %s3517_s9, %s3518_s10  }
   0x7   :  { %s24_s12 = sshll.u32 %s3519_s11, 4  ;;  %s45_s15 = sshll.u32 %s5039_s2, 4  ;;  %s25_s12 = int_to_ptr.vmem [resolvable:$true] %s24_s12  ;;  %s46_s15 = int_to_ptr.hbm [resolvable:$true] %s45_s15 }
   0x8   :  { %27 = dma.hbm_to_vmem [thread:$0]  %s23_s8, 1024, %s25_s12, [#allocation3]  }
   0x9   :  { %s3520_s1 = smov [#allocation7]   ;;  %s3521_s17 = smov 512  }
   0xa   :  { %s47_s16 = sshll.u32 %s3520_s1, 4  ;;  %s3522_s18 = smov 32   ;;  %s48_s16 = int_to_ptr.vmem [resolvable:$true] %s47_s16 }
   0xb   :  { %53 = dma.hbm_to_vmem [thread:$0]  %s46_s15, 8192, %s48_s16, [#allocation6], %s3521_s17, %s3521_s17, %s3522_s18  }
   0xc   :  { %3508 = dma.done.wait [#allocation3], 1024  }
   0xd   :  { %3509 = vsyncadd [#allocation3], 4294966272 }
   0xe   :  { %3510 = dma.done.wait [#allocation6], 16384  }
   0xf   :  { %3511 = vsyncadd [#allocation6], 4294950912  ;;  %v3578_v0 = vld [vmem:[#allocation5 + $0x38] sm:$0xff]  ;;  %v3588_v4 = vld [vmem:[#allocation5 + $0x30] sm:$0xff]  ;;  %s2517_s25 = sshll.u32 %s5043_s6, 4  ;;  %s3526_s26 = smov [#allocation9]   ;;  %s2518_s25 = int_to_ptr.hbm [resolvable:$true] %s2517_s25 }
  0x10   :  { %v3580_v1 = vld [vmem:[#allocation5 + $0x78] sm:$0xff]  ;;  %707 = vmatpush.bf16.msra.mxu0 %v3578_v0  ;;  %v3590_v5 = vld [vmem:[#allocation5 + $0x70] sm:$0xff]  ;;  %v3600_v8 = vld [vmem:[#allocation5 + $0x28] sm:$0xff]  ;;  %s2515_s27 = sshll.u32 %s3526_s26, 4  ;;  %s2528_s30 = sshll.u32 %s5044_s7, 4  ;;  %s2516_s27 = int_to_ptr.vmem [resolvable:$true] %s2515_s27  ;;  %s2529_s30 = int_to_ptr.hbm [resolvable:$true] %s2528_s30 }
  0x11   :  { %v3582_v2 = vld [vmem:[#allocation5 + $0xb8] sm:$0xff]  ;;  %720 = vmatpush.bf16.msra.mxu1 %v3580_v1  ;;  %v3594_v6 = vld [vmem:[#allocation5 + $0xb0] sm:$0xff]  ;;  %v3602_v9 = vld [vmem:[#allocation5 + $0x68] sm:$0xff]  ;;  %s3527_s8 = smov [#allocation11]   ;;  %s3528_s6 = smov [#allocation8]  }
  0x12   :  { %v3584_v3 = vld [vmem:[#allocation5 + $0xf8] sm:$0xff]  ;;  %733 = vmatpush.bf16.msra.mxu2 %v3582_v2  ;;  %v3596_v7 = vld [vmem:[#allocation5 + $0xf0] sm:$0xff]  ;;  %v3606_v10 = vld [vmem:[#allocation5 + $0xa8] sm:$0xff]  ;;  %s2526_s9 = sshll.u32 %s3527_s8, 4  ;;  %s2504_s7 = sshll.u32 %s3528_s6, 4  ;;  %s2527_s9 = int_to_ptr.vmem [resolvable:$true] %s2526_s9  ;;  %s2505_s7 = int_to_ptr.vmem [resolvable:$true] %s2504_s7 }
  0x13   :  { %746 = vmatpush.bf16.msra.mxu3 %v3584_v3  ;;  %v3608_v11 = vld [vmem:[#allocation5 + $0xe8] sm:$0xff]  ;;  %v3612_v12 = vld [vmem:[#allocation5 + $0x20] sm:$0xff]  ;;  %v3624_v16 = vld [vmem:[#allocation5 + $0x18] sm:$0xff]  ;;  %s2506_s12 = sshll.u32 %s5042_s5, 4  ;;  %s2507_s12 = int_to_ptr.hbm [resolvable:$true] %s2506_s12 }
  0x14   :  { %708 = vmatpush.bf16.msra.mxu0 %v3588_v4  ;;  %v3614_v13 = vld [vmem:[#allocation5 + $0x60] sm:$0xff]  ;;  %v3626_v17 = vld [vmem:[#allocation5 + $0x58] sm:$0xff]  ;;  %v3636_v20 = vld [vmem:[#allocation5 + $0x10] sm:$0xff] }
  0x15   :  { %721 = vmatpush.bf16.msra.mxu1 %v3590_v5  ;;  %v3618_v14 = vld [vmem:[#allocation5 + $0xa0] sm:$0xff]  ;;  %v3630_v18 = vld [vmem:[#allocation5 + $0x98] sm:$0xff]  ;;  %v3638_v21 = vld [vmem:[#allocation5 + $0x50] sm:$0xff] }
  0x16   :  { %734 = vmatpush.bf16.msra.mxu2 %v3594_v6  ;;  %v3620_v15 = vld [vmem:[#allocation5 + $0xe0] sm:$0xff]  ;;  %v3632_v19 = vld [vmem:[#allocation5 + $0xd8] sm:$0xff]  ;;  %v3642_v22 = vld [vmem:[#allocation5 + $0x90] sm:$0xff] }
  0x17   :  { %747 = vmatpush.bf16.msra.mxu3 %v3596_v7  ;;  %v3644_v23 = vld [vmem:[#allocation5 + $0xd0] sm:$0xff]  ;;  %v3648_v24 = vld [vmem:[#allocation5 + $0x8] sm:$0xff]  ;;  %v3658_v28 = vld [vmem:[#allocation5] sm:$0xff] }
  0x18   :  { %709 = vmatpush.bf16.msra.mxu0 %v3600_v8  ;;  %v3650_v25 = vld [vmem:[#allocation5 + $0x48] sm:$0xff]  ;;  %v3662_v29 = vld [vmem:[#allocation5 + $0x40] sm:$0xff]  ;;  %v3670_v32 = vld [vmem:[#allocation5 + $0x138] sm:$0xff] }
  0x19   :  { %722 = vmatpush.bf16.msra.mxu1 %v3602_v9  ;;  %v3654_v26 = vld [vmem:[#allocation5 + $0x88] sm:$0xff]  ;;  %v3664_v30 = vld [vmem:[#allocation5 + $0x80] sm:$0xff]  ;;  %v3672_v33 = vld [vmem:[#allocation2 + $0x10] sm:$0xff] }
  0x1a   :  { %735 = vmatpush.bf16.msra.mxu2 %v3606_v10  ;;  %v3656_v27 = vld [vmem:[#allocation5 + $0xc8] sm:$0xff]  ;;  %v3666_v31 = vld [vmem:[#allocation5 + $0xc0] sm:$0xff]  ;;  %5355 = vst [vmem:[#allocation16_spill] sm:$0xff] %v3672_v33  ;;  %v3676_v35 = vld [vmem:[#allocation5 + $0x178] sm:$0xff]  ;;  %v317_v40 = vpack.c.bf16 %v3672_v33, %v3672_v33 }
  0x1b   :  { %748 = vmatpush.bf16.msra.mxu3 %v3608_v11  ;;  %v3674_v34 = vld [vmem:[#allocation2] sm:$0xff]  ;;  %v3678_v36 = vld [vmem:[#allocation2 + $0x18] sm:$0xff]  ;;  %v3680_v37 = vld [vmem:[#allocation2 + $0x8] sm:$0xff] }
  0x1c   :  { %710 = vmatpush.bf16.msra.mxu0 %v3612_v12  ;;  %5356 = vst [vmem:[#allocation17_spill] sm:$0xff] %v3674_v34  ;;  %v3682_v38 = vld [vmem:[#allocation5 + $0x1b8] sm:$0xff]  ;;  %v315_v41 = vpack.c.bf16 %v3674_v34, %v3674_v34  ;;  %v318_v42 = vpack.c.bf16 %v3678_v36, %v3678_v36  ;;  %v316_v43 = vpack.c.bf16 %v3680_v37, %v3680_v37  ;;  %v3700_v44 = vld [vmem:[#allocation5 + $0x130] sm:$0xff]  ;;  %v3712_v48 = vld [vmem:[#allocation5 + $0x128] sm:$0xff] }
  0x1d   :  { %723 = vmatpush.bf16.msra.mxu1 %v3614_v13  ;;  %5357 = vst [vmem:[#allocation18_spill] sm:$0xff] %v3678_v36  ;;  %v3684_v39 = vld [vmem:[#allocation5 + $0x1f8] sm:$0xff]  ;;  %v3702_v45 = vld [vmem:[#allocation5 + $0x170] sm:$0xff]  ;;  %v3714_v49 = vld [vmem:[#allocation5 + $0x168] sm:$0xff] }
  0x1e   :  { %736 = vmatpush.bf16.msra.mxu2 %v3618_v14  ;;  %5358 = vst [vmem:[#allocation19_spill] sm:$0xff] %v3680_v37  ;;  %v3706_v46 = vld [vmem:[#allocation5 + $0x1b0] sm:$0xff]  ;;  %v3718_v50 = vld [vmem:[#allocation5 + $0x1a8] sm:$0xff]  ;;  %v3724_v52 = vld [vmem:[#allocation5 + $0x120] sm:$0xff] }
  0x1f   :  { %749 = vmatpush.bf16.msra.mxu3 %v3620_v15  ;;  %v3708_v47 = vld [vmem:[#allocation5 + $0x1f0] sm:$0xff]  ;;  %5359 = vst [vmem:[#allocation20_spill] sm:$0xff] %v3712_v48  ;;  %v3720_v51 = vld [vmem:[#allocation5 + $0x1e8] sm:$0xff]  ;;  %v3726_v53 = vld [vmem:[#allocation5 + $0x160] sm:$0xff] }
  0x20   :  { %711 = vmatpush.bf16.msra.mxu0 %v3624_v16  ;;  %5360 = vst [vmem:[#allocation21_spill] sm:$0xff] %v3714_v49  ;;  %v3730_v54 = vld [vmem:[#allocation5 + $0x1a0] sm:$0xff]  ;;  %v3736_v56 = vld [vmem:[#allocation5 + $0x118] sm:$0xff]  ;;  %v3748_v60 = vld [vmem:[#allocation5 + $0x110] sm:$0xff] }
  0x21   :  { %724 = vmatpush.bf16.msra.mxu1 %v3626_v17  ;;  %5361 = vst [vmem:[#allocation22_spill] sm:$0xff] %v3718_v50  ;;  %v3732_v55 = vld [vmem:[#allocation5 + $0x1e0] sm:$0xff]  ;;  %v3738_v57 = vld [vmem:[#allocation5 + $0x158] sm:$0xff]  ;;  %v3750_v61 = vld [vmem:[#allocation5 + $0x150] sm:$0xff] }
  0x22   :  { %737 = vmatpush.bf16.msra.mxu2 %v3630_v18  ;;  %5362 = vst [vmem:[#allocation23_spill] sm:$0xff] %v3720_v51  ;;  %v3742_v58 = vld [vmem:[#allocation5 + $0x198] sm:$0xff]  ;;  %v3754_v62 = vld [vmem:[#allocation5 + $0x190] sm:$0xff]  ;;  %v3770_v36 = vld [vmem:[#allocation5 + $0x100] sm:$0xff] }
  0x23   :  { %750 = vmatpush.bf16.msra.mxu3 %v3632_v19  ;;  %5363 = vst [vmem:[#allocation24_spill] sm:$0xff] %v3724_v52  ;;  %v3744_v59 = vld [vmem:[#allocation5 + $0x1d8] sm:$0xff]  ;;  %v3756_v63 = vld [vmem:[#allocation5 + $0x1d0] sm:$0xff]  ;;  %v3772_v33 = vld [vmem:[#allocation5 + $0x140] sm:$0xff] }
  0x24   :  { %712 = vmatpush.bf16.msra.mxu0 %v3636_v20  ;;  %5364 = vst [vmem:[#allocation25_spill] sm:$0xff] %v3726_v53  ;;  %v3776_v37 = vld [vmem:[#allocation5 + $0x180] sm:$0xff] }
  0x25   :  { %725 = vmatpush.bf16.msra.mxu1 %v3638_v21  ;;  %5365 = vst [vmem:[#allocation26_spill] sm:$0xff] %v3730_v54  ;;  %v3778_v34 = vld [vmem:[#allocation2 + $0x20] sm:$0xff] }
  0x26   :  { %738 = vmatpush.bf16.msra.mxu2 %v3642_v22  ;;  %5366 = vst [vmem:[#allocation27_spill] sm:$0xff] %v3732_v55 }
  0x27   :  { %751 = vmatpush.bf16.msra.mxu3 %v3644_v23  ;;  %5367 = vst [vmem:[#allocation28_spill] sm:$0xff] %v3736_v56 }
  0x28   :  { %713 = vmatpush.bf16.msra.mxu0 %v3648_v24  ;;  %5368 = vst [vmem:[#allocation29_spill] sm:$0xff] %v3738_v57 }
  0x29   :  { %726 = vmatpush.bf16.msra.mxu1 %v3650_v25  ;;  %5369 = vst [vmem:[#allocation30_spill] sm:$0xff] %v3742_v58 }
  0x2a   :  { %739 = vmatpush.bf16.msra.mxu2 %v3654_v26  ;;  %5370 = vst [vmem:[#allocation31_spill] sm:$0xff] %v3744_v59 }
  0x2b   :  { %752 = vmatpush.bf16.msra.mxu3 %v3656_v27  ;;  %5371 = vst [vmem:[#allocation32_spill] sm:$0xff] %v3748_v60 }
  0x2c   :  { %714 = vmatpush.bf16.msra.mxu0 %v3658_v28  ;;  %5372 = vst [vmem:[#allocation33_spill] sm:$0xff] %v3750_v61 }
  0x2d   :  { %727 = vmatpush.bf16.msra.mxu1 %v3662_v29  ;;  %5373 = vst [vmem:[#allocation34_spill] sm:$0xff] %v3754_v62 }
  0x2e   :  { %740 = vmatpush.bf16.msra.mxu2 %v3664_v30  ;;  %5374 = vst [vmem:[#allocation35_spill] sm:$0xff] %v3756_v63 }
  0x2f   :  { %753 = vmatpush.bf16.msra.mxu3 %v3666_v31  ;;  %715 = vmatmul.bf16.vlgmr.msra.gmra.mxu0 %v315_v41  ;;  %v3762_v41 = vld [vmem:[#allocation5 + $0x148] sm:$0xff]  ;;  %5379 = vst [vmem:[#allocation40_spill] sm:$0xff] %v3770_v36 }
  0x30   :  { %759 = vmatpush.bf16.msrb.mxu0 %v3670_v32  ;;  %728 = vmatmul.bf16.vlgmr.msra.gmra.mxu1 %v316_v43  ;;  %5376 = vst [vmem:[#allocation37_spill] sm:$0xff] %v3762_v41  ;;  %v3768_v43 = vld [vmem:[#allocation5 + $0x1c8] sm:$0xff] }
  0x31   :  { %772 = vmatpush.bf16.msrb.mxu1 %v3676_v35  ;;  %741 = vmatmul.bf16.vlgmr.msra.gmra.mxu2 %v317_v40  ;;  %v3760_v40 = vld [vmem:[#allocation5 + $0x108] sm:$0xff]  ;;  %5378 = vst [vmem:[#allocation39_spill] sm:$0xff] %v3768_v43 }
  0x32   :  { %785 = vmatpush.bf16.msrb.mxu2 %v3682_v38  ;;  %754 = vmatmul.bf16.vlgmr.msra.gmra.mxu3 %v318_v42  ;;  %5375 = vst [vmem:[#allocation36_spill] sm:$0xff] %v3760_v40  ;;  %v3766_v42 = vld [vmem:[#allocation5 + $0x188] sm:$0xff] }
  0x33   :  { %798 = vmatpush.bf16.msrb.mxu3 %v3684_v39  ;;  %5377 = vst [vmem:[#allocation38_spill] sm:$0xff] %v3766_v42 }
  0x34   :  { %760 = vmatpush.bf16.msrb.mxu0 %v3700_v44  ;;  %5380 = vst [vmem:[#allocation41_spill] sm:$0xff] %v3772_v33 }
  0x35   :  { %773 = vmatpush.bf16.msrb.mxu1 %v3702_v45  ;;  %5381 = vst [vmem:[#allocation42_spill] sm:$0xff] %v3776_v37 }
  0x36   :  { %786 = vmatpush.bf16.msrb.mxu2 %v3706_v46  ;;  %5382 = vst [vmem:[#allocation43_spill] sm:$0xff] %v3778_v34 }
  0x37   :  { %799 = vmatpush.bf16.msrb.mxu3 %v3708_v47 }
  0x38   :  { %761 = vmatpush.bf16.msrb.mxu0 %v3712_v48 }
  0x39   :  { %774 = vmatpush.bf16.msrb.mxu1 %v3714_v49  ;;  %v2952_v49 = vld [vmem:[#allocation7 + $0x128] sm:$0xf0] }
  0x3a   :  { %787 = vmatpush.bf16.msrb.mxu2 %v3718_v50 }
  0x3b   :  { %800 = vmatpush.bf16.msrb.mxu3 %v3720_v51 }
  0x3c   :  { %762 = vmatpush.bf16.msrb.mxu0 %v3724_v52 }
  0x3d   :  { %775 = vmatpush.bf16.msrb.mxu1 %v3726_v53 }
  0x3e   :  { %788 = vmatpush.bf16.msrb.mxu2 %v3730_v54 }
  0x3f   :  { %801 = vmatpush.bf16.msrb.mxu3 %v3732_v55 }
  0x40   :  { %763 = vmatpush.bf16.msrb.mxu0 %v3736_v56 }
  0x41   :  { %776 = vmatpush.bf16.msrb.mxu1 %v3738_v57 }
  0x42   :  { %789 = vmatpush.bf16.msrb.mxu2 %v3742_v58 }
  0x43   :  { %802 = vmatpush.bf16.msrb.mxu3 %v3744_v59 }
  0x44   :  { %764 = vmatpush.bf16.msrb.mxu0 %v3748_v60  ;;  %v3788_v60 = vld [vmem:[#allocation2 + $0x38] sm:$0xff] }
  0x45   :  { %777 = vmatpush.bf16.msrb.mxu1 %v3750_v61  ;;  %v3780_v61 = vld [vmem:[#allocation2 + $0x28] sm:$0xff]  ;;  %5386 = vst [vmem:[#allocation47_spill] sm:$0xff] %v3788_v60 }
  0x46   :  { %790 = vmatpush.bf16.msrb.mxu2 %v3754_v62  ;;  %5383 = vst [vmem:[#allocation44_spill] sm:$0xff] %v3780_v61  ;;  %v3786_v62 = vld [vmem:[#allocation2 + $0x30] sm:$0xff] }
  0x47   :  { %803 = vmatpush.bf16.msrb.mxu3 %v3756_v63  ;;  %v3784_v63 = vld [vmem:[#allocation5 + $0x1c0] sm:$0xff]  ;;  %5385 = vst [vmem:[#allocation46_spill] sm:$0xff] %v3786_v62 }
  0x48   :  { %765 = vmatpush.bf16.msrb.mxu0 %v3760_v40  ;;  %5384 = vst [vmem:[#allocation45_spill] sm:$0xff] %v3784_v63  ;;  %v319_v40 = vpack.c.bf16 %v3778_v34, %v3778_v34 }
  0x49   :  { %778 = vmatpush.bf16.msrb.mxu1 %v3762_v41  ;;  %v320_v41 = vpack.c.bf16 %v3780_v61, %v3780_v61 }
  0x4a   :  { %791 = vmatpush.bf16.msrb.mxu2 %v3766_v42  ;;  %v321_v42 = vpack.c.bf16 %v3786_v62, %v3786_v62  ;;  %v3211_v62 = vld [vmem:[%s5040_s3] ss:$0 sm:$0xff] }
  0x4b   :  { %804 = vmatpush.bf16.msrb.mxu3 %v3768_v43  ;;  %v322_v43 = vpack.c.bf16 %v3788_v60, %v3788_v60 }
  0x4c   :  { %766 = vmatpush.bf16.msrb.mxu0 %v3770_v36 }
  0x4d   :  { %779 = vmatpush.bf16.msrb.mxu1 %v3772_v33 }
  0x4e   :  { %792 = vmatpush.bf16.msrb.mxu2 %v3776_v37 }
  0x4f   :  { %805 = vmatpush.bf16.msrb.mxu3 %v3784_v63  ;;  %767 = vmatmul.bf16.vlgmr.msrb.gmra.mxu0 %v319_v40 }
  0x50   :  { %780 = vmatmul.bf16.vlgmr.msrb.gmra.mxu1 %v320_v41 }
  0x51   :  { %793 = vmatmul.bf16.vlgmr.msrb.gmra.mxu2 %v321_v42  ;;  %v275_v42 = vlaneseq }
  0x52   :  { %806 = vmatmul.bf16.vlgmr.msrb.gmra.mxu3 %v322_v43 }
  0x53   :  { %v3805_v54 = vand.u32 127, %v275_v42 }
  0x55   :  { %vm277_vm0 = vcmp.lt.s32.totalorder %v3805_v54, 10 }
  0xac   :  { %v716_v34 = vpop.f32.mrf.mxu0 }
  0xad   :  { %v729_v61 = vpop.f32.mrf.mxu1  ;;  %v717_v56 = vadd.f32 %v3211_v62, %v716_v34  ;;  %v3193_v62 = vld [vmem:[#allocation7 + $0x1e4] sm:$0xf0] }
  0xaf   :  { %v730_v37 = vadd.f32 %v729_v61, %v717_v56  ;;  %v3038_v56 = vld [vmem:[#allocation7 + $0x1c0] sm:$0xf] }
  0xb4   :  { %v742_v59 = vpop.f32.mrf.mxu2  ;;  %v718_v58 = vpop.f32.mrf.mxu0 }
  0xb5   :  { %v755_v36 = vpop.f32.mrf.mxu3  ;;  %v731_v33 = vpop.f32.mrf.mxu1  ;;  %v743_v55 = vadd.f32 %v742_v59, %v730_v37  ;;  %v3192_v59 = vld [vmem:[#allocation7 + $0x1dc] sm:$0xf0] }
  0xb7   :  { %v756_v63 = vadd.f32 %v755_v36, %v743_v55  ;;  %v270_v55 = vld [vmem:[%s5041_s4] sm:$0xff] }
  0xbc   :  { %v744_v57 = vpop.f32.mrf.mxu2 }
  0xbd   :  { %v757_v60 = vpop.f32.mrf.mxu3 }
  0xbe   :  { %v3046_v60 = vld [vmem:[#allocation7 + $0x1c8] sm:$0xf] }
  0xcc   :  { %v768_v40 = vpop.f32.mrf.mxu0 }
  0xcd   :  { %v781_v41 = vpop.f32.mrf.mxu1  ;;  %v769_v43 = vadd.f32 %v768_v40, %v756_v63  ;;  %v3189_v63 = vld [vmem:[#allocation7 + $0x1cc] sm:$0xf] }
  0xce   :  { %v3048_v40 = vld [vmem:[#allocation7 + $0x1e8] sm:$0xf0] }
  0xcf   :  { %v782_v53 = vadd.f32 %v781_v41, %v769_v43  ;;  %v3821_v41 = vor.u32 %v3193_v62, %v3046_v60  ;;  %v3823_v42 = vor.u32 %v3189_v63, %v3048_v40  ;;  %v3006_v43 = vld [vmem:[#allocation7 + $0x180] sm:$0xf]  ;;  %v3172_v63 = vld [vmem:[#allocation7 + $0x144] sm:$0xf] }
  0xd0   :  { %v3176_v62 = vld [vmem:[#allocation7 + $0x15c] sm:$0xf0]  ;;  %v2976_v40 = vld [vmem:[#allocation7 + $0x160] sm:$0xf0] }
  0xd1   :  { %5389 = vst [vmem:[#allocation50_spill] sm:$0xff] %v3821_v41  ;;  %1184 = vmatpush.bf16.msra.mxu2 %v3821_v41  ;;  %1197 = vmatpush.bf16.msra.mxu3 %v3823_v42  ;;  %v3177_v41 = vld [vmem:[#allocation7 + $0x164] sm:$0xf0] }
  0xd2   :  { %5390 = vst [vmem:[#allocation51_spill] sm:$0xff] %v3823_v42  ;;  %v2950_v42 = vld [vmem:[#allocation7 + $0x108] sm:$0xf] }
  0xd4   :  { %v794_v52 = vpop.f32.mrf.mxu2  ;;  %v770_v51 = vpop.f32.mrf.mxu0 }
  0xd5   :  { %v807_v58 = vpop.f32.mrf.mxu3  ;;  %v795_v33 = vadd.f32 %v794_v52, %v782_v53  ;;  %v783_v50 = vpop.f32.mrf.mxu1  ;;  %v3523_v52 = vmov 0   ;;  %v3188_v51 = vld [vmem:[#allocation7 + $0x1c4] sm:$0xf] }
  0xd6   :  { %3209 = vset.pattern.permute.xlu1 %v3523_v52  ;;  %v3816_v50 = vor.u32 %v3192_v59, %v3038_v56  ;;  %v3040_v53 = vld [vmem:[#allocation7 + $0x1e0] sm:$0xf0]  ;;  %3210 = vset.pattern.permute.xlu0 %v3523_v52  ;;  %v3181_v52 = vld [vmem:[#allocation7 + $0x18c] sm:$0xf] }
  0xd7   :  { %v808_v57 = vadd.f32 %v807_v58, %v795_v33  ;;  %279 = vperm.xlu1 %3209, %v270_v55   ;;  %v3818_v61 = vor.u32 %v3188_v51, %v3040_v53  ;;  %v3184_v58 = vld [vmem:[#allocation7 + $0x19c] sm:$0xf0]  ;;  %v3180_v33 = vld [vmem:[#allocation7 + $0x184] sm:$0xf]  ;;  %v3185_v55 = vld [vmem:[#allocation7 + $0x1a4] sm:$0xf0] }
  0xd8   :  { %5387 = vst [vmem:[#allocation48_spill] sm:$0xff] %v3816_v50  ;;  %1158 = vmatpush.bf16.msra.mxu0 %v3816_v50  ;;  %v3016_v51 = vld [vmem:[#allocation7 + $0x1a8] sm:$0xf0]  ;;  %v2974_v53 = vld [vmem:[#allocation7 + $0x140] sm:$0xf] }
  0xd9   :  { %v3810_v34 = vsel %vm277_vm0, %v808_v57, -1e+30  ;;  %5388 = vst [vmem:[#allocation49_spill] sm:$0xff] %v3818_v61  ;;  %1171 = vmatpush.bf16.msra.mxu1 %v3818_v61  ;;  %v3826_v57 = vor.u32 %v3184_v58, %v3006_v43  ;;  %v3834_v60 = vor.u32 %v3181_v52, %v3016_v51  ;;  %v3837_v43 = vor.u32 %v3176_v62, %v2974_v53  ;;  %v2982_v58 = vld [vmem:[#allocation7 + $0x148] sm:$0xf] }
  0xda   :  { %812 = vmax.xlane.f32.xlu0 %v3810_v34  ;;  %v3173_v61 = vld [vmem:[#allocation7 + $0x14c] sm:$0xf]  ;;  %v3844_v52 = vor.u32 %v3177_v41, %v2982_v58  ;;  %v3164_v53 = vld [vmem:[#allocation7 + $0x104] sm:$0xf] }
  0xdb   :  { %5391 = vst [vmem:[#allocation52_spill] sm:$0xff] %v3826_v57  ;;  %1198 = vmatpush.bf16.msra.mxu3 %v3834_v60  ;;  %v2944_v62 = vld [vmem:[#allocation7 + $0x120] sm:$0xf0]  ;;  %v3165_v50 = vld [vmem:[#allocation7 + $0x10c] sm:$0xf] }
  0xdc   :  { %v796_v36 = vpop.f32.mrf.mxu2  ;;  %5394 = vst [vmem:[#allocation55_spill] sm:$0xff] %v3834_v60  ;;  %1159 = vmatpush.bf16.msra.mxu0 %v3826_v57  ;;  %v3169_v57 = vld [vmem:[#allocation7 + $0x124] sm:$0xf0]  ;;  %v3160_v60 = vld [vmem:[#allocation7 + $0xdc] sm:$0xf0]  ;;  %v3858_v41 = vor.u32 %v3165_v50, %v2952_v49 }
  0xdd   :  { %v809_v37 = vpop.f32.mrf.mxu3  ;;  %v3008_v36 = vld [vmem:[#allocation7 + $0x1a0] sm:$0xf0]  ;;  %5395 = vst [vmem:[#allocation56_spill] sm:$0xff] %v3837_v43 }
  0xde   :  { %v3014_v37 = vld [vmem:[#allocation7 + $0x188] sm:$0xf]  ;;  %v3830_v56 = vor.u32 %v3180_v33, %v3008_v36  ;;  %v3840_v33 = vor.u32 %v3172_v63, %v2976_v40  ;;  %v2984_v36 = vld [vmem:[#allocation7 + $0x168] sm:$0xf0]  ;;  %5397 = vst [vmem:[#allocation58_spill] sm:$0xff] %v3844_v52  ;;  %v3852_v40 = vor.u32 %v3164_v53, %v2944_v62 }
  0xdf   :  { %v3832_v59 = vor.u32 %v3185_v55, %v3014_v37  ;;  %v2942_v37 = vld [vmem:[#allocation7 + $0x100] sm:$0xf]  ;;  %v3846_v51 = vor.u32 %v3173_v61, %v2984_v36  ;;  %v3856_v61 = vor.u32 %v3169_v57, %v2950_v42  ;;  %5402 = vst [vmem:[#allocation63_spill] sm:$0xff] %v3858_v41  ;;  %v3156_v58 = vld [vmem:[#allocation7 + $0xc4] sm:$0xf] }
  0xe0   :  { %5392 = vst [vmem:[#allocation53_spill] sm:$0xff] %v3830_v56  ;;  %1172 = vmatpush.bf16.msra.mxu1 %v3830_v56  ;;  %v3168_v55 = vld [vmem:[#allocation7 + $0x11c] sm:$0xf0]  ;;  %1160 = vmatpush.bf16.msra.mxu0 %v3837_v43  ;;  %v2912_v36 = vld [vmem:[#allocation7 + $0xe0] sm:$0xf0] }
  0xe1   :  { %5393 = vst [vmem:[#allocation54_spill] sm:$0xff] %v3832_v59  ;;  %1185 = vmatpush.bf16.msra.mxu2 %v3832_v59  ;;  %v3849_v63 = vor.u32 %v3168_v55, %v2942_v37  ;;  %v2910_v59 = vld [vmem:[#allocation7 + $0xc0] sm:$0xf]  ;;  %1199 = vmatpush.bf16.msra.mxu3 %v3846_v51  ;;  %v2918_v56 = vld [vmem:[#allocation7 + $0xc8] sm:$0xf]  ;;  %v3864_v62 = vor.u32 %v3156_v58, %v2912_v36 }
  0xe2   :  { %5396 = vst [vmem:[#allocation57_spill] sm:$0xff] %v3840_v33  ;;  %v3161_v43 = vld [vmem:[#allocation7 + $0xe4] sm:$0xf0]  ;;  %v3157_v37 = vld [vmem:[#allocation7 + $0xcc] sm:$0xf]  ;;  %v3861_v53 = vor.u32 %v3160_v60, %v2910_v59 }
  0xe3   :  { %5398 = vst [vmem:[#allocation59_spill] sm:$0xff] %v3846_v51  ;;  %v2920_v55 = vld [vmem:[#allocation7 + $0xe8] sm:$0xf0]  ;;  %v3152_v51 = vld [vmem:[#allocation7 + $0x9c] sm:$0xf0]  ;;  %v3868_v49 = vor.u32 %v3161_v43, %v2918_v56 }
  0xe4   :  { %5399 = vst [vmem:[#allocation60_spill] sm:$0xff] %v3849_v63  ;;  %1173 = vmatpush.bf16.msra.mxu1 %v3840_v33  ;;  %1161 = vmatpush.bf16.msra.mxu0 %v3849_v63  ;;  %v3870_v50 = vor.u32 %v3157_v37, %v2920_v55  ;;  %v3148_v42 = vld [vmem:[#allocation7 + $0x84] sm:$0xf]  ;;  %v2886_v33 = vld [vmem:[#allocation7 + $0x88] sm:$0xf] }
  0xe5   :  { %5400 = vst [vmem:[#allocation61_spill] sm:$0xff] %v3852_v40  ;;  %1186 = vmatpush.bf16.msra.mxu2 %v3844_v52  ;;  %v2878_v52 = vld [vmem:[#allocation7 + $0x80] sm:$0xf]  ;;  %1200 = vmatpush.bf16.msra.mxu3 %v3858_v41  ;;  %v2880_v57 = vld [vmem:[#allocation7 + $0xa0] sm:$0xf0] }
  0xe6   :  { %5401 = vst [vmem:[#allocation62_spill] sm:$0xff] %v3856_v61  ;;  %v3153_v63 = vld [vmem:[#allocation7 + $0xa4] sm:$0xf0]  ;;  %v3149_v59 = vld [vmem:[#allocation7 + $0x8c] sm:$0xf]  ;;  %v3873_v58 = vor.u32 %v3152_v51, %v2878_v52  ;;  %v3877_v41 = vor.u32 %v3148_v42, %v2880_v57 }
  0xe7   :  { %5403 = vst [vmem:[#allocation64_spill] sm:$0xff] %v3861_v53  ;;  %v2888_v60 = vld [vmem:[#allocation7 + $0xa8] sm:$0xf0]  ;;  %v3881_v56 = vor.u32 %v3153_v63, %v2886_v33  ;;  %v2846_v33 = vld [vmem:[#allocation7 + $0x40] sm:$0xf] }
  0xe8   :  { %1174 = vmatpush.bf16.msra.mxu1 %v3852_v40  ;;  %5404 = vst [vmem:[#allocation65_spill] sm:$0xff] %v3864_v62  ;;  %1162 = vmatpush.bf16.msra.mxu0 %v3861_v53  ;;  %v3883_v43 = vor.u32 %v3149_v59, %v2888_v60  ;;  %v3144_v52 = vld [vmem:[#allocation7 + $0x5c] sm:$0xf0]  ;;  %v3140_v51 = vld [vmem:[#allocation7 + $0x44] sm:$0xf] }
  0xe9   :  { %1187 = vmatpush.bf16.msra.mxu2 %v3856_v61  ;;  %5405 = vst [vmem:[#allocation66_spill] sm:$0xff] %v3868_v49  ;;  %1201 = vmatpush.bf16.msra.mxu3 %v3870_v50  ;;  %v3894_v63 = vor.u32 %v3144_v52, %v2846_v33  ;;  %v2848_v55 = vld [vmem:[#allocation7 + $0x60] sm:$0xf0]  ;;  %v2854_v42 = vld [vmem:[#allocation7 + $0x48] sm:$0xf] }
  0xea   :  { %5406 = vst [vmem:[#allocation67_spill] sm:$0xff] %v3870_v50  ;;  %v3145_v57 = vld [vmem:[#allocation7 + $0x64] sm:$0xf0]  ;;  %v3896_v59 = vor.u32 %v3140_v51, %v2848_v55  ;;  %v3136_v33 = vld [vmem:[#allocation7 + $0x1c] sm:$0xf0] }
  0xeb   :  { %5407 = vst [vmem:[#allocation68_spill] sm:$0xff] %v3873_v58  ;;  %v3898_v60 = vor.u32 %v3145_v57, %v2854_v42  ;;  %v3132_v52 = vld [vmem:[#allocation7 + $0x4] sm:$0xf]  ;;  %v2822_v55 = vld [vmem:[#allocation7 + $0x8] sm:$0xf] }
  0xec   :  { %1175 = vmatpush.bf16.msra.mxu1 %v3864_v62  ;;  %5408 = vst [vmem:[#allocation69_spill] sm:$0xff] %v3877_v41  ;;  %1163 = vmatpush.bf16.msra.mxu0 %v3873_v58  ;;  %v2816_v51 = vld [vmem:[#allocation7 + $0x20] sm:$0xf0]  ;;  %v3137_v42 = vld [vmem:[#allocation7 + $0x24] sm:$0xf0] }
  0xed   :  { %1188 = vmatpush.bf16.msra.mxu2 %v3868_v49  ;;  %5409 = vst [vmem:[#allocation70_spill] sm:$0xff] %v3881_v56  ;;  %1202 = vmatpush.bf16.msra.mxu3 %v3883_v43  ;;  %v3908_v57 = vor.u32 %v3132_v52, %v2816_v51  ;;  %v3910_v50 = vor.u32 %v3137_v42, %v2822_v55  ;;  %v3190_v49 = vld [vmem:[#allocation7 + $0x1d4] sm:$0xf]  ;;  %v3062_v52 = vld [vmem:[#allocation7 + $0x1d8] sm:$0xf] }
  0xee   :  { %5410 = vst [vmem:[#allocation71_spill] sm:$0xff] %v3883_v43  ;;  %v2814_v43 = vld [vmem:[#allocation7] sm:$0xf]  ;;  %v3195_v51 = vld [vmem:[#allocation7 + $0x1f4] sm:$0xf0] }
  0xef   :  { %5411 = vst [vmem:[#allocation72_spill] sm:$0xff] %v3894_v63  ;;  %v3191_v55 = vld [vmem:[#allocation7 + $0x1dc] sm:$0xf]  ;;  %v3922_v42 = vor.u32 %v3195_v51, %v3062_v52  ;;  %v3187_v52 = vld [vmem:[#allocation7 + $0x1b4] sm:$0xf0] }
  0xf0   :  { %1176 = vmatpush.bf16.msra.mxu1 %v3877_v41  ;;  %5412 = vst [vmem:[#allocation73_spill] sm:$0xff] %v3896_v59  ;;  %1164 = vmatpush.bf16.msra.mxu0 %v3894_v63  ;;  %v3054_v63 = vld [vmem:[#allocation7 + $0x1d0] sm:$0xf]  ;;  %v3056_v41 = vld [vmem:[#allocation7 + $0x1f0] sm:$0xf0] }
  0xf1   :  { %1189 = vmatpush.bf16.msra.mxu2 %v3881_v56  ;;  %5413 = vst [vmem:[#allocation74_spill] sm:$0xff] %v3898_v60  ;;  %v3906_v56 = vor.u32 %v3136_v33, %v2814_v43  ;;  %v3919_v33 = vor.u32 %v3190_v49, %v3056_v41  ;;  %v3182_v41 = vld [vmem:[#allocation7 + $0x194] sm:$0xf]  ;;  %v3183_v51 = vld [vmem:[#allocation7 + $0x19c] sm:$0xf] }
  0xf2   :  { %5416 = vst [vmem:[#allocation77_spill] sm:$0xff] %v3908_v57  ;;  %v3024_v49 = vld [vmem:[#allocation7 + $0x1b0] sm:$0xf0] }
  0xf3   :  { %5415 = vst [vmem:[#allocation76_spill] sm:$0xff] %v3906_v56  ;;  %v2896_v58 = vld [vmem:[#allocation7 + $0xb0] sm:$0xf0] }
  0xf4   :  { %1177 = vmatpush.bf16.msra.mxu1 %v3896_v59  ;;  %5417 = vst [vmem:[#allocation78_spill] sm:$0xff] %v3910_v50  ;;  %1165 = vmatpush.bf16.msra.mxu0 %v3906_v56  ;;  %v3194_v59 = vld [vmem:[#allocation7 + $0x1ec] sm:$0xf0]  ;;  %v2832_v62 = vld [vmem:[#allocation7 + $0x30] sm:$0xf0] }
  0xf5   :  { %1190 = vmatpush.bf16.msra.mxu2 %v3898_v60  ;;  %v3917_v43 = vor.u32 %v3194_v59, %v3054_v63  ;;  %5420 = vst [vmem:[#allocation81_spill] sm:$0xff] %v3919_v33  ;;  %v3030_v59 = vld [vmem:[#allocation7 + $0x198] sm:$0xf] }
  0xf6   :  { %5421 = vst [vmem:[#allocation82_spill] sm:$0xff] %v3922_v42  ;;  %v3934_v56 = vor.u32 %v3187_v52, %v3030_v59  ;;  %v3000_v52 = vld [vmem:[#allocation7 + $0x178] sm:$0xf0] }
  0xf7   :  { %5419 = vst [vmem:[#allocation80_spill] sm:$0xff] %v3917_v43 }
  0xf8   :  { %1178 = vmatpush.bf16.msra.mxu1 %v3908_v57  ;;  %1210 = vmatpush.bf16.msrb.mxu0 %v3917_v43  ;;  %5425 = vst [vmem:[#allocation86_spill] sm:$0xff] %v3934_v56 }
  0xf9   :  { %1191 = vmatpush.bf16.msra.mxu2 %v3910_v50  ;;  %v3931_v50 = vor.u32 %v3182_v41, %v3024_v49  ;;  %v2992_v41 = vld [vmem:[#allocation7 + $0x170] sm:$0xf0]  ;;  %v2998_v49 = vld [vmem:[#allocation7 + $0x158] sm:$0xf] }
  0xfb   :  { %5424 = vst [vmem:[#allocation85_spill] sm:$0xff] %v3931_v50 }
  0xfc   :  { %1223 = vmatpush.bf16.msrb.mxu1 %v3919_v33 }
  0xfd   :  { %1236 = vmatpush.bf16.msrb.mxu2 %v3922_v42  ;;  %v3179_v42 = vld [vmem:[#allocation7 + $0x174] sm:$0xf0] }
  0xfe   :  { %v3945_v59 = vor.u32 %v3179_v42, %v2998_v49  ;;  %v3167_v49 = vld [vmem:[#allocation7 + $0x11c] sm:$0xf] }
 0x100   :  { %1224 = vmatpush.bf16.msrb.mxu1 %v3931_v50  ;;  %5429 = vst [vmem:[#allocation90_spill] sm:$0xff] %v3945_v59  ;;  %v3150_v50 = vld [vmem:[#allocation7 + $0x94] sm:$0xf] }
 0x101   :  { %1237 = vmatpush.bf16.msrb.mxu2 %v3934_v56  ;;  %v2960_v56 = vld [vmem:[#allocation7 + $0x130] sm:$0xf0] }
 0x105   :  { %1238 = vmatpush.bf16.msrb.mxu2 %v3945_v59  ;;  %v2934_v59 = vld [vmem:[#allocation7 + $0xd8] sm:$0xf] }
 0x14d   :  { %v813_v48 = vpop.xlane.xlu0 %812 }
 0x14e   :  { %v814_v36 = vsub.f32 %v3810_v34, %v813_v48 }
 0x150   :  { %v815_v37 = vmul.f32 1.442695, %v814_v36  ;;  %v3141_v36 = vld [vmem:[#allocation7 + $0x4c] sm:$0xf] }
 0x152   :  { %3212 = vpow2.f32 %v815_v37  ;;  %v2856_v37 = vld [vmem:[#allocation7 + $0x68] sm:$0xf0] }
 0x158   :  { %v3213_v48 = vpop.eup %3212 }
 0x159   :  { %v3891_v34 = vsel %vm277_vm0, %v3213_v48, 0.0  ;;  %v3901_v48 = vor.u32 %v3141_v36, %v2856_v37  ;;  %v3133_v36 = vld [vmem:[#allocation7 + $0xc] sm:$0xf] }
 0x15a   :  { %818 = vadd.xlane.f32.xlu0 %v3891_v34  ;;  %v2824_v37 = vld [vmem:[#allocation7 + $0x28] sm:$0xf0] }
 0x15b   :  { %5414 = vst [vmem:[#allocation75_spill] sm:$0xff] %v3901_v48  ;;  %1203 = vmatpush.bf16.msra.mxu3 %v3901_v48  ;;  %v3913_v60 = vor.u32 %v3133_v36, %v2824_v37  ;;  %v3064_v36 = vld [vmem:[#allocation7 + $0x1f8] sm:$0xf0]  ;;  %v3022_v37 = vld [vmem:[#allocation7 + $0x190] sm:$0xf] }
 0x15c   :  { %v3186_v48 = vld [vmem:[#allocation7 + $0x1ac] sm:$0xf0]  ;;  %v3926_v57 = vor.u32 %v3191_v55, %v3064_v36 }
 0x15d   :  { %5418 = vst [vmem:[#allocation79_spill] sm:$0xff] %v3913_v60  ;;  %v3928_v63 = vor.u32 %v3186_v48, %v3022_v37  ;;  %v2990_v55 = vld [vmem:[#allocation7 + $0x150] sm:$0xf]  ;;  %v3174_v48 = vld [vmem:[#allocation7 + $0x154] sm:$0xf] }
 0x15e   :  { %5422 = vst [vmem:[#allocation83_spill] sm:$0xff] %v3926_v57  ;;  %v3178_v36 = vld [vmem:[#allocation7 + $0x16c] sm:$0xf0]  ;;  %v3943_v33 = vor.u32 %v3174_v48, %v2992_v41  ;;  %v2966_v48 = vld [vmem:[#allocation7 + $0x118] sm:$0xf] }
 0x15f   :  { %1204 = vmatpush.bf16.msra.mxu3 %v3913_v60  ;;  %5423 = vst [vmem:[#allocation84_spill] sm:$0xff] %v3928_v63  ;;  %v3032_v60 = vld [vmem:[#allocation7 + $0x1b8] sm:$0xf0]  ;;  %1211 = vmatpush.bf16.msrb.mxu0 %v3928_v63  ;;  %v3940_v37 = vor.u32 %v3178_v36, %v2990_v55  ;;  %v3170_v63 = vld [vmem:[#allocation7 + $0x12c] sm:$0xf0] }
 0x160   :  { %v3936_v43 = vor.u32 %v3183_v51, %v3032_v60  ;;  %5428 = vst [vmem:[#allocation89_spill] sm:$0xff] %v3943_v33  ;;  %v3175_v60 = vld [vmem:[#allocation7 + $0x15c] sm:$0xf]  ;;  %1225 = vmatpush.bf16.msrb.mxu1 %v3943_v33  ;;  %v3166_v36 = vld [vmem:[#allocation7 + $0x114] sm:$0xf] }
 0x161   :  { %5427 = vst [vmem:[#allocation88_spill] sm:$0xff] %v3940_v37  ;;  %v3948_v51 = vor.u32 %v3175_v60, %v3000_v52  ;;  %v3955_v42 = vor.u32 %v3166_v36, %v2960_v56  ;;  %v3171_v41 = vld [vmem:[#allocation7 + $0x134] sm:$0xf0]  ;;  %v3158_v33 = vld [vmem:[#allocation7 + $0xd4] sm:$0xf] }
 0x162   :  { %5426 = vst [vmem:[#allocation87_spill] sm:$0xff] %v3936_v43  ;;  %v3958_v60 = vor.u32 %v3171_v41, %v2966_v48  ;;  %v2928_v36 = vld [vmem:[#allocation7 + $0xf0] sm:$0xf0]  ;;  %v3159_v41 = vld [vmem:[#allocation7 + $0xdc] sm:$0xf] }
 0x163   :  { %1249 = vmatpush.bf16.msrb.mxu3 %v3926_v57  ;;  %5430 = vst [vmem:[#allocation91_spill] sm:$0xff] %v3948_v51  ;;  %v2958_v57 = vld [vmem:[#allocation7 + $0x110] sm:$0xf]  ;;  %1212 = vmatpush.bf16.msrb.mxu0 %v3940_v37  ;;  %v3163_v37 = vld [vmem:[#allocation7 + $0xf4] sm:$0xf0]  ;;  %v3968_v48 = vor.u32 %v3158_v33, %v2928_v36 }
 0x164   :  { %v3952_v55 = vor.u32 %v3170_v63, %v2958_v57  ;;  %5432 = vst [vmem:[#allocation93_spill] sm:$0xff] %v3955_v42  ;;  %1226 = vmatpush.bf16.msrb.mxu1 %v3955_v42  ;;  %v2926_v57 = vld [vmem:[#allocation7 + $0xd0] sm:$0xf]  ;;  %1239 = vmatpush.bf16.msrb.mxu2 %v3958_v60  ;;  %v2902_v33 = vld [vmem:[#allocation7 + $0x98] sm:$0xf] }
 0x165   :  { %5433 = vst [vmem:[#allocation94_spill] sm:$0xff] %v3958_v60  ;;  %v3162_v63 = vld [vmem:[#allocation7 + $0xec] sm:$0xf0]  ;;  %v3155_v36 = vld [vmem:[#allocation7 + $0xb4] sm:$0xf0] }
 0x166   :  { %5431 = vst [vmem:[#allocation92_spill] sm:$0xff] %v3952_v55  ;;  %v3965_v56 = vor.u32 %v3162_v63, %v2926_v57  ;;  %v3978_v63 = vor.u32 %v3150_v50, %v2896_v58  ;;  %v3143_v50 = vld [vmem:[#allocation7 + $0x5c] sm:$0xf] }
 0x167   :  { %1250 = vmatpush.bf16.msrb.mxu3 %v3936_v43  ;;  %v2968_v43 = vld [vmem:[#allocation7 + $0x138] sm:$0xf0]  ;;  %1213 = vmatpush.bf16.msrb.mxu0 %v3952_v55  ;;  %5436 = vst [vmem:[#allocation97_spill] sm:$0xff] %v3968_v48  ;;  %v3154_v55 = vld [vmem:[#allocation7 + $0xac] sm:$0xf0] }
 0x168   :  { %v3960_v52 = vor.u32 %v3167_v49, %v2968_v43  ;;  %5435 = vst [vmem:[#allocation96_spill] sm:$0xff] %v3965_v56  ;;  %v3970_v43 = vor.u32 %v3163_v37, %v2934_v59  ;;  %v2936_v49 = vld [vmem:[#allocation7 + $0xf8] sm:$0xf0]  ;;  %1227 = vmatpush.bf16.msrb.mxu1 %v3968_v48  ;;  %v3981_v59 = vor.u32 %v3155_v36, %v2902_v33  ;;  %v2864_v48 = vld [vmem:[#allocation7 + $0x70] sm:$0xf0] }
 0x169   :  { %v3972_v42 = vor.u32 %v3159_v41, %v2936_v49  ;;  %5440 = vst [vmem:[#allocation101_spill] sm:$0xff] %v3978_v63  ;;  %v3151_v37 = vld [vmem:[#allocation7 + $0x9c] sm:$0xf]  ;;  %v2862_v49 = vld [vmem:[#allocation7 + $0x50] sm:$0xf] }
 0x16a   :  { %5434 = vst [vmem:[#allocation95_spill] sm:$0xff] %v3960_v52  ;;  %1240 = vmatpush.bf16.msrb.mxu2 %v3970_v43  ;;  %v2904_v41 = vld [vmem:[#allocation7 + $0xb8] sm:$0xf0]  ;;  %v2830_v36 = vld [vmem:[#allocation7 + $0x10] sm:$0xf] }
 0x16b   :  { %1251 = vmatpush.bf16.msrb.mxu3 %v3948_v51  ;;  %5437 = vst [vmem:[#allocation98_spill] sm:$0xff] %v3970_v43  ;;  %v2894_v51 = vld [vmem:[#allocation7 + $0x90] sm:$0xf]  ;;  %1214 = vmatpush.bf16.msrb.mxu0 %v3965_v56  ;;  %v3984_v60 = vor.u32 %v3151_v37, %v2904_v41  ;;  %v3142_v56 = vld [vmem:[#allocation7 + $0x54] sm:$0xf] }
 0x16c   :  { %5438 = vst [vmem:[#allocation99_spill] sm:$0xff] %v3972_v42  ;;  %v3976_v57 = vor.u32 %v3154_v55, %v2894_v51  ;;  %v2870_v51 = vld [vmem:[#allocation7 + $0x58] sm:$0xf]  ;;  %v2872_v58 = vld [vmem:[#allocation7 + $0x78] sm:$0xf0]  ;;  %1228 = vmatpush.bf16.msrb.mxu1 %v3978_v63  ;;  %v3990_v33 = vor.u32 %v3142_v56, %v2864_v48 }
 0x16d   :  { %5441 = vst [vmem:[#allocation102_spill] sm:$0xff] %v3981_v59  ;;  %v3147_v55 = vld [vmem:[#allocation7 + $0x74] sm:$0xf0]  ;;  %v3138_v41 = vld [vmem:[#allocation7 + $0x2c] sm:$0xf0]  ;;  %v3996_v53 = vor.u32 %v3143_v50, %v2872_v58 }
 0x16e   :  { %5439 = vst [vmem:[#allocation100_spill] sm:$0xff] %v3976_v57  ;;  %1241 = vmatpush.bf16.msrb.mxu2 %v3981_v59  ;;  %v3993_v37 = vor.u32 %v3147_v55, %v2870_v51  ;;  %v3139_v63 = vld [vmem:[#allocation7 + $0x34] sm:$0xf0]  ;;  %v4000_v56 = vor.u32 %v3138_v41, %v2830_v36  ;;  %v280_v36 = vpop.permute.xlu1 %279 }
 0x16f   :  { %1252 = vmatpush.bf16.msrb.mxu3 %v3960_v52  ;;  %v3146_v52 = vld [vmem:[#allocation7 + $0x6c] sm:$0xf0]  ;;  %5442 = vst [vmem:[#allocation103_spill] sm:$0xff] %v3984_v60  ;;  %1215 = vmatpush.bf16.msrb.mxu0 %v3976_v57  ;;  %v2838_v57 = vld [vmem:[#allocation7 + $0x18] sm:$0xf]  ;;  %vm281_vm3 = vcmp.eq.s32.totalorder %v3805_v54, %v280_v36 }
 0x170   :  { %v3988_v43 = vor.u32 %v3146_v52, %v2862_v49  ;;  %5444 = vst [vmem:[#allocation105_spill] sm:$0xff] %v3990_v33  ;;  %v3135_v52 = vld [vmem:[#allocation7 + $0x1c] sm:$0xf]  ;;  %1229 = vmatpush.bf16.msrb.mxu1 %v3990_v33  ;;  %v4005_v51 = vor.u32 %v3139_v63, %v2838_v57 }
 0x171   :  { %5445 = vst [vmem:[#allocation106_spill] sm:$0xff] %v3993_v37  ;;  %v2840_v49 = vld [vmem:[#allocation7 + $0x38] sm:$0xf0] }
 0x172   :  { %5443 = vst [vmem:[#allocation104_spill] sm:$0xff] %v3988_v43  ;;  %1242 = vmatpush.bf16.msrb.mxu2 %v3993_v37  ;;  %v4008_v55 = vor.u32 %v3135_v52, %v2840_v49  ;;  %v3303_v54 = vld [vmem:[#allocation5 + $0xf8] sm:$0xff] }
 0x173   :  { %1253 = vmatpush.bf16.msrb.mxu3 %v3972_v42  ;;  %v3134_v42 = vld [vmem:[#allocation7 + $0x14] sm:$0xf]  ;;  %5446 = vst [vmem:[#allocation107_spill] sm:$0xff] %v3996_v53  ;;  %1216 = vmatpush.bf16.msrb.mxu0 %v3988_v43 }
 0x174   :  { %5447 = vst [vmem:[#allocation108_spill] sm:$0xff] %v4000_v56  ;;  %v4002_v48 = vor.u32 %v3134_v42, %v2832_v62 }
 0x175   :  { %5449 = vst [vmem:[#allocation110_spill] sm:$0xff] %v4005_v51 }
 0x176   :  { %5448 = vst [vmem:[#allocation109_spill] sm:$0xff] %v4002_v48  ;;  %1230 = vmatpush.bf16.msrb.mxu1 %v4002_v48  ;;  %1243 = vmatpush.bf16.msrb.mxu2 %v4005_v51 }
 0x177   :  { %1254 = vmatpush.bf16.msrb.mxu3 %v3984_v60  ;;  %5450 = vst [vmem:[#allocation111_spill] sm:$0xff] %v4008_v55  ;;  %1217 = vmatpush.bf16.msrb.mxu0 %v4000_v56 }
 0x17b   :  { %1255 = vmatpush.bf16.msrb.mxu3 %v3996_v53  ;;  %v3524_v53 = vmov 0.0  }
 0x17c   :  { %v4015_v37 = vsel %vm281_vm3, 1.0, %v3524_v53  ;;  %v5477_v53 = vld [vmem:[#allocation16_spill] sm:$0xff] }
 0x17d   :  { %v301_v36 = vadd.f32 0.03137255, %v5477_v53 }
 0x17f   :  { %1256 = vmatpush.bf16.msrb.mxu3 %v4008_v55 }
 0x1cd   :  { %v819_v61 = vpop.xlane.xlu0 %818 }
 0x1ce   :  { %3214 = vrcp.f32 %v819_v61  ;;  %v831_v42 = vand.u32 2147483648, %v819_v61  ;;  %v829_v57 = vand.u32 2147483647, %v819_v61  ;;  %vm825_vm2 = vweird.f32 %v819_v61 }
 0x1d0   :  { %v832_v52 = vor.u32 1.1754944e-38, %v831_v42  ;;  %vm830_vm5 = vcmp.eq.f32.partialorder %v829_v57, 8.507059e+37 }
 0x1d4   :  { %v3215_v50 = vpop.eup %3214 }
 0x1d5   :  { %v821_v58 = vmul.f32 %v3215_v50, %v819_v61  ;;  %vm826_vm1 = vweird.f32 %v3215_v50 }
 0x1d6   :  { %vm827_vm4 = vmor %vm825_vm2, %vm826_vm1 }
 0x1d7   :  { %v822_v62 = vsub.f32 1.0, %v821_v58 }
 0x1d9   :  { %v823_v41 = vmul.f32 %v3215_v50, %v822_v62 }
 0x1db   :  { %v824_v63 = vadd.f32 %v3215_v50, %v823_v41 }
 0x1dd   :  { %v828_v49 = vsel %vm827_vm4, %v3215_v50, %v824_v63 }
 0x1de   :  { %v833_v51 = vsel %vm830_vm5, %v832_v52, %v828_v49 }
 0x1df   :  { %v834_v55 = vmul.f32 %v833_v51, %v3891_v34  ;;  %v2550_v34 = vadd.f32 -0.03137255, %v5477_v53  ;;  %v5478_v51 = vld [vmem:[#allocation18_spill] sm:$0xff] }
 0x1e0   :  { %v302_v41 = vadd.f32 0.03137255, %v5478_v51 }
 0x1e1   :  { %v836_v58 = vsub.f32 %v834_v55, %v4015_v37  ;;  %835 = vst [vmem:[#allocation9] sm:$0xff] %v834_v55  ;;  %v2551_v55 = vadd.f32 -0.03137255, %v5478_v51 }
 0x1e2   :  { %2520 = dma.vmem_to_hbm [thread:$0]  %s2516_s27, 128, %s2518_s25, [#allocation10]  }
 0x1e3   :  { %v837_v62 = vpack.c.bf16 %v836_v58, %v836_v58  ;;  %v4111_v58 = vmax.f32 %v2550_v34, -1.0 }
 0x1e5   :  { %1166 = vmatmul.bf16.vlgmr.msra.gmra.mxu0 %v837_v62  ;;  %1179 = vmatmul.bf16.vlgmr.msra.gmra.mxu1 %v837_v62 }
 0x1e6   :  { %1192 = vmatmul.bf16.vlgmr.msra.gmra.mxu2 %v837_v62  ;;  %1205 = vmatmul.bf16.vlgmr.msra.gmra.mxu3 %v837_v62 }
 0x1e7   :  { %1310 = vmatpush.bf16.msra.mxu0 %v3578_v0  ;;  %1323 = vmatpush.bf16.msra.mxu1 %v3580_v1  ;;  %v5451_v0 = vld [vmem:[#allocation20_spill] sm:$0xff]  ;;  %v5452_v1 = vld [vmem:[#allocation21_spill] sm:$0xff] }
 0x1e8   :  { %1336 = vmatpush.bf16.msra.mxu2 %v3582_v2  ;;  %1349 = vmatpush.bf16.msra.mxu3 %v3584_v3  ;;  %v5453_v2 = vld [vmem:[#allocation22_spill] sm:$0xff]  ;;  %v5454_v3 = vld [vmem:[#allocation23_spill] sm:$0xff] }
 0x1eb   :  { %1311 = vmatpush.bf16.msra.mxu0 %v3588_v4  ;;  %1324 = vmatpush.bf16.msra.mxu1 %v3590_v5  ;;  %v5455_v4 = vld [vmem:[#allocation24_spill] sm:$0xff]  ;;  %v5456_v5 = vld [vmem:[#allocation25_spill] sm:$0xff] }
 0x1ec   :  { %1337 = vmatpush.bf16.msra.mxu2 %v3594_v6  ;;  %1350 = vmatpush.bf16.msra.mxu3 %v3596_v7  ;;  %v5457_v6 = vld [vmem:[#allocation26_spill] sm:$0xff]  ;;  %v5458_v7 = vld [vmem:[#allocation27_spill] sm:$0xff] }
 0x1ef   :  { %1312 = vmatpush.bf16.msra.mxu0 %v3600_v8  ;;  %1325 = vmatpush.bf16.msra.mxu1 %v3602_v9  ;;  %v5459_v8 = vld [vmem:[#allocation28_spill] sm:$0xff]  ;;  %v5460_v9 = vld [vmem:[#allocation29_spill] sm:$0xff] }
 0x1f0   :  { %1338 = vmatpush.bf16.msra.mxu2 %v3606_v10  ;;  %1351 = vmatpush.bf16.msra.mxu3 %v3608_v11  ;;  %v5461_v10 = vld [vmem:[#allocation30_spill] sm:$0xff]  ;;  %v5462_v11 = vld [vmem:[#allocation31_spill] sm:$0xff] }
 0x1f3   :  { %1313 = vmatpush.bf16.msra.mxu0 %v3612_v12  ;;  %1326 = vmatpush.bf16.msra.mxu1 %v3614_v13  ;;  %v5463_v12 = vld [vmem:[#allocation32_spill] sm:$0xff]  ;;  %v5464_v13 = vld [vmem:[#allocation33_spill] sm:$0xff] }
 0x1f4   :  { %1339 = vmatpush.bf16.msra.mxu2 %v3618_v14  ;;  %1352 = vmatpush.bf16.msra.mxu3 %v3620_v15  ;;  %v5465_v14 = vld [vmem:[#allocation34_spill] sm:$0xff]  ;;  %v5466_v15 = vld [vmem:[#allocation35_spill] sm:$0xff] }
 0x1f5   :  { %1218 = vmatmul.bf16.vlgmr.msrb.gmra.mxu0 %v837_v62  ;;  %1231 = vmatmul.bf16.vlgmr.msrb.gmra.mxu1 %v837_v62 }
 0x1f6   :  { %1244 = vmatmul.bf16.vlgmr.msrb.gmra.mxu2 %v837_v62  ;;  %1257 = vmatmul.bf16.vlgmr.msrb.gmra.mxu3 %v837_v62  ;;  %v4113_v62 = vmax.f32 %v2551_v55, -1.0 }
 0x1f7   :  { %1314 = vmatpush.bf16.msra.mxu0 %v3624_v16  ;;  %1327 = vmatpush.bf16.msra.mxu1 %v3626_v17  ;;  %v5467_v16 = vld [vmem:[#allocation36_spill] sm:$0xff]  ;;  %v5468_v17 = vld [vmem:[#allocation37_spill] sm:$0xff] }
 0x1f8   :  { %1340 = vmatpush.bf16.msra.mxu2 %v3630_v18  ;;  %1353 = vmatpush.bf16.msra.mxu3 %v3632_v19  ;;  %v5469_v18 = vld [vmem:[#allocation38_spill] sm:$0xff]  ;;  %v5470_v19 = vld [vmem:[#allocation39_spill] sm:$0xff] }
 0x1fb   :  { %1315 = vmatpush.bf16.msra.mxu0 %v3636_v20  ;;  %1328 = vmatpush.bf16.msra.mxu1 %v3638_v21  ;;  %v5471_v20 = vld [vmem:[#allocation40_spill] sm:$0xff]  ;;  %v5472_v21 = vld [vmem:[#allocation41_spill] sm:$0xff] }
 0x1fc   :  { %1341 = vmatpush.bf16.msra.mxu2 %v3642_v22  ;;  %1354 = vmatpush.bf16.msra.mxu3 %v3644_v23  ;;  %v5473_v22 = vld [vmem:[#allocation42_spill] sm:$0xff]  ;;  %v5474_v23 = vld [vmem:[#allocation45_spill] sm:$0xff] }
 0x1ff   :  { %1316 = vmatpush.bf16.msra.mxu0 %v3648_v24  ;;  %1329 = vmatpush.bf16.msra.mxu1 %v3650_v25  ;;  %v5475_v24 = vld [vmem:[#allocation17_spill] sm:$0xff] }
 0x200   :  { %1342 = vmatpush.bf16.msra.mxu2 %v3654_v26  ;;  %1355 = vmatpush.bf16.msra.mxu3 %v3656_v27  ;;  %v2548_v25 = vadd.f32 -0.03137255, %v5475_v24  ;;  %v5476_v26 = vld [vmem:[#allocation19_spill] sm:$0xff] }
 0x201   :  { %v2549_v27 = vadd.f32 -0.03137255, %v5476_v26 }
 0x203   :  { %1317 = vmatpush.bf16.msra.mxu0 %v3658_v28  ;;  %1330 = vmatpush.bf16.msra.mxu1 %v3662_v29  ;;  %v299_v28 = vadd.f32 0.03137255, %v5475_v24  ;;  %v300_v29 = vadd.f32 0.03137255, %v5476_v26 }
 0x204   :  { %1343 = vmatpush.bf16.msra.mxu2 %v3664_v30  ;;  %1356 = vmatpush.bf16.msra.mxu3 %v3666_v31 }
 0x207   :  { %1362 = vmatpush.bf16.msrb.mxu0 %v3670_v32  ;;  %1375 = vmatpush.bf16.msrb.mxu1 %v3676_v35  ;;  %v4087_v32 = vmax.f32 %v2548_v25, -1.0  ;;  %v4089_v35 = vmax.f32 %v2549_v27, -1.0 }
 0x208   :  { %1388 = vmatpush.bf16.msrb.mxu2 %v3682_v38  ;;  %1401 = vmatpush.bf16.msrb.mxu3 %v3684_v39  ;;  %v5199_v38 = vmov -0.007843138  }
 0x20b   :  { %1363 = vmatpush.bf16.msrb.mxu0 %v3700_v44  ;;  %1376 = vmatpush.bf16.msrb.mxu1 %v3702_v45  ;;  %v4093_v45 = vmin.f32 %v299_v28, 1.0 }
 0x20c   :  { %1389 = vmatpush.bf16.msrb.mxu2 %v3706_v46  ;;  %1402 = vmatpush.bf16.msrb.mxu3 %v3708_v47  ;;  %v4095_v46 = vmin.f32 %v300_v29, 1.0 }
 0x20f   :  { %1364 = vmatpush.bf16.msrb.mxu0 %v5451_v0  ;;  %1377 = vmatpush.bf16.msrb.mxu1 %v5452_v1 }
 0x210   :  { %1390 = vmatpush.bf16.msrb.mxu2 %v5453_v2  ;;  %1403 = vmatpush.bf16.msrb.mxu3 %v5454_v3 }
 0x213   :  { %1365 = vmatpush.bf16.msrb.mxu0 %v5455_v4  ;;  %1378 = vmatpush.bf16.msrb.mxu1 %v5456_v5 }
 0x214   :  { %1391 = vmatpush.bf16.msrb.mxu2 %v5457_v6  ;;  %1404 = vmatpush.bf16.msrb.mxu3 %v5458_v7  ;;  %v4121_v6 = vmin.f32 %v301_v36, 1.0  ;;  %v4123_v7 = vmin.f32 %v302_v41, 1.0  ;;  %v5491_v36 = vld [vmem:[#allocation46_spill] sm:$0xff] }
 0x215   :  { %v2554_v41 = vadd.f32 -0.03137255, %v5491_v36 }
 0x217   :  { %1366 = vmatpush.bf16.msrb.mxu0 %v5459_v8  ;;  %1379 = vmatpush.bf16.msrb.mxu1 %v5460_v9  ;;  %v3232_v8 = vld [vmem:[#allocation2 + $0x10] sm:$0xff] }
 0x218   :  { %1392 = vmatpush.bf16.msrb.mxu2 %v5461_v10  ;;  %1405 = vmatpush.bf16.msrb.mxu3 %v5462_v11  ;;  %v3233_v10 = vld [vmem:[#allocation2 + $0x18] sm:$0xff] }
 0x21b   :  { %1367 = vmatpush.bf16.msrb.mxu0 %v5463_v12  ;;  %1380 = vmatpush.bf16.msrb.mxu1 %v5464_v13 }
 0x21c   :  { %1393 = vmatpush.bf16.msrb.mxu2 %v5465_v14  ;;  %1406 = vmatpush.bf16.msrb.mxu3 %v5466_v15  ;;  %v5479_v14 = vld [vmem:[#allocation48_spill] sm:$0xff]  ;;  %v5480_v15 = vld [vmem:[#allocation49_spill] sm:$0xff] }
 0x21f   :  { %1368 = vmatpush.bf16.msrb.mxu0 %v5467_v16  ;;  %1381 = vmatpush.bf16.msrb.mxu1 %v5468_v17  ;;  %v5481_v16 = vld [vmem:[#allocation43_spill] sm:$0xff] }
 0x220   :  { %1394 = vmatpush.bf16.msrb.mxu2 %v5469_v18  ;;  %1407 = vmatpush.bf16.msrb.mxu3 %v5470_v19  ;;  %v2552_v17 = vadd.f32 -0.03137255, %v5481_v16  ;;  %v5482_v18 = vld [vmem:[#allocation44_spill] sm:$0xff] }
 0x221   :  { %v2553_v19 = vadd.f32 -0.03137255, %v5482_v18 }
 0x223   :  { %1369 = vmatpush.bf16.msrb.mxu0 %v5471_v20  ;;  %1382 = vmatpush.bf16.msrb.mxu1 %v5472_v21 }
 0x224   :  { %1395 = vmatpush.bf16.msrb.mxu2 %v5473_v22  ;;  %1408 = vmatpush.bf16.msrb.mxu3 %v5474_v23  ;;  %v303_v22 = vadd.f32 0.03137255, %v5481_v16  ;;  %v304_v23 = vadd.f32 0.03137255, %v5482_v18 }
 0x226   :  { %v4151_v53 = vmin.f32 %v303_v22, 1.0  ;;  %v4153_v34 = vmin.f32 %v304_v23, 1.0  ;;  %v5499_v22 = vld [vmem:[#allocation60_spill] sm:$0xff] }
 0x228   :  { %5487 = vst [vmem:[#allocation22_spill] sm:$0xff] %v4151_v53 }
 0x229   :  { %5488 = vst [vmem:[#allocation23_spill] sm:$0xff] %v4153_v34 }
 0x262   :  { %v1167_v30 = vpop.f32.mrf.mxu0  ;;  %v1180_v31 = vpop.f32.mrf.mxu1 }
 0x263   :  { %vm1262_vm6 = vcmp.ge.f32.partialorder %v1167_v30, 0.0  ;;  %vm1263_vm7 = vcmp.ge.f32.partialorder %v1180_v31, 0.0  ;;  %v5483_v30 = vld [vmem:[#allocation52_spill] sm:$0xff]  ;;  %v5484_v31 = vld [vmem:[#allocation53_spill] sm:$0xff] }
 0x264   :  { %v1270_v39 = vsel %vm1262_vm6, 0.007843138, %v5199_v38  ;;  %v1271_v44 = vsel %vm1263_vm7, 0.007843138, %v5199_v38 }
 0x265   :  { %v1278_v47 = vadd.f32 %v1270_v39, %v5475_v24  ;;  %v1279_v61 = vadd.f32 %v1271_v44, %v5476_v26  ;;  %v4145_v39 = vmax.f32 %v2552_v17, -1.0  ;;  %v4147_v44 = vmax.f32 %v2553_v19, -1.0 }
 0x267   :  { %v1286_v50 = vmax.f32 %v1278_v47, %v4087_v32  ;;  %v1287_v42 = vmax.f32 %v1279_v61, %v4089_v35  ;;  %5485 = vst [vmem:[#allocation20_spill] sm:$0xff] %v4145_v39 }
 0x268   :  { %5486 = vst [vmem:[#allocation21_spill] sm:$0xff] %v4147_v44 }
 0x269   :  { %v4106_v57 = vmin.f32 %v1286_v50, %v4093_v45  ;;  %v4109_v63 = vmin.f32 %v1287_v42, %v4095_v46  ;;  %v1193_v52 = vpop.f32.mrf.mxu2  ;;  %v1206_v49 = vpop.f32.mrf.mxu3  ;;  %v5489_v50 = vld [vmem:[#allocation50_spill] sm:$0xff]  ;;  %v5490_v42 = vld [vmem:[#allocation51_spill] sm:$0xff] }
 0x26a   :  { %vm1264_vm8 = vcmp.ge.f32.partialorder %v1193_v52, 0.0  ;;  %vm1265_vm9 = vcmp.ge.f32.partialorder %v1206_v49, 0.0  ;;  %v1169_v0 = vpop.f32.mrf.mxu0  ;;  %v1182_v1 = vpop.f32.mrf.mxu1  ;;  %v5492_v52 = vld [vmem:[#allocation47_spill] sm:$0xff] }
 0x26b   :  { %v1272_v2 = vsel %vm1264_vm8, 0.007843138, %v5199_v38  ;;  %v1273_v3 = vsel %vm1265_vm9, 0.007843138, %v5199_v38  ;;  %v1302_v4 = vpack.c.bf16 %v4106_v57, %v4106_v57  ;;  %v1303_v5 = vpack.c.bf16 %v4109_v63, %v4109_v63  ;;  %v5493_v0 = vld [vmem:[#allocation56_spill] sm:$0xff]  ;;  %v5494_v1 = vld [vmem:[#allocation57_spill] sm:$0xff] }
 0x26c   :  { %v1280_v9 = vadd.f32 %v3232_v8, %v1272_v2  ;;  %v1281_v11 = vadd.f32 %v3233_v10, %v1273_v3  ;;  %v2555_v49 = vadd.f32 -0.03137255, %v5492_v52 }
 0x26d   :  { %1318 = vmatmul.bf16.vlgmr.msra.gmra.mxu0 %v1302_v4  ;;  %1331 = vmatmul.bf16.vlgmr.msra.gmra.mxu1 %v1303_v5  ;;  %v305_v4 = vadd.f32 0.03137255, %v5491_v36  ;;  %v306_v5 = vadd.f32 0.03137255, %v5492_v52 }
 0x26e   :  { %v1288_v12 = vmax.f32 %v1280_v9, %v4111_v58  ;;  %v1289_v13 = vmax.f32 %v1281_v11, %v4113_v62  ;;  %1427 = vmatpush.bf16.msra.mxu0 %v5479_v14  ;;  %1440 = vmatpush.bf16.msra.mxu1 %v5480_v15  ;;  %v4177_v17 = vmax.f32 %v2555_v49, -1.0  ;;  %v5504_v49 = vld [vmem:[#allocation64_spill] sm:$0xff] }
 0x270   :  { %v4132_v20 = vmin.f32 %v1288_v12, %v4121_v6  ;;  %v4135_v21 = vmin.f32 %v1289_v13, %v4123_v7  ;;  %v5495_v12 = vld [vmem:[#allocation54_spill] sm:$0xff]  ;;  %v5496_v13 = vld [vmem:[#allocation55_spill] sm:$0xff]  ;;  %5498 = vst [vmem:[#allocation25_spill] sm:$0xff] %v4177_v17 }
 0x271   :  { %v1195_v24 = vpop.f32.mrf.mxu2  ;;  %v1208_v25 = vpop.f32.mrf.mxu3 }
 0x272   :  { %v1219_v26 = vpop.f32.mrf.mxu0  ;;  %v1232_v27 = vpop.f32.mrf.mxu1  ;;  %v1304_v28 = vpack.c.bf16 %v4132_v20, %v4132_v20  ;;  %v1305_v29 = vpack.c.bf16 %v4135_v21, %v4135_v21  ;;  %1428 = vmatpush.bf16.msra.mxu0 %v5483_v30  ;;  %1441 = vmatpush.bf16.msra.mxu1 %v5484_v31 }
 0x273   :  { %vm1266_vm10 = vcmp.ge.f32.partialorder %v1219_v26, 0.0  ;;  %vm1267_vm11 = vcmp.ge.f32.partialorder %v1232_v27, 0.0  ;;  %v4187_v27 = vmin.f32 %v305_v4, 1.0 }
 0x274   :  { %v1274_v47 = vsel %vm1266_vm10, 0.007843138, %v5199_v38  ;;  %v1275_v61 = vsel %vm1267_vm11, 0.007843138, %v5199_v38  ;;  %1344 = vmatmul.bf16.vlgmr.msra.gmra.mxu2 %v1304_v28  ;;  %1357 = vmatmul.bf16.vlgmr.msra.gmra.mxu3 %v1305_v29  ;;  %v4189_v28 = vmin.f32 %v306_v5, 1.0 }
 0x275   :  { %v1282_v51 = vadd.f32 %v1274_v47, %v5481_v16  ;;  %v1283_v55 = vadd.f32 %v1275_v61, %v5482_v18  ;;  %1453 = vmatpush.bf16.msra.mxu2 %v5489_v50  ;;  %1466 = vmatpush.bf16.msra.mxu3 %v5490_v42  ;;  %v4175_v16 = vmax.f32 %v2554_v41, -1.0  ;;  %5500 = vst [vmem:[#allocation26_spill] sm:$0xff] %v4187_v27  ;;  %v5503_v41 = vld [vmem:[#allocation59_spill] sm:$0xff] }
 0x276   :  { %1429 = vmatpush.bf16.msra.mxu0 %v5493_v0  ;;  %1442 = vmatpush.bf16.msra.mxu1 %v5494_v1  ;;  %5501 = vst [vmem:[#allocation27_spill] sm:$0xff] %v4189_v28 }
 0x277   :  { %v1290_v2 = vmax.f32 %v1282_v51, %v4145_v39  ;;  %v1291_v3 = vmax.f32 %v1283_v55, %v4147_v44  ;;  %5497 = vst [vmem:[#allocation24_spill] sm:$0xff] %v4175_v16  ;;  %v5502_v55 = vld [vmem:[#allocation58_spill] sm:$0xff] }
 0x279   :  { %v4168_v8 = vmin.f32 %v1290_v2, %v4151_v53  ;;  %v4171_v9 = vmin.f32 %v1291_v3, %v4153_v34  ;;  %v1245_v10 = vpop.f32.mrf.mxu2  ;;  %v1258_v11 = vpop.f32.mrf.mxu3  ;;  %1454 = vmatpush.bf16.msra.mxu2 %v5495_v12  ;;  %1467 = vmatpush.bf16.msra.mxu3 %v5496_v13  ;;  %v5505_v2 = vld [vmem:[#allocation65_spill] sm:$0xff] }
 0x27a   :  { %vm1268_vm12 = vcmp.ge.f32.partialorder %v1245_v10, 0.0  ;;  %vm1269_vm13 = vcmp.ge.f32.partialorder %v1258_v11, 0.0  ;;  %v1221_v18 = vpop.f32.mrf.mxu0  ;;  %v1234_v19 = vpop.f32.mrf.mxu1  ;;  %1430 = vmatpush.bf16.msra.mxu0 %v5499_v22  ;;  %1443 = vmatpush.bf16.msra.mxu1 %v3852_v40  ;;  %v5506_v11 = vld [vmem:[#allocation62_spill] sm:$0xff] }
 0x27b   :  { %v1276_v23 = vsel %vm1268_vm12, 0.007843138, %v5199_v38  ;;  %v1277_v24 = vsel %vm1269_vm13, 0.007843138, %v5199_v38  ;;  %v1306_v25 = vpack.c.bf16 %v4168_v8, %v4168_v8  ;;  %v1307_v26 = vpack.c.bf16 %v4171_v9, %v4171_v9  ;;  %v5507_v18 = vld [vmem:[#allocation63_spill] sm:$0xff]  ;;  %v5508_v19 = vld [vmem:[#allocation68_spill] sm:$0xff] }
 0x27c   :  { %v1284_v29 = vadd.f32 %v1276_v23, %v5491_v36  ;;  %v1285_v47 = vadd.f32 %v1277_v24, %v5492_v52  ;;  %v5509_v23 = vld [vmem:[#allocation69_spill] sm:$0xff]  ;;  %v5510_v24 = vld [vmem:[#allocation66_spill] sm:$0xff]  ;;  %v5521_v38 = vld [vmem:[#allocation75_spill] sm:$0xff] }
 0x27d   :  { %1370 = vmatmul.bf16.vlgmr.msrb.gmra.mxu0 %v1306_v25  ;;  %1383 = vmatmul.bf16.vlgmr.msrb.gmra.mxu1 %v1307_v26  ;;  %v5511_v25 = vld [vmem:[#allocation67_spill] sm:$0xff]  ;;  %v5512_v26 = vld [vmem:[#allocation72_spill] sm:$0xff] }
 0x27e   :  { %v1292_v61 = vmax.f32 %v1284_v29, %v4175_v16  ;;  %v1293_v51 = vmax.f32 %v1285_v47, %v4177_v17  ;;  %1455 = vmatpush.bf16.msra.mxu2 %v5502_v55  ;;  %1468 = vmatpush.bf16.msra.mxu3 %v5503_v41  ;;  %v5513_v29 = vld [vmem:[#allocation73_spill] sm:$0xff]  ;;  %v5514_v47 = vld [vmem:[#allocation70_spill] sm:$0xff] }
 0x27f   :  { %1431 = vmatpush.bf16.msra.mxu0 %v5504_v49  ;;  %1444 = vmatpush.bf16.msra.mxu1 %v5505_v2 }
 0x280   :  { %v4200_v3 = vmin.f32 %v1292_v61, %v4187_v27  ;;  %v4203_v36 = vmin.f32 %v1293_v51, %v4189_v28  ;;  %v5515_v61 = vld [vmem:[#allocation71_spill] sm:$0xff]  ;;  %v5516_v51 = vld [vmem:[#allocation76_spill] sm:$0xff] }
 0x281   :  { %v1247_v52 = vpop.f32.mrf.mxu2  ;;  %v1260_v4 = vpop.f32.mrf.mxu3 }
 0x282   :  { %v1308_v5 = vpack.c.bf16 %v4200_v3, %v4200_v3  ;;  %v1309_v10 = vpack.c.bf16 %v4203_v36, %v4203_v36  ;;  %1456 = vmatpush.bf16.msra.mxu2 %v5506_v11  ;;  %1469 = vmatpush.bf16.msra.mxu3 %v5507_v18  ;;  %v5517_v52 = vld [vmem:[#allocation77_spill] sm:$0xff]  ;;  %v5518_v4 = vld [vmem:[#allocation80_spill] sm:$0xff] }
 0x283   :  { %1432 = vmatpush.bf16.msra.mxu0 %v5508_v19  ;;  %1445 = vmatpush.bf16.msra.mxu1 %v5509_v23 }
 0x284   :  { %1396 = vmatmul.bf16.vlgmr.msrb.gmra.mxu2 %v1308_v5  ;;  %1409 = vmatmul.bf16.vlgmr.msrb.gmra.mxu3 %v1309_v10  ;;  %v5519_v5 = vld [vmem:[#allocation81_spill] sm:$0xff]  ;;  %v5520_v10 = vld [vmem:[#allocation74_spill] sm:$0xff] }
 0x286   :  { %1457 = vmatpush.bf16.msra.mxu2 %v5510_v24  ;;  %1470 = vmatpush.bf16.msra.mxu3 %v5511_v25  ;;  %v5522_v25 = vld [vmem:[#allocation84_spill] sm:$0xff] }
 0x287   :  { %1433 = vmatpush.bf16.msra.mxu0 %v5512_v26  ;;  %1446 = vmatpush.bf16.msra.mxu1 %v5513_v29  ;;  %v5523_v26 = vld [vmem:[#allocation85_spill] sm:$0xff]  ;;  %v5524_v29 = vld [vmem:[#allocation78_spill] sm:$0xff] }
 0x28a   :  { %1458 = vmatpush.bf16.msra.mxu2 %v5514_v47  ;;  %1471 = vmatpush.bf16.msra.mxu3 %v5515_v61  ;;  %v5525_v47 = vld [vmem:[#allocation79_spill] sm:$0xff]  ;;  %v5526_v61 = vld [vmem:[#allocation82_spill] sm:$0xff] }
 0x28b   :  { %1434 = vmatpush.bf16.msra.mxu0 %v5516_v51  ;;  %1447 = vmatpush.bf16.msra.mxu1 %v5517_v52  ;;  %v5527_v51 = vld [vmem:[#allocation83_spill] sm:$0xff]  ;;  %v5528_v52 = vld [vmem:[#allocation88_spill] sm:$0xff] }
 0x28e   :  { %1459 = vmatpush.bf16.msra.mxu2 %v5520_v10  ;;  %1472 = vmatpush.bf16.msra.mxu3 %v5521_v38  ;;  %v5531_v10 = vld [vmem:[#allocation87_spill] sm:$0xff]  ;;  %v5532_v38 = vld [vmem:[#allocation92_spill] sm:$0xff] }
 0x28f   :  { %1479 = vmatpush.bf16.msrb.mxu0 %v5518_v4  ;;  %1492 = vmatpush.bf16.msrb.mxu1 %v5519_v5  ;;  %v5529_v4 = vld [vmem:[#allocation89_spill] sm:$0xff]  ;;  %v5530_v5 = vld [vmem:[#allocation86_spill] sm:$0xff] }
 0x292   :  { %1460 = vmatpush.bf16.msra.mxu2 %v5524_v29  ;;  %1473 = vmatpush.bf16.msra.mxu3 %v5525_v47  ;;  %v5535_v29 = vld [vmem:[#allocation91_spill] sm:$0xff]  ;;  %v5536_v47 = vld [vmem:[#allocation96_spill] sm:$0xff] }
 0x293   :  { %1480 = vmatpush.bf16.msrb.mxu0 %v5522_v25  ;;  %1493 = vmatpush.bf16.msrb.mxu1 %v5523_v26  ;;  %v5533_v25 = vld [vmem:[#allocation93_spill] sm:$0xff]  ;;  %v5534_v26 = vld [vmem:[#allocation90_spill] sm:$0xff] }
 0x296   :  { %1505 = vmatpush.bf16.msrb.mxu2 %v5526_v61  ;;  %1518 = vmatpush.bf16.msrb.mxu3 %v5527_v51  ;;  %v5537_v61 = vld [vmem:[#allocation97_spill] sm:$0xff]  ;;  %v5538_v51 = vld [vmem:[#allocation94_spill] sm:$0xff] }
 0x297   :  { %1481 = vmatpush.bf16.msrb.mxu0 %v5528_v52  ;;  %1494 = vmatpush.bf16.msrb.mxu1 %v5529_v4  ;;  %v5539_v52 = vld [vmem:[#allocation95_spill] sm:$0xff]  ;;  %v5540_v4 = vld [vmem:[#allocation100_spill] sm:$0xff] }
 0x29a   :  { %1506 = vmatpush.bf16.msrb.mxu2 %v5530_v5  ;;  %1519 = vmatpush.bf16.msrb.mxu3 %v5531_v10  ;;  %v5541_v5 = vld [vmem:[#allocation101_spill] sm:$0xff]  ;;  %v5542_v10 = vld [vmem:[#allocation98_spill] sm:$0xff] }
 0x29b   :  { %1482 = vmatpush.bf16.msrb.mxu0 %v5532_v38  ;;  %1495 = vmatpush.bf16.msrb.mxu1 %v5533_v25  ;;  %v5543_v38 = vld [vmem:[#allocation99_spill] sm:$0xff] }
 0x29e   :  { %1507 = vmatpush.bf16.msrb.mxu2 %v5534_v26  ;;  %1520 = vmatpush.bf16.msrb.mxu3 %v5535_v29 }
 0x29f   :  { %1483 = vmatpush.bf16.msrb.mxu0 %v5536_v47  ;;  %1496 = vmatpush.bf16.msrb.mxu1 %v5537_v61 }
 0x2a2   :  { %1508 = vmatpush.bf16.msrb.mxu2 %v5538_v51  ;;  %1521 = vmatpush.bf16.msrb.mxu3 %v5539_v52  ;;  %v5544_v52 = vld [vmem:[#allocation106_spill] sm:$0xff] }
 0x2a3   :  { %1484 = vmatpush.bf16.msrb.mxu0 %v5540_v4  ;;  %1497 = vmatpush.bf16.msrb.mxu1 %v5541_v5  ;;  %v5545_v4 = vld [vmem:[#allocation107_spill] sm:$0xff]  ;;  %v5546_v5 = vld [vmem:[#allocation110_spill] sm:$0xff] }
 0x2a6   :  { %1509 = vmatpush.bf16.msrb.mxu2 %v5542_v10  ;;  %1522 = vmatpush.bf16.msrb.mxu3 %v5543_v38  ;;  %v5547_v10 = vld [vmem:[#allocation111_spill] sm:$0xff] }
 0x2a7   :  { %1485 = vmatpush.bf16.msrb.mxu0 %v3988_v43  ;;  %1498 = vmatpush.bf16.msrb.mxu1 %v3990_v33 }
 0x2aa   :  { %1510 = vmatpush.bf16.msrb.mxu2 %v3981_v59  ;;  %1523 = vmatpush.bf16.msrb.mxu3 %v3984_v60  ;;  %v4260_v60 = vld [vmem:[%s5040_s3] ss:$0 sm:$0xff] }
 0x2ab   :  { %1486 = vmatpush.bf16.msrb.mxu0 %v4000_v56  ;;  %1499 = vmatpush.bf16.msrb.mxu1 %v4002_v48  ;;  %5548 = vst [vmem:[#allocation28_spill] sm:$0xff] %v4260_v60 }
 0x2ae   :  { %1511 = vmatpush.bf16.msrb.mxu2 %v5544_v52  ;;  %1524 = vmatpush.bf16.msrb.mxu3 %v5545_v4 }
 0x2b2   :  { %1512 = vmatpush.bf16.msrb.mxu2 %v5546_v5  ;;  %1525 = vmatpush.bf16.msrb.mxu3 %v5547_v10 }
 0x2ea   :  { %v1319_v38 = vpop.f32.mrf.mxu0  ;;  %v1332_v43 = vpop.f32.mrf.mxu1 }
 0x2eb   :  { %v1320_v56 = vadd.f32 %v4260_v60, %v1319_v38 }
 0x2ed   :  { %v1333_v52 = vadd.f32 %v1332_v43, %v1320_v56 }
 0x2f2   :  { %v1321_v51 = vpop.f32.mrf.mxu0  ;;  %v1334_v33 = vpop.f32.mrf.mxu1 }
 0x2f7   :  { %v1345_v48 = vpop.f32.mrf.mxu2  ;;  %v1358_v59 = vpop.f32.mrf.mxu3 }
 0x2f8   :  { %v1346_v61 = vadd.f32 %v1345_v48, %v1333_v52 }
 0x2fa   :  { %v1371_v4 = vpop.f32.mrf.mxu0  ;;  %v1384_v47 = vpop.f32.mrf.mxu1  ;;  %v1359_v5 = vadd.f32 %v1358_v59, %v1346_v61  ;;  %v4277_v61 = vld [vmem:[#allocation5 + $0xf8] sm:$0xff] }
 0x2fc   :  { %v1372_v26 = vadd.f32 %v1371_v4, %v1359_v5  ;;  %v4280_v4 = vld [vmem:[#allocation5 + $0x30] sm:$0xff] }
 0x2fd   :  { %v4283_v5 = vld [vmem:[#allocation5 + $0x70] sm:$0xff] }
 0x2fe   :  { %v1385_v33 = vadd.f32 %v1384_v47, %v1372_v26  ;;  %v4274_v47 = vld [vmem:[#allocation5 + $0xb8] sm:$0xff] }
 0x2ff   :  { %v1347_v29 = vpop.f32.mrf.mxu2  ;;  %v1360_v10 = vpop.f32.mrf.mxu3 }
 0x300   :  { %v4286_v10 = vld [vmem:[#allocation5 + $0xb0] sm:$0xff] }
 0x302   :  { %v1373_v25 = vpop.f32.mrf.mxu0  ;;  %v1386_v51 = vpop.f32.mrf.mxu1 }
 0x303   :  { %v4289_v51 = vld [vmem:[#allocation5 + $0xf0] sm:$0xff] }
 0x307   :  { %v1397_v24 = vpop.f32.mrf.mxu2  ;;  %v1410_v23 = vpop.f32.mrf.mxu3 }
 0x308   :  { %v1398_v19 = vadd.f32 %v1397_v24, %v1385_v33  ;;  %v4292_v33 = vld [vmem:[#allocation5 + $0x28] sm:$0xff] }
 0x309   :  { %5549 = vst [vmem:[#allocation29_spill] sm:$0xff] %v4292_v33 }
 0x30a   :  { %v1411_v18 = vadd.f32 %v1410_v23, %v1398_v19 }
 0x30c   :  { %v1414_v38 = vsel %vm277_vm0, %v1411_v18, -1e+30  ;;  %v4271_v18 = vld [vmem:[#allocation5 + $0x78] sm:$0xff] }
 0x30d   :  { %1415 = vmax.xlane.f32.xlu1 %v1414_v38 }
 0x30f   :  { %v1399_v60 = vpop.f32.mrf.mxu2  ;;  %v1412_v43 = vpop.f32.mrf.mxu3 }
 0x310   :  { %v4268_v60 = vld [vmem:[#allocation5 + $0x38] sm:$0xff]  ;;  %v4298_v43 = vld [vmem:[#allocation5 + $0xa8] sm:$0xff] }
 0x311   :  { %5551 = vst [vmem:[#allocation31_spill] sm:$0xff] %v4298_v43 }
 0x380   :  { %v1416_v56 = vpop.xlane.xlu1 %1415 }
 0x381   :  { %v1417_v48 = vsub.f32 %v1414_v38, %v1416_v56  ;;  %v4295_v38 = vld [vmem:[#allocation5 + $0x68] sm:$0xff] }
 0x382   :  { %5550 = vst [vmem:[#allocation30_spill] sm:$0xff] %v4295_v38  ;;  %v4301_v56 = vld [vmem:[#allocation5 + $0xe8] sm:$0xff] }
 0x383   :  { %v1418_v52 = vmul.f32 1.442695, %v1417_v48  ;;  %5552 = vst [vmem:[#allocation32_spill] sm:$0xff] %v4301_v56  ;;  %v4304_v48 = vld [vmem:[#allocation5 + $0x20] sm:$0xff] }
 0x384   :  { %5553 = vst [vmem:[#allocation33_spill] sm:$0xff] %v4304_v48 }
 0x385   :  { %3216 = vpow2.f32 %v1418_v52  ;;  %v4307_v52 = vld [vmem:[#allocation5 + $0x60] sm:$0xff] }
 0x386   :  { %5554 = vst [vmem:[#allocation34_spill] sm:$0xff] %v4307_v52 }
 0x38b   :  { %v3217_v59 = vpop.eup %3216 }
 0x38c   :  { %v1420_v25 = vsel %vm277_vm0, %v3217_v59, 0.0  ;;  %v4310_v59 = vld [vmem:[#allocation5 + $0xa0] sm:$0xff] }
 0x38d   :  { %1421 = vadd.xlane.f32.xlu2 %v1420_v25  ;;  %5555 = vst [vmem:[#allocation35_spill] sm:$0xff] %v4310_v59 }
 0x400   :  { %v1422_v26 = vpop.xlane.xlu2 %1421 }
 0x401   :  { %3218 = vrcp.f32 %v1422_v26  ;;  %v4316_v26 = vld [vmem:[#allocation5 + $0x18] sm:$0xff] }
 0x402   :  { %5557 = vst [vmem:[#allocation37_spill] sm:$0xff] %v4316_v26 }
 0x407   :  { %v3219_v29 = vpop.eup %3218 }
 0x408   :  { %v1424_v24 = vmul.f32 %v3219_v29, %v1420_v25  ;;  %v4313_v25 = vld [vmem:[#allocation5 + $0xe0] sm:$0xff]  ;;  %v4319_v29 = vld [vmem:[#allocation5 + $0x58] sm:$0xff] }
 0x409   :  { %5556 = vst [vmem:[#allocation36_spill] sm:$0xff] %v4313_v25 }
 0x40a   :  { %v1425_v19 = vsub.f32 %v1424_v24, %v4015_v37  ;;  %5558 = vst [vmem:[#allocation38_spill] sm:$0xff] %v4319_v29  ;;  %v4322_v24 = vld [vmem:[#allocation5 + $0x98] sm:$0xff] }
 0x40b   :  { %5559 = vst [vmem:[#allocation39_spill] sm:$0xff] %v4322_v24 }
 0x40c   :  { %v1426_v23 = vpack.c.bf16 %v1425_v19, %v1425_v19  ;;  %v4325_v19 = vld [vmem:[#allocation5 + $0xd8] sm:$0xff] }
 0x40d   :  { %5560 = vst [vmem:[#allocation40_spill] sm:$0xff] %v4325_v19 }
 0x40e   :  { %1435 = vmatmul.bf16.vlgmr.msra.gmra.mxu0 %v1426_v23  ;;  %1448 = vmatmul.bf16.vlgmr.msra.gmra.mxu1 %v1426_v23 }
 0x40f   :  { %1461 = vmatmul.bf16.vlgmr.msra.gmra.mxu2 %v1426_v23  ;;  %1474 = vmatmul.bf16.vlgmr.msra.gmra.mxu3 %v1426_v23 }
 0x410   :  { %1579 = vmatpush.bf16.msra.mxu0 %v4268_v60  ;;  %1592 = vmatpush.bf16.msra.mxu1 %v4271_v18 }
 0x411   :  { %1605 = vmatpush.bf16.msra.mxu2 %v4274_v47  ;;  %1618 = vmatpush.bf16.msra.mxu3 %v4277_v61 }
 0x414   :  { %1580 = vmatpush.bf16.msra.mxu0 %v4280_v4  ;;  %1593 = vmatpush.bf16.msra.mxu1 %v4283_v5 }
 0x415   :  { %1606 = vmatpush.bf16.msra.mxu2 %v4286_v10  ;;  %1619 = vmatpush.bf16.msra.mxu3 %v4289_v51 }
 0x418   :  { %1581 = vmatpush.bf16.msra.mxu0 %v4292_v33  ;;  %1594 = vmatpush.bf16.msra.mxu1 %v4295_v38 }
 0x419   :  { %1607 = vmatpush.bf16.msra.mxu2 %v4298_v43  ;;  %1620 = vmatpush.bf16.msra.mxu3 %v4301_v56 }
 0x41c   :  { %1582 = vmatpush.bf16.msra.mxu0 %v4304_v48  ;;  %1595 = vmatpush.bf16.msra.mxu1 %v4307_v52 }
 0x41d   :  { %1608 = vmatpush.bf16.msra.mxu2 %v4310_v59  ;;  %1621 = vmatpush.bf16.msra.mxu3 %v4313_v25  ;;  %v4328_v25 = vld [vmem:[#allocation5 + $0x10] sm:$0xff] }
 0x41e   :  { %1487 = vmatmul.bf16.vlgmr.msrb.gmra.mxu0 %v1426_v23  ;;  %1500 = vmatmul.bf16.vlgmr.msrb.gmra.mxu1 %v1426_v23  ;;  %5561 = vst [vmem:[#allocation41_spill] sm:$0xff] %v4328_v25 }
 0x41f   :  { %1513 = vmatmul.bf16.vlgmr.msrb.gmra.mxu2 %v1426_v23  ;;  %1526 = vmatmul.bf16.vlgmr.msrb.gmra.mxu3 %v1426_v23  ;;  %v4331_v23 = vld [vmem:[#allocation5 + $0x50] sm:$0xff] }
 0x420   :  { %1583 = vmatpush.bf16.msra.mxu0 %v4316_v26  ;;  %1596 = vmatpush.bf16.msra.mxu1 %v4319_v29  ;;  %5562 = vst [vmem:[#allocation42_spill] sm:$0xff] %v4331_v23  ;;  %v4334_v26 = vld [vmem:[#allocation5 + $0x90] sm:$0xff] }
 0x421   :  { %1609 = vmatpush.bf16.msra.mxu2 %v4322_v24  ;;  %1622 = vmatpush.bf16.msra.mxu3 %v4325_v19  ;;  %5563 = vst [vmem:[#allocation45_spill] sm:$0xff] %v4334_v26  ;;  %v4337_v29 = vld [vmem:[#allocation5 + $0xd0] sm:$0xff]  ;;  %v4340_v24 = vld [vmem:[#allocation5 + $0x8] sm:$0xff] }
 0x422   :  { %5564 = vst [vmem:[#allocation17_spill] sm:$0xff] %v4337_v29  ;;  %v4343_v19 = vld [vmem:[#allocation5 + $0x48] sm:$0xff] }
 0x423   :  { %5565 = vst [vmem:[#allocation19_spill] sm:$0xff] %v4340_v24 }
 0x424   :  { %1584 = vmatpush.bf16.msra.mxu0 %v4328_v25  ;;  %1597 = vmatpush.bf16.msra.mxu1 %v4331_v23  ;;  %5566 = vst [vmem:[#allocation16_spill] sm:$0xff] %v4343_v19  ;;  %v4346_v25 = vld [vmem:[#allocation5 + $0x88] sm:$0xff] }
 0x425   :  { %1610 = vmatpush.bf16.msra.mxu2 %v4334_v26  ;;  %1623 = vmatpush.bf16.msra.mxu3 %v4337_v29  ;;  %5567 = vst [vmem:[#allocation18_spill] sm:$0xff] %v4346_v25  ;;  %v4349_v23 = vld [vmem:[#allocation5 + $0xc8] sm:$0xff]  ;;  %v4352_v26 = vld [vmem:[#allocation5] sm:$0xff] }
 0x426   :  { %5568 = vst [vmem:[#allocation48_spill] sm:$0xff] %v4349_v23  ;;  %v4355_v29 = vld [vmem:[#allocation5 + $0x40] sm:$0xff] }
 0x427   :  { %5569 = vst [vmem:[#allocation49_spill] sm:$0xff] %v4352_v26 }
 0x428   :  { %1585 = vmatpush.bf16.msra.mxu0 %v4340_v24  ;;  %1598 = vmatpush.bf16.msra.mxu1 %v4343_v19  ;;  %5570 = vst [vmem:[#allocation43_spill] sm:$0xff] %v4355_v29  ;;  %v4358_v24 = vld [vmem:[#allocation5 + $0x138] sm:$0xff] }
 0x429   :  { %1611 = vmatpush.bf16.msra.mxu2 %v4346_v25  ;;  %1624 = vmatpush.bf16.msra.mxu3 %v4349_v23  ;;  %5571 = vst [vmem:[#allocation44_spill] sm:$0xff] %v4358_v24  ;;  %v4361_v19 = vld [vmem:[#allocation5 + $0x178] sm:$0xff]  ;;  %v4364_v25 = vld [vmem:[#allocation5 + $0x80] sm:$0xff] }
 0x42a   :  { %5572 = vst [vmem:[#allocation52_spill] sm:$0xff] %v4361_v19  ;;  %v4367_v23 = vld [vmem:[#allocation5 + $0xc0] sm:$0xff] }
 0x42b   :  { %5573 = vst [vmem:[#allocation53_spill] sm:$0xff] %v4364_v25 }
 0x42c   :  { %1586 = vmatpush.bf16.msra.mxu0 %v4352_v26  ;;  %1599 = vmatpush.bf16.msra.mxu1 %v4355_v29  ;;  %5574 = vst [vmem:[#allocation50_spill] sm:$0xff] %v4367_v23  ;;  %v4370_v26 = vld [vmem:[#allocation5 + $0x1b8] sm:$0xff] }
 0x42d   :  { %1612 = vmatpush.bf16.msra.mxu2 %v4364_v25  ;;  %1625 = vmatpush.bf16.msra.mxu3 %v4367_v23  ;;  %5575 = vst [vmem:[#allocation51_spill] sm:$0xff] %v4370_v26  ;;  %v4373_v29 = vld [vmem:[#allocation5 + $0x1f8] sm:$0xff]  ;;  %v4382_v25 = vld [vmem:[#allocation5 + $0x1b0] sm:$0xff] }
 0x42e   :  { %5576 = vst [vmem:[#allocation46_spill] sm:$0xff] %v4373_v29  ;;  %v4385_v23 = vld [vmem:[#allocation5 + $0x1f0] sm:$0xff] }
 0x42f   :  { %5579 = vst [vmem:[#allocation57_spill] sm:$0xff] %v4382_v25 }
 0x430   :  { %1631 = vmatpush.bf16.msrb.mxu0 %v4358_v24  ;;  %1644 = vmatpush.bf16.msrb.mxu1 %v4361_v19  ;;  %v4376_v24 = vld [vmem:[#allocation5 + $0x130] sm:$0xff]  ;;  %5580 = vst [vmem:[#allocation112_spill] sm:$0xff] %v4385_v23 }
 0x431   :  { %1657 = vmatpush.bf16.msrb.mxu2 %v4370_v26  ;;  %1670 = vmatpush.bf16.msrb.mxu3 %v4373_v29  ;;  %5577 = vst [vmem:[#allocation47_spill] sm:$0xff] %v4376_v24  ;;  %v4379_v19 = vld [vmem:[#allocation5 + $0x170] sm:$0xff]  ;;  %v4388_v26 = vld [vmem:[#allocation5 + $0x128] sm:$0xff] }
 0x432   :  { %5578 = vst [vmem:[#allocation56_spill] sm:$0xff] %v4379_v19  ;;  %v4391_v29 = vld [vmem:[#allocation5 + $0x168] sm:$0xff] }
 0x433   :  { %5581 = vst [vmem:[#allocation113_spill] sm:$0xff] %v4388_v26 }
 0x434   :  { %1632 = vmatpush.bf16.msrb.mxu0 %v4376_v24  ;;  %1645 = vmatpush.bf16.msrb.mxu1 %v4379_v19  ;;  %5582 = vst [vmem:[#allocation114_spill] sm:$0xff] %v4391_v29  ;;  %v4394_v24 = vld [vmem:[#allocation5 + $0x1a8] sm:$0xff] }
 0x435   :  { %1658 = vmatpush.bf16.msrb.mxu2 %v4382_v25  ;;  %1671 = vmatpush.bf16.msrb.mxu3 %v4385_v23  ;;  %5583 = vst [vmem:[#allocation115_spill] sm:$0xff] %v4394_v24  ;;  %v4397_v19 = vld [vmem:[#allocation5 + $0x1e8] sm:$0xff]  ;;  %v4400_v25 = vld [vmem:[#allocation5 + $0x120] sm:$0xff] }
 0x436   :  { %5584 = vst [vmem:[#allocation116_spill] sm:$0xff] %v4397_v19  ;;  %v4403_v23 = vld [vmem:[#allocation5 + $0x160] sm:$0xff] }
 0x437   :  { %5585 = vst [vmem:[#allocation117_spill] sm:$0xff] %v4400_v25 }
 0x438   :  { %1633 = vmatpush.bf16.msrb.mxu0 %v4388_v26  ;;  %1646 = vmatpush.bf16.msrb.mxu1 %v4391_v29  ;;  %5586 = vst [vmem:[#allocation118_spill] sm:$0xff] %v4403_v23  ;;  %v4406_v26 = vld [vmem:[#allocation5 + $0x1a0] sm:$0xff] }
 0x439   :  { %1659 = vmatpush.bf16.msrb.mxu2 %v4394_v24  ;;  %1672 = vmatpush.bf16.msrb.mxu3 %v4397_v19  ;;  %5587 = vst [vmem:[#allocation119_spill] sm:$0xff] %v4406_v26  ;;  %v4409_v29 = vld [vmem:[#allocation5 + $0x1e0] sm:$0xff]  ;;  %v4412_v24 = vld [vmem:[#allocation5 + $0x118] sm:$0xff] }
 0x43a   :  { %5588 = vst [vmem:[#allocation120_spill] sm:$0xff] %v4409_v29  ;;  %v4415_v19 = vld [vmem:[#allocation5 + $0x158] sm:$0xff] }
 0x43b   :  { %5589 = vst [vmem:[#allocation121_spill] sm:$0xff] %v4412_v24 }
 0x43c   :  { %1634 = vmatpush.bf16.msrb.mxu0 %v4400_v25  ;;  %1647 = vmatpush.bf16.msrb.mxu1 %v4403_v23  ;;  %5590 = vst [vmem:[#allocation122_spill] sm:$0xff] %v4415_v19  ;;  %v4418_v25 = vld [vmem:[#allocation5 + $0x198] sm:$0xff] }
 0x43d   :  { %1660 = vmatpush.bf16.msrb.mxu2 %v4406_v26  ;;  %1673 = vmatpush.bf16.msrb.mxu3 %v4409_v29  ;;  %5591 = vst [vmem:[#allocation123_spill] sm:$0xff] %v4418_v25  ;;  %v4421_v23 = vld [vmem:[#allocation5 + $0x1d8] sm:$0xff]  ;;  %v4424_v26 = vld [vmem:[#allocation5 + $0x110] sm:$0xff] }
 0x43e   :  { %5592 = vst [vmem:[#allocation124_spill] sm:$0xff] %v4421_v23  ;;  %v4427_v29 = vld [vmem:[#allocation5 + $0x150] sm:$0xff] }
 0x43f   :  { %5593 = vst [vmem:[#allocation125_spill] sm:$0xff] %v4424_v26 }
 0x440   :  { %1635 = vmatpush.bf16.msrb.mxu0 %v4412_v24  ;;  %1648 = vmatpush.bf16.msrb.mxu1 %v4415_v19  ;;  %5594 = vst [vmem:[#allocation126_spill] sm:$0xff] %v4427_v29  ;;  %v4430_v24 = vld [vmem:[#allocation5 + $0x190] sm:$0xff] }
 0x441   :  { %1661 = vmatpush.bf16.msrb.mxu2 %v4418_v25  ;;  %1674 = vmatpush.bf16.msrb.mxu3 %v4421_v23  ;;  %5595 = vst [vmem:[#allocation127_spill] sm:$0xff] %v4430_v24  ;;  %v4433_v19 = vld [vmem:[#allocation5 + $0x1d0] sm:$0xff]  ;;  %v4436_v25 = vld [vmem:[#allocation5 + $0x108] sm:$0xff] }
 0x442   :  { %5596 = vst [vmem:[#allocation128_spill] sm:$0xff] %v4433_v19  ;;  %v4439_v23 = vld [vmem:[#allocation5 + $0x148] sm:$0xff] }
 0x443   :  { %5597 = vst [vmem:[#allocation129_spill] sm:$0xff] %v4436_v25 }
 0x444   :  { %1636 = vmatpush.bf16.msrb.mxu0 %v4424_v26  ;;  %1649 = vmatpush.bf16.msrb.mxu1 %v4427_v29  ;;  %5598 = vst [vmem:[#allocation130_spill] sm:$0xff] %v4439_v23  ;;  %v4442_v26 = vld [vmem:[#allocation5 + $0x188] sm:$0xff] }
 0x445   :  { %1662 = vmatpush.bf16.msrb.mxu2 %v4430_v24  ;;  %1675 = vmatpush.bf16.msrb.mxu3 %v4433_v19  ;;  %5599 = vst [vmem:[#allocation131_spill] sm:$0xff] %v4442_v26  ;;  %v4445_v29 = vld [vmem:[#allocation5 + $0x1c8] sm:$0xff]  ;;  %v4448_v24 = vld [vmem:[#allocation5 + $0x100] sm:$0xff] }
 0x446   :  { %5600 = vst [vmem:[#allocation132_spill] sm:$0xff] %v4445_v29  ;;  %v4451_v19 = vld [vmem:[#allocation5 + $0x140] sm:$0xff] }
 0x447   :  { %5601 = vst [vmem:[#allocation133_spill] sm:$0xff] %v4448_v24 }
 0x448   :  { %1637 = vmatpush.bf16.msrb.mxu0 %v4436_v25  ;;  %1650 = vmatpush.bf16.msrb.mxu1 %v4439_v23  ;;  %5602 = vst [vmem:[#allocation134_spill] sm:$0xff] %v4451_v19  ;;  %v4454_v25 = vld [vmem:[#allocation5 + $0x180] sm:$0xff] }
 0x449   :  { %1663 = vmatpush.bf16.msrb.mxu2 %v4442_v26  ;;  %1676 = vmatpush.bf16.msrb.mxu3 %v4445_v29  ;;  %5603 = vst [vmem:[#allocation135_spill] sm:$0xff] %v4454_v25  ;;  %v4457_v23 = vld [vmem:[#allocation5 + $0x1c0] sm:$0xff]  ;;  %v5605_v29 = vmov -0.007843138  }
 0x44a   :  { %5604 = vst [vmem:[#allocation136_spill] sm:$0xff] %v4457_v23 }
 0x44c   :  { %1638 = vmatpush.bf16.msrb.mxu0 %v4448_v24  ;;  %1651 = vmatpush.bf16.msrb.mxu1 %v4451_v19 }
 0x44d   :  { %1664 = vmatpush.bf16.msrb.mxu2 %v4454_v25  ;;  %1677 = vmatpush.bf16.msrb.mxu3 %v4457_v23 }
 0x48b   :  { %v1436_v26 = vpop.f32.mrf.mxu0  ;;  %v1449_v59 = vpop.f32.mrf.mxu1 }
 0x48c   :  { %vm1531_vm14 = vcmp.ge.f32.partialorder %v1436_v26, 0.0  ;;  %vm1532_vm15 = vcmp.ge.f32.partialorder %v1449_v59, 0.0 }
 0x48d   :  { %v1539_v52 = vsel %vm1531_vm14, 0.007843138, %v5605_v29  ;;  %v1540_v24 = vsel %vm1532_vm15, 0.007843138, %v5605_v29 }
 0x48e   :  { %v1547_v48 = vadd.f32 %v1539_v52, %v4106_v57  ;;  %v1548_v19 = vadd.f32 %v1540_v24, %v4109_v63 }
 0x490   :  { %v1555_v56 = vmax.f32 %v1547_v48, %v4087_v32  ;;  %v1556_v25 = vmax.f32 %v1548_v19, %v4089_v35 }
 0x492   :  { %v4467_v43 = vmin.f32 %v1555_v56, %v4093_v45  ;;  %v4470_v23 = vmin.f32 %v1556_v25, %v4095_v46  ;;  %v1462_v26 = vpop.f32.mrf.mxu2  ;;  %v1475_v59 = vpop.f32.mrf.mxu3 }
 0x493   :  { %vm1533_vm1 = vcmp.ge.f32.partialorder %v1462_v26, 0.0  ;;  %vm1534_vm2 = vcmp.ge.f32.partialorder %v1475_v59, 0.0  ;;  %v1438_v38 = vpop.f32.mrf.mxu0  ;;  %v1451_v33 = vpop.f32.mrf.mxu1 }
 0x494   :  { %v1541_v57 = vsel %vm1533_vm1, 0.007843138, %v5605_v29  ;;  %v1542_v63 = vsel %vm1534_vm2, 0.007843138, %v5605_v29  ;;  %v1571_v48 = vpack.c.bf16 %v4467_v43, %v4467_v43  ;;  %v1572_v56 = vpack.c.bf16 %v4470_v23, %v4470_v23 }
 0x495   :  { %v1549_v52 = vadd.f32 %v1541_v57, %v4132_v20  ;;  %v1550_v25 = vadd.f32 %v1542_v63, %v4135_v21 }
 0x496   :  { %1587 = vmatmul.bf16.vlgmr.msra.gmra.mxu0 %v1571_v48  ;;  %1600 = vmatmul.bf16.vlgmr.msra.gmra.mxu1 %v1572_v56 }
 0x497   :  { %v1557_v24 = vmax.f32 %v1549_v52, %v4111_v58  ;;  %v1558_v33 = vmax.f32 %v1550_v25, %v4113_v62  ;;  %1696 = vmatpush.bf16.msra.mxu0 %v5479_v14  ;;  %1709 = vmatpush.bf16.msra.mxu1 %v5480_v15 }
 0x499   :  { %v4485_v38 = vmin.f32 %v1557_v24, %v4121_v6  ;;  %v4488_v19 = vmin.f32 %v1558_v33, %v4123_v7 }
 0x49a   :  { %v1464_v26 = vpop.f32.mrf.mxu2  ;;  %v1477_v20 = vpop.f32.mrf.mxu3 }
 0x49b   :  { %v1488_v59 = vpop.f32.mrf.mxu0  ;;  %v1501_v21 = vpop.f32.mrf.mxu1  ;;  %v1573_v57 = vpack.c.bf16 %v4485_v38, %v4485_v38  ;;  %v1574_v63 = vpack.c.bf16 %v4488_v19, %v4488_v19  ;;  %1697 = vmatpush.bf16.msra.mxu0 %v5483_v30  ;;  %1710 = vmatpush.bf16.msra.mxu1 %v5484_v31 }
 0x49c   :  { %vm1535_vm3 = vcmp.ge.f32.partialorder %v1488_v59, 0.0  ;;  %vm1536_vm4 = vcmp.ge.f32.partialorder %v1501_v21, 0.0 }
 0x49d   :  { %v1543_v48 = vsel %vm1535_vm3, 0.007843138, %v5605_v29  ;;  %v1544_v56 = vsel %vm1536_vm4, 0.007843138, %v5605_v29  ;;  %1613 = vmatmul.bf16.vlgmr.msra.gmra.mxu2 %v1573_v57  ;;  %1626 = vmatmul.bf16.vlgmr.msra.gmra.mxu3 %v1574_v63 }
 0x49e   :  { %v1551_v52 = vadd.f32 %v1543_v48, %v4168_v8  ;;  %v1552_v25 = vadd.f32 %v1544_v56, %v4171_v9  ;;  %1722 = vmatpush.bf16.msra.mxu2 %v5489_v50  ;;  %1735 = vmatpush.bf16.msra.mxu3 %v5490_v42 }
 0x49f   :  { %1698 = vmatpush.bf16.msra.mxu0 %v5493_v0  ;;  %1711 = vmatpush.bf16.msra.mxu1 %v5494_v1 }
 0x4a0   :  { %v1559_v24 = vmax.f32 %v1551_v52, %v4145_v39  ;;  %v1560_v33 = vmax.f32 %v1552_v25, %v4147_v44 }
 0x4a2   :  { %v4507_v26 = vmin.f32 %v1559_v24, %v4151_v53  ;;  %v4510_v20 = vmin.f32 %v1560_v33, %v4153_v34  ;;  %v1514_v8 = vpop.f32.mrf.mxu2  ;;  %v1527_v9 = vpop.f32.mrf.mxu3  ;;  %1723 = vmatpush.bf16.msra.mxu2 %v5495_v12  ;;  %1736 = vmatpush.bf16.msra.mxu3 %v5496_v13 }
 0x4a3   :  { %vm1537_vm5 = vcmp.ge.f32.partialorder %v1514_v8, 0.0  ;;  %vm1538_vm6 = vcmp.ge.f32.partialorder %v1527_v9, 0.0  ;;  %v1490_v59 = vpop.f32.mrf.mxu0  ;;  %v1503_v21 = vpop.f32.mrf.mxu1  ;;  %1699 = vmatpush.bf16.msra.mxu0 %v5499_v22  ;;  %1712 = vmatpush.bf16.msra.mxu1 %v3852_v40 }
 0x4a4   :  { %v1545_v57 = vsel %vm1537_vm5, 0.007843138, %v5605_v29  ;;  %v1546_v63 = vsel %vm1538_vm6, 0.007843138, %v5605_v29  ;;  %v1575_v48 = vpack.c.bf16 %v4507_v26, %v4507_v26  ;;  %v1576_v56 = vpack.c.bf16 %v4510_v20, %v4510_v20 }
 0x4a5   :  { %v1553_v52 = vadd.f32 %v1545_v57, %v4200_v3  ;;  %v1554_v25 = vadd.f32 %v1546_v63, %v4203_v36  ;;  %v5607_v57 = vld [vmem:[#allocation63_spill] sm:$0xff]  ;;  %v5608_v63 = vld [vmem:[#allocation68_spill] sm:$0xff] }
 0x4a6   :  { %1639 = vmatmul.bf16.vlgmr.msrb.gmra.mxu0 %v1575_v48  ;;  %1652 = vmatmul.bf16.vlgmr.msrb.gmra.mxu1 %v1576_v56  ;;  %v5609_v48 = vld [vmem:[#allocation69_spill] sm:$0xff]  ;;  %v5610_v56 = vld [vmem:[#allocation66_spill] sm:$0xff] }
 0x4a7   :  { %v1561_v24 = vmax.f32 %v1553_v52, %v4175_v16  ;;  %v1562_v33 = vmax.f32 %v1554_v25, %v4177_v17  ;;  %1724 = vmatpush.bf16.msra.mxu2 %v5502_v55  ;;  %1737 = vmatpush.bf16.msra.mxu3 %v5503_v41  ;;  %v5611_v52 = vld [vmem:[#allocation67_spill] sm:$0xff]  ;;  %v5612_v25 = vld [vmem:[#allocation72_spill] sm:$0xff] }
 0x4a8   :  { %1700 = vmatpush.bf16.msra.mxu0 %v5504_v49  ;;  %1713 = vmatpush.bf16.msra.mxu1 %v5505_v2 }
 0x4a9   :  { %v4531_v8 = vmin.f32 %v1561_v24, %v4187_v27  ;;  %v4534_v3 = vmin.f32 %v1562_v33, %v4189_v28  ;;  %v5613_v24 = vld [vmem:[#allocation73_spill] sm:$0xff]  ;;  %v5614_v33 = vld [vmem:[#allocation70_spill] sm:$0xff] }
 0x4aa   :  { %v1516_v36 = vpop.f32.mrf.mxu2  ;;  %v1529_v9 = vpop.f32.mrf.mxu3 }
 0x4ab   :  { %5606 = vst [vmem:[#allocation137_spill] sm:$0xff] %v4534_v3  ;;  %v1577_v59 = vpack.c.bf16 %v4531_v8, %v4531_v8  ;;  %v1578_v21 = vpack.c.bf16 %v4534_v3, %v4534_v3  ;;  %1725 = vmatpush.bf16.msra.mxu2 %v5506_v11  ;;  %1738 = vmatpush.bf16.msra.mxu3 %v5607_v57  ;;  %v5615_v36 = vld [vmem:[#allocation71_spill] sm:$0xff]  ;;  %v5616_v9 = vld [vmem:[#allocation76_spill] sm:$0xff]  ;;  %v5617_v57 = vld [vmem:[#allocation77_spill] sm:$0xff] }
 0x4ac   :  { %1701 = vmatpush.bf16.msra.mxu0 %v5608_v63  ;;  %1714 = vmatpush.bf16.msra.mxu1 %v5609_v48  ;;  %v5618_v63 = vld [vmem:[#allocation80_spill] sm:$0xff] }
 0x4ad   :  { %1665 = vmatmul.bf16.vlgmr.msrb.gmra.mxu2 %v1577_v59  ;;  %1678 = vmatmul.bf16.vlgmr.msrb.gmra.mxu3 %v1578_v21  ;;  %v5619_v59 = vld [vmem:[#allocation81_spill] sm:$0xff]  ;;  %v5620_v21 = vld [vmem:[#allocation74_spill] sm:$0xff]  ;;  %v5654_v11 = vld [vmem:[#allocation28_spill] sm:$0xff] }
 0x4af   :  { %1726 = vmatpush.bf16.msra.mxu2 %v5610_v56  ;;  %1739 = vmatpush.bf16.msra.mxu3 %v5611_v52  ;;  %v5621_v56 = vld [vmem:[#allocation75_spill] sm:$0xff]  ;;  %v5622_v52 = vld [vmem:[#allocation84_spill] sm:$0xff] }
 0x4b0   :  { %1702 = vmatpush.bf16.msra.mxu0 %v5612_v25  ;;  %1715 = vmatpush.bf16.msra.mxu1 %v5613_v24  ;;  %v5623_v25 = vld [vmem:[#allocation85_spill] sm:$0xff]  ;;  %v5624_v24 = vld [vmem:[#allocation78_spill] sm:$0xff] }
 0x4b3   :  { %1727 = vmatpush.bf16.msra.mxu2 %v5614_v33  ;;  %1740 = vmatpush.bf16.msra.mxu3 %v5615_v36  ;;  %v5625_v33 = vld [vmem:[#allocation79_spill] sm:$0xff]  ;;  %v5626_v36 = vld [vmem:[#allocation82_spill] sm:$0xff] }
 0x4b4   :  { %1703 = vmatpush.bf16.msra.mxu0 %v5616_v9  ;;  %1716 = vmatpush.bf16.msra.mxu1 %v5617_v57  ;;  %v5627_v9 = vld [vmem:[#allocation83_spill] sm:$0xff]  ;;  %v5628_v57 = vld [vmem:[#allocation88_spill] sm:$0xff] }
 0x4b7   :  { %1728 = vmatpush.bf16.msra.mxu2 %v5620_v21  ;;  %1741 = vmatpush.bf16.msra.mxu3 %v5621_v56  ;;  %v5631_v21 = vld [vmem:[#allocation87_spill] sm:$0xff]  ;;  %v5632_v56 = vld [vmem:[#allocation92_spill] sm:$0xff] }
 0x4b8   :  { %1748 = vmatpush.bf16.msrb.mxu0 %v5618_v63  ;;  %1761 = vmatpush.bf16.msrb.mxu1 %v5619_v59  ;;  %v5629_v63 = vld [vmem:[#allocation89_spill] sm:$0xff]  ;;  %v5630_v59 = vld [vmem:[#allocation86_spill] sm:$0xff] }
 0x4bb   :  { %1729 = vmatpush.bf16.msra.mxu2 %v5624_v24  ;;  %1742 = vmatpush.bf16.msra.mxu3 %v5625_v33  ;;  %v5635_v24 = vld [vmem:[#allocation91_spill] sm:$0xff]  ;;  %v5636_v33 = vld [vmem:[#allocation96_spill] sm:$0xff] }
 0x4bc   :  { %1749 = vmatpush.bf16.msrb.mxu0 %v5622_v52  ;;  %1762 = vmatpush.bf16.msrb.mxu1 %v5623_v25  ;;  %v5633_v52 = vld [vmem:[#allocation93_spill] sm:$0xff]  ;;  %v5634_v25 = vld [vmem:[#allocation90_spill] sm:$0xff] }
 0x4bf   :  { %1774 = vmatpush.bf16.msrb.mxu2 %v5626_v36  ;;  %1787 = vmatpush.bf16.msrb.mxu3 %v5627_v9  ;;  %v5637_v36 = vld [vmem:[#allocation97_spill] sm:$0xff]  ;;  %v5638_v9 = vld [vmem:[#allocation94_spill] sm:$0xff] }
 0x4c0   :  { %1750 = vmatpush.bf16.msrb.mxu0 %v5628_v57  ;;  %1763 = vmatpush.bf16.msrb.mxu1 %v5629_v63  ;;  %v5639_v57 = vld [vmem:[#allocation95_spill] sm:$0xff]  ;;  %v5640_v63 = vld [vmem:[#allocation100_spill] sm:$0xff] }
 0x4c3   :  { %1775 = vmatpush.bf16.msrb.mxu2 %v5630_v59  ;;  %1788 = vmatpush.bf16.msrb.mxu3 %v5631_v21  ;;  %v5641_v59 = vld [vmem:[#allocation101_spill] sm:$0xff]  ;;  %v5642_v21 = vld [vmem:[#allocation98_spill] sm:$0xff] }
 0x4c4   :  { %1751 = vmatpush.bf16.msrb.mxu0 %v5632_v56  ;;  %1764 = vmatpush.bf16.msrb.mxu1 %v5633_v52  ;;  %v5643_v56 = vld [vmem:[#allocation99_spill] sm:$0xff]  ;;  %v5644_v52 = vld [vmem:[#allocation104_spill] sm:$0xff] }
 0x4c7   :  { %1776 = vmatpush.bf16.msrb.mxu2 %v5634_v25  ;;  %1789 = vmatpush.bf16.msrb.mxu3 %v5635_v24  ;;  %v5645_v25 = vld [vmem:[#allocation105_spill] sm:$0xff]  ;;  %v5646_v24 = vld [vmem:[#allocation102_spill] sm:$0xff] }
 0x4c8   :  { %1752 = vmatpush.bf16.msrb.mxu0 %v5636_v33  ;;  %1765 = vmatpush.bf16.msrb.mxu1 %v5637_v36  ;;  %v5647_v33 = vld [vmem:[#allocation103_spill] sm:$0xff]  ;;  %v5648_v36 = vld [vmem:[#allocation108_spill] sm:$0xff] }
 0x4cb   :  { %1777 = vmatpush.bf16.msrb.mxu2 %v5638_v9  ;;  %1790 = vmatpush.bf16.msrb.mxu3 %v5639_v57  ;;  %v5649_v9 = vld [vmem:[#allocation109_spill] sm:$0xff]  ;;  %v5650_v57 = vld [vmem:[#allocation106_spill] sm:$0xff] }
 0x4cc   :  { %1753 = vmatpush.bf16.msrb.mxu0 %v5640_v63  ;;  %1766 = vmatpush.bf16.msrb.mxu1 %v5641_v59  ;;  %v5651_v63 = vld [vmem:[#allocation107_spill] sm:$0xff]  ;;  %v5652_v59 = vld [vmem:[#allocation110_spill] sm:$0xff] }
 0x4cf   :  { %1778 = vmatpush.bf16.msrb.mxu2 %v5642_v21  ;;  %1791 = vmatpush.bf16.msrb.mxu3 %v5643_v56  ;;  %v5653_v21 = vld [vmem:[#allocation111_spill] sm:$0xff] }
 0x4d0   :  { %1754 = vmatpush.bf16.msrb.mxu0 %v5644_v52  ;;  %1767 = vmatpush.bf16.msrb.mxu1 %v5645_v25 }
 0x4d3   :  { %1779 = vmatpush.bf16.msrb.mxu2 %v5646_v24  ;;  %1792 = vmatpush.bf16.msrb.mxu3 %v5647_v33 }
 0x4d4   :  { %1755 = vmatpush.bf16.msrb.mxu0 %v5648_v36  ;;  %1768 = vmatpush.bf16.msrb.mxu1 %v5649_v9 }
 0x4d7   :  { %1780 = vmatpush.bf16.msrb.mxu2 %v5650_v57  ;;  %1793 = vmatpush.bf16.msrb.mxu3 %v5651_v63 }
 0x4db   :  { %1781 = vmatpush.bf16.msrb.mxu2 %v5652_v59  ;;  %1794 = vmatpush.bf16.msrb.mxu3 %v5653_v21 }
 0x513   :  { %v1588_v56 = vpop.f32.mrf.mxu0  ;;  %v1601_v52 = vpop.f32.mrf.mxu1 }
 0x514   :  { %v1589_v24 = vadd.f32 %v5654_v11, %v1588_v56 }
 0x516   :  { %v1602_v27 = vadd.f32 %v1601_v52, %v1589_v24 }
 0x51b   :  { %v1590_v48 = vpop.f32.mrf.mxu0  ;;  %v1603_v25 = vpop.f32.mrf.mxu1 }
 0x520   :  { %v1614_v28 = vpop.f32.mrf.mxu2  ;;  %v1627_v33 = vpop.f32.mrf.mxu3 }
 0x521   :  { %v1615_v36 = vadd.f32 %v1614_v28, %v1602_v27 }
 0x523   :  { %v1640_v2 = vpop.f32.mrf.mxu0  ;;  %v1653_v9 = vpop.f32.mrf.mxu1  ;;  %v1628_v49 = vadd.f32 %v1627_v33, %v1615_v36  ;;  %v5657_v33 = vld [vmem:[#allocation31_spill] sm:$0xff]  ;;  %v5658_v36 = vld [vmem:[#allocation32_spill] sm:$0xff] }
 0x525   :  { %v1641_v63 = vadd.f32 %v1640_v2, %v1628_v49 }
 0x527   :  { %v1654_v17 = vadd.f32 %v1653_v9, %v1641_v63  ;;  %v5656_v63 = vld [vmem:[#allocation30_spill] sm:$0xff]  ;;  %v5659_v9 = vld [vmem:[#allocation33_spill] sm:$0xff] }
 0x528   :  { %v1616_v57 = vpop.f32.mrf.mxu2  ;;  %v1629_v41 = vpop.f32.mrf.mxu3 }
 0x52b   :  { %v1642_v55 = vpop.f32.mrf.mxu0  ;;  %v1655_v59 = vpop.f32.mrf.mxu1 }
 0x52c   :  { %v5660_v59 = vld [vmem:[#allocation34_spill] sm:$0xff] }
 0x530   :  { %v1666_v21 = vpop.f32.mrf.mxu2  ;;  %v1679_v16 = vpop.f32.mrf.mxu3 }
 0x531   :  { %v1667_v3 = vadd.f32 %v1666_v21, %v1654_v17  ;;  %v5661_v21 = vld [vmem:[#allocation35_spill] sm:$0xff] }
 0x533   :  { %v1680_v48 = vadd.f32 %v1679_v16, %v1667_v3  ;;  %v5655_v3 = vld [vmem:[#allocation29_spill] sm:$0xff] }
 0x535   :  { %v1683_v56 = vsel %vm277_vm0, %v1680_v48, -1e+30  ;;  %v5662_v48 = vld [vmem:[#allocation36_spill] sm:$0xff] }
 0x536   :  { %1684 = vmax.xlane.f32.xlu2 %v1683_v56 }
 0x538   :  { %v1668_v25 = vpop.f32.mrf.mxu2  ;;  %v1681_v52 = vpop.f32.mrf.mxu3 }
 0x539   :  { %v5664_v25 = vld [vmem:[#allocation38_spill] sm:$0xff]  ;;  %v5665_v52 = vld [vmem:[#allocation39_spill] sm:$0xff] }
 0x5a9   :  { %v1685_v27 = vpop.xlane.xlu2 %1684 }
 0x5aa   :  { %v1686_v28 = vsub.f32 %v1683_v56, %v1685_v27  ;;  %v5663_v56 = vld [vmem:[#allocation37_spill] sm:$0xff]  ;;  %v5666_v27 = vld [vmem:[#allocation40_spill] sm:$0xff] }
 0x5ac   :  { %v1687_v24 = vmul.f32 1.442695, %v1686_v28  ;;  %v5667_v28 = vld [vmem:[#allocation41_spill] sm:$0xff] }
 0x5ae   :  { %3220 = vpow2.f32 %v1687_v24  ;;  %v5668_v24 = vld [vmem:[#allocation42_spill] sm:$0xff] }
 0x5b4   :  { %v3221_v57 = vpop.eup %3220 }
 0x5b5   :  { %v1689_v55 = vsel %vm277_vm0, %v3221_v57, 0.0  ;;  %v5669_v57 = vld [vmem:[#allocation45_spill] sm:$0xff] }
 0x5b6   :  { %1690 = vadd.xlane.f32.xlu0 %v1689_v55 }
 0x629   :  { %v1691_v41 = vpop.xlane.xlu0 %1690 }
 0x62a   :  { %3222 = vrcp.f32 %v1691_v41  ;;  %v5671_v41 = vld [vmem:[#allocation19_spill] sm:$0xff] }
 0x630   :  { %v3223_v49 = vpop.eup %3222 }
 0x631   :  { %v1693_v17 = vmul.f32 %v3223_v49, %v1689_v55  ;;  %v5670_v55 = vld [vmem:[#allocation17_spill] sm:$0xff]  ;;  %v5672_v49 = vld [vmem:[#allocation16_spill] sm:$0xff] }
 0x633   :  { %v1694_v16 = vsub.f32 %v1693_v17, %v4015_v37  ;;  %v5673_v17 = vld [vmem:[#allocation18_spill] sm:$0xff] }
 0x635   :  { %v1695_v2 = vpack.c.bf16 %v1694_v16, %v1694_v16  ;;  %v5674_v16 = vld [vmem:[#allocation48_spill] sm:$0xff] }
 0x637   :  { %1704 = vmatmul.bf16.vlgmr.msra.gmra.mxu0 %v1695_v2  ;;  %1717 = vmatmul.bf16.vlgmr.msra.gmra.mxu1 %v1695_v2 }
 0x638   :  { %1730 = vmatmul.bf16.vlgmr.msra.gmra.mxu2 %v1695_v2  ;;  %1743 = vmatmul.bf16.vlgmr.msra.gmra.mxu3 %v1695_v2 }
 0x639   :  { %1848 = vmatpush.bf16.msra.mxu0 %v4268_v60  ;;  %1861 = vmatpush.bf16.msra.mxu1 %v4271_v18 }
 0x63a   :  { %1874 = vmatpush.bf16.msra.mxu2 %v4274_v47  ;;  %1887 = vmatpush.bf16.msra.mxu3 %v4277_v61 }
 0x63d   :  { %1849 = vmatpush.bf16.msra.mxu0 %v4280_v4  ;;  %1862 = vmatpush.bf16.msra.mxu1 %v4283_v5 }
 0x63e   :  { %1875 = vmatpush.bf16.msra.mxu2 %v4286_v10  ;;  %1888 = vmatpush.bf16.msra.mxu3 %v4289_v51 }
 0x641   :  { %1850 = vmatpush.bf16.msra.mxu0 %v5655_v3  ;;  %1863 = vmatpush.bf16.msra.mxu1 %v5656_v63 }
 0x642   :  { %1876 = vmatpush.bf16.msra.mxu2 %v5657_v33  ;;  %1889 = vmatpush.bf16.msra.mxu3 %v5658_v36 }
 0x645   :  { %1851 = vmatpush.bf16.msra.mxu0 %v5659_v9  ;;  %1864 = vmatpush.bf16.msra.mxu1 %v5660_v59 }
 0x646   :  { %1877 = vmatpush.bf16.msra.mxu2 %v5661_v21  ;;  %1890 = vmatpush.bf16.msra.mxu3 %v5662_v48 }
 0x647   :  { %1756 = vmatmul.bf16.vlgmr.msrb.gmra.mxu0 %v1695_v2  ;;  %1769 = vmatmul.bf16.vlgmr.msrb.gmra.mxu1 %v1695_v2 }
 0x648   :  { %1782 = vmatmul.bf16.vlgmr.msrb.gmra.mxu2 %v1695_v2  ;;  %1795 = vmatmul.bf16.vlgmr.msrb.gmra.mxu3 %v1695_v2  ;;  %v5675_v2 = vld [vmem:[#allocation49_spill] sm:$0xff] }
 0x649   :  { %1852 = vmatpush.bf16.msra.mxu0 %v5663_v56  ;;  %1865 = vmatpush.bf16.msra.mxu1 %v5664_v25 }
 0x64a   :  { %1878 = vmatpush.bf16.msra.mxu2 %v5665_v52  ;;  %1891 = vmatpush.bf16.msra.mxu3 %v5666_v27  ;;  %v5676_v52 = vld [vmem:[#allocation43_spill] sm:$0xff]  ;;  %v5677_v27 = vld [vmem:[#allocation44_spill] sm:$0xff] }
 0x64d   :  { %1853 = vmatpush.bf16.msra.mxu0 %v5667_v28  ;;  %1866 = vmatpush.bf16.msra.mxu1 %v5668_v24  ;;  %v5678_v28 = vld [vmem:[#allocation52_spill] sm:$0xff]  ;;  %v5679_v24 = vld [vmem:[#allocation53_spill] sm:$0xff] }
 0x64e   :  { %1879 = vmatpush.bf16.msra.mxu2 %v5669_v57  ;;  %1892 = vmatpush.bf16.msra.mxu3 %v5670_v55  ;;  %v5680_v57 = vld [vmem:[#allocation50_spill] sm:$0xff]  ;;  %v5681_v55 = vld [vmem:[#allocation51_spill] sm:$0xff] }
 0x651   :  { %1854 = vmatpush.bf16.msra.mxu0 %v5671_v41  ;;  %1867 = vmatpush.bf16.msra.mxu1 %v5672_v49  ;;  %v5682_v41 = vld [vmem:[#allocation46_spill] sm:$0xff]  ;;  %v5683_v49 = vld [vmem:[#allocation47_spill] sm:$0xff] }
 0x652   :  { %1880 = vmatpush.bf16.msra.mxu2 %v5673_v17  ;;  %1893 = vmatpush.bf16.msra.mxu3 %v5674_v16  ;;  %v5684_v17 = vld [vmem:[#allocation56_spill] sm:$0xff]  ;;  %v5685_v16 = vld [vmem:[#allocation57_spill] sm:$0xff] }
 0x655   :  { %1855 = vmatpush.bf16.msra.mxu0 %v5675_v2  ;;  %1868 = vmatpush.bf16.msra.mxu1 %v5676_v52  ;;  %v5686_v2 = vld [vmem:[#allocation112_spill] sm:$0xff]  ;;  %v5687_v52 = vld [vmem:[#allocation113_spill] sm:$0xff] }
 0x656   :  { %1881 = vmatpush.bf16.msra.mxu2 %v5679_v24  ;;  %1894 = vmatpush.bf16.msra.mxu3 %v5680_v57  ;;  %v5690_v24 = vld [vmem:[#allocation116_spill] sm:$0xff]  ;;  %v5691_v57 = vld [vmem:[#allocation117_spill] sm:$0xff] }
 0x659   :  { %1900 = vmatpush.bf16.msrb.mxu0 %v5677_v27  ;;  %1913 = vmatpush.bf16.msrb.mxu1 %v5678_v28  ;;  %v5688_v27 = vld [vmem:[#allocation114_spill] sm:$0xff]  ;;  %v5689_v28 = vld [vmem:[#allocation115_spill] sm:$0xff] }
 0x65a   :  { %1926 = vmatpush.bf16.msrb.mxu2 %v5681_v55  ;;  %1939 = vmatpush.bf16.msrb.mxu3 %v5682_v41  ;;  %v5692_v55 = vld [vmem:[#allocation118_spill] sm:$0xff]  ;;  %v5693_v41 = vld [vmem:[#allocation119_spill] sm:$0xff] }
 0x65d   :  { %1901 = vmatpush.bf16.msrb.mxu0 %v5683_v49  ;;  %1914 = vmatpush.bf16.msrb.mxu1 %v5684_v17  ;;  %v5694_v49 = vld [vmem:[#allocation120_spill] sm:$0xff]  ;;  %v5695_v17 = vld [vmem:[#allocation121_spill] sm:$0xff] }
 0x65e   :  { %1927 = vmatpush.bf16.msrb.mxu2 %v5685_v16  ;;  %1940 = vmatpush.bf16.msrb.mxu3 %v5686_v2  ;;  %v5696_v16 = vld [vmem:[#allocation122_spill] sm:$0xff]  ;;  %v5697_v2 = vld [vmem:[#allocation123_spill] sm:$0xff] }
 0x661   :  { %1902 = vmatpush.bf16.msrb.mxu0 %v5687_v52  ;;  %1915 = vmatpush.bf16.msrb.mxu1 %v5688_v27  ;;  %v5698_v52 = vld [vmem:[#allocation124_spill] sm:$0xff]  ;;  %v5699_v27 = vld [vmem:[#allocation125_spill] sm:$0xff] }
 0x662   :  { %1928 = vmatpush.bf16.msrb.mxu2 %v5689_v28  ;;  %1941 = vmatpush.bf16.msrb.mxu3 %v5690_v24  ;;  %v5700_v28 = vld [vmem:[#allocation126_spill] sm:$0xff]  ;;  %v5701_v24 = vld [vmem:[#allocation127_spill] sm:$0xff] }
 0x665   :  { %1903 = vmatpush.bf16.msrb.mxu0 %v5691_v57  ;;  %1916 = vmatpush.bf16.msrb.mxu1 %v5692_v55  ;;  %v5702_v57 = vld [vmem:[#allocation128_spill] sm:$0xff]  ;;  %v5703_v55 = vld [vmem:[#allocation129_spill] sm:$0xff] }
 0x666   :  { %1929 = vmatpush.bf16.msrb.mxu2 %v5693_v41  ;;  %1942 = vmatpush.bf16.msrb.mxu3 %v5694_v49  ;;  %v5704_v41 = vld [vmem:[#allocation130_spill] sm:$0xff]  ;;  %v5705_v49 = vld [vmem:[#allocation131_spill] sm:$0xff] }
 0x669   :  { %1904 = vmatpush.bf16.msrb.mxu0 %v5695_v17  ;;  %1917 = vmatpush.bf16.msrb.mxu1 %v5696_v16  ;;  %v5706_v17 = vld [vmem:[#allocation132_spill] sm:$0xff]  ;;  %v5707_v16 = vld [vmem:[#allocation133_spill] sm:$0xff] }
 0x66a   :  { %1930 = vmatpush.bf16.msrb.mxu2 %v5697_v2  ;;  %1943 = vmatpush.bf16.msrb.mxu3 %v5698_v52  ;;  %v5708_v2 = vld [vmem:[#allocation134_spill] sm:$0xff]  ;;  %v5709_v52 = vld [vmem:[#allocation135_spill] sm:$0xff] }
 0x66d   :  { %1905 = vmatpush.bf16.msrb.mxu0 %v5699_v27  ;;  %1918 = vmatpush.bf16.msrb.mxu1 %v5700_v28  ;;  %v5710_v27 = vld [vmem:[#allocation136_spill] sm:$0xff] }
 0x66e   :  { %1931 = vmatpush.bf16.msrb.mxu2 %v5701_v24  ;;  %1944 = vmatpush.bf16.msrb.mxu3 %v5702_v57 }
 0x671   :  { %1906 = vmatpush.bf16.msrb.mxu0 %v5703_v55  ;;  %1919 = vmatpush.bf16.msrb.mxu1 %v5704_v41 }
 0x672   :  { %1932 = vmatpush.bf16.msrb.mxu2 %v5705_v49  ;;  %1945 = vmatpush.bf16.msrb.mxu3 %v5706_v17 }
 0x675   :  { %1907 = vmatpush.bf16.msrb.mxu0 %v5707_v16  ;;  %1920 = vmatpush.bf16.msrb.mxu1 %v5708_v2 }
 0x676   :  { %1933 = vmatpush.bf16.msrb.mxu2 %v5709_v52  ;;  %1946 = vmatpush.bf16.msrb.mxu3 %v5710_v27 }
 0x6b4   :  { %v1705_v28 = vpop.f32.mrf.mxu0  ;;  %v1718_v24 = vpop.f32.mrf.mxu1 }
 0x6b5   :  { %vm1800_vm7 = vcmp.ge.f32.partialorder %v1705_v28, 0.0  ;;  %vm1801_vm8 = vcmp.ge.f32.partialorder %v1718_v24, 0.0 }
 0x6b6   :  { %v1808_v55 = vsel %vm1800_vm7, 0.007843138, %v5605_v29  ;;  %v1809_v41 = vsel %vm1801_vm8, 0.007843138, %v5605_v29 }
 0x6b7   :  { %v1816_v49 = vadd.f32 %v1808_v55, %v4467_v43  ;;  %v1817_v17 = vadd.f32 %v1809_v41, %v4470_v23 }
 0x6b9   :  { %v1824_v16 = vmax.f32 %v1816_v49, %v4087_v32  ;;  %v1825_v2 = vmax.f32 %v1817_v17, %v4089_v35 }
 0x6bb   :  { %v4665_v52 = vmin.f32 %v1824_v16, %v4093_v45  ;;  %v4668_v27 = vmin.f32 %v1825_v2, %v4095_v46  ;;  %v1731_v28 = vpop.f32.mrf.mxu2  ;;  %v1744_v24 = vpop.f32.mrf.mxu3 }
 0x6bc   :  { %vm1802_vm9 = vcmp.ge.f32.partialorder %v1731_v28, 0.0  ;;  %vm1803_vm10 = vcmp.ge.f32.partialorder %v1744_v24, 0.0  ;;  %v1707_v57 = vpop.f32.mrf.mxu0  ;;  %v1720_v25 = vpop.f32.mrf.mxu1 }
 0x6bd   :  { %v1840_v43 = vpack.c.bf16 %v4665_v52, %v4665_v52  ;;  %v1841_v23 = vpack.c.bf16 %v4668_v27, %v4668_v27  ;;  %v1810_v55 = vsel %vm1802_vm9, 0.007843138, %v5605_v29  ;;  %v1811_v41 = vsel %vm1803_vm10, 0.007843138, %v5605_v29 }
 0x6be   :  { %v1818_v49 = vadd.f32 %v1810_v55, %v4485_v38  ;;  %v1819_v17 = vadd.f32 %v1811_v41, %v4488_v19 }
 0x6bf   :  { %1856 = vmatmul.bf16.vlgmr.msra.gmra.mxu0 %v1840_v43  ;;  %1869 = vmatmul.bf16.vlgmr.msra.gmra.mxu1 %v1841_v23 }
 0x6c0   :  { %v1826_v16 = vmax.f32 %v1818_v49, %v4111_v58  ;;  %v1827_v25 = vmax.f32 %v1819_v17, %v4113_v62  ;;  %1965 = vmatpush.bf16.msra.mxu0 %v5479_v14  ;;  %1978 = vmatpush.bf16.msra.mxu1 %v5480_v15 }
 0x6c2   :  { %v4683_v57 = vmin.f32 %v1826_v16, %v4121_v6  ;;  %v4686_v2 = vmin.f32 %v1827_v25, %v4123_v7 }
 0x6c3   :  { %v1733_v28 = vpop.f32.mrf.mxu2  ;;  %v1746_v38 = vpop.f32.mrf.mxu3 }
 0x6c4   :  { %v1842_v19 = vpack.c.bf16 %v4683_v57, %v4683_v57  ;;  %v1843_v24 = vpack.c.bf16 %v4686_v2, %v4686_v2  ;;  %v1757_v43 = vpop.f32.mrf.mxu0  ;;  %v1770_v23 = vpop.f32.mrf.mxu1  ;;  %1966 = vmatpush.bf16.msra.mxu0 %v5483_v30  ;;  %1979 = vmatpush.bf16.msra.mxu1 %v5484_v31 }
 0x6c5   :  { %vm1804_vm11 = vcmp.ge.f32.partialorder %v1757_v43, 0.0  ;;  %vm1805_vm12 = vcmp.ge.f32.partialorder %v1770_v23, 0.0 }
 0x6c6   :  { %v1812_v55 = vsel %vm1804_vm11, 0.007843138, %v5605_v29  ;;  %v1813_v41 = vsel %vm1805_vm12, 0.007843138, %v5605_v29  ;;  %1882 = vmatmul.bf16.vlgmr.msra.gmra.mxu2 %v1842_v19  ;;  %1895 = vmatmul.bf16.vlgmr.msra.gmra.mxu3 %v1843_v24 }
 0x6c7   :  { %v1820_v49 = vadd.f32 %v1812_v55, %v4507_v26  ;;  %v1821_v17 = vadd.f32 %v1813_v41, %v4510_v20  ;;  %1991 = vmatpush.bf16.msra.mxu2 %v5489_v50  ;;  %2004 = vmatpush.bf16.msra.mxu3 %v5490_v42 }
 0x6c8   :  { %1967 = vmatpush.bf16.msra.mxu0 %v5493_v0  ;;  %1980 = vmatpush.bf16.msra.mxu1 %v5494_v1 }
 0x6c9   :  { %v1828_v16 = vmax.f32 %v1820_v49, %v4145_v39  ;;  %v1829_v25 = vmax.f32 %v1821_v17, %v4147_v44  ;;  %v5711_v17 = vld [vmem:[#allocation137_spill] sm:$0xff] }
 0x6cb   :  { %v4705_v28 = vmin.f32 %v1828_v16, %v4151_v53  ;;  %v4708_v38 = vmin.f32 %v1829_v25, %v4153_v34  ;;  %v1783_v26 = vpop.f32.mrf.mxu2  ;;  %v1796_v20 = vpop.f32.mrf.mxu3  ;;  %1992 = vmatpush.bf16.msra.mxu2 %v5495_v12  ;;  %2005 = vmatpush.bf16.msra.mxu3 %v5496_v13  ;;  %v5712_v25 = vld [vmem:[#allocation24_spill] sm:$0xff]  ;;  %v5717_v13 = vld [vmem:[#allocation65_spill] sm:$0xff]  ;;  %v5718_v12 = vld [vmem:[#allocation26_spill] sm:$0xff] }
 0x6cc   :  { %vm1806_vm13 = vcmp.ge.f32.partialorder %v1783_v26, 0.0  ;;  %vm1807_vm14 = vcmp.ge.f32.partialorder %v1796_v20, 0.0  ;;  %v1759_v19 = vpop.f32.mrf.mxu0  ;;  %v1772_v24 = vpop.f32.mrf.mxu1  ;;  %1968 = vmatpush.bf16.msra.mxu0 %v5499_v22  ;;  %1981 = vmatpush.bf16.msra.mxu1 %v3852_v40  ;;  %v5713_v20 = vld [vmem:[#allocation25_spill] sm:$0xff]  ;;  %v5715_v40 = vld [vmem:[#allocation59_spill] sm:$0xff]  ;;  %v5716_v22 = vld [vmem:[#allocation64_spill] sm:$0xff] }
 0x6cd   :  { %v1844_v43 = vpack.c.bf16 %v4705_v28, %v4705_v28  ;;  %v1845_v23 = vpack.c.bf16 %v4708_v38, %v4708_v38  ;;  %v1814_v55 = vsel %vm1806_vm13, 0.007843138, %v5605_v29  ;;  %v1815_v41 = vsel %vm1807_vm14, 0.007843138, %v5605_v29  ;;  %v5714_v24 = vld [vmem:[#allocation58_spill] sm:$0xff] }
 0x6ce   :  { %v1822_v49 = vadd.f32 %v1814_v55, %v4531_v8  ;;  %v1823_v16 = vadd.f32 %v1815_v41, %v5711_v17  ;;  %v5720_v8 = vld [vmem:[#allocation27_spill] sm:$0xff]  ;;  %v5722_v17 = vld [vmem:[#allocation62_spill] sm:$0xff] }
 0x6cf   :  { %1908 = vmatmul.bf16.vlgmr.msrb.gmra.mxu0 %v1844_v43  ;;  %1921 = vmatmul.bf16.vlgmr.msrb.gmra.mxu1 %v1845_v23 }
 0x6d0   :  { %v1830_v26 = vmax.f32 %v1822_v49, %v5712_v25  ;;  %v1831_v19 = vmax.f32 %v1823_v16, %v5713_v20  ;;  %1993 = vmatpush.bf16.msra.mxu2 %v5714_v24  ;;  %2006 = vmatpush.bf16.msra.mxu3 %v5715_v40  ;;  %v5723_v16 = vld [vmem:[#allocation63_spill] sm:$0xff] }
 0x6d1   :  { %1969 = vmatpush.bf16.msra.mxu0 %v5716_v22  ;;  %1982 = vmatpush.bf16.msra.mxu1 %v5717_v13  ;;  %v5724_v22 = vld [vmem:[#allocation68_spill] sm:$0xff]  ;;  %v5725_v13 = vld [vmem:[#allocation69_spill] sm:$0xff] }
 0x6d2   :  { %v4729_v34 = vmin.f32 %v1830_v26, %v5718_v12  ;;  %v4732_v55 = vmin.f32 %v1831_v19, %v5720_v8  ;;  %v5726_v26 = vld [vmem:[#allocation66_spill] sm:$0xff]  ;;  %v5727_v19 = vld [vmem:[#allocation67_spill] sm:$0xff] }
 0x6d3   :  { %v1785_v43 = vpop.f32.mrf.mxu2  ;;  %v1798_v23 = vpop.f32.mrf.mxu3  ;;  %v5730_v8 = vld [vmem:[#allocation70_spill] sm:$0xff]  ;;  %v5731_v12 = vld [vmem:[#allocation71_spill] sm:$0xff] }
 0x6d4   :  { %5719 = vst [vmem:[#allocation28_spill] sm:$0xff] %v4729_v34  ;;  %v1846_v41 = vpack.c.bf16 %v4729_v34, %v4729_v34  ;;  %v1847_v49 = vpack.c.bf16 %v4732_v55, %v4732_v55  ;;  %1994 = vmatpush.bf16.msra.mxu2 %v5722_v17  ;;  %2007 = vmatpush.bf16.msra.mxu3 %v5723_v16  ;;  %v5728_v43 = vld [vmem:[#allocation72_spill] sm:$0xff]  ;;  %v5729_v23 = vld [vmem:[#allocation73_spill] sm:$0xff] }
 0x6d5   :  { %5721 = vst [vmem:[#allocation29_spill] sm:$0xff] %v4732_v55  ;;  %1970 = vmatpush.bf16.msra.mxu0 %v5724_v22  ;;  %1983 = vmatpush.bf16.msra.mxu1 %v5725_v13  ;;  %v5732_v17 = vld [vmem:[#allocation76_spill] sm:$0xff]  ;;  %v5733_v16 = vld [vmem:[#allocation77_spill] sm:$0xff] }
 0x6d6   :  { %1934 = vmatmul.bf16.vlgmr.msrb.gmra.mxu2 %v1846_v41  ;;  %1947 = vmatmul.bf16.vlgmr.msrb.gmra.mxu3 %v1847_v49  ;;  %v5734_v22 = vld [vmem:[#allocation80_spill] sm:$0xff]  ;;  %v5735_v41 = vld [vmem:[#allocation81_spill] sm:$0xff]  ;;  %v5736_v49 = vld [vmem:[#allocation74_spill] sm:$0xff] }
 0x6d8   :  { %1995 = vmatpush.bf16.msra.mxu2 %v5726_v26  ;;  %2008 = vmatpush.bf16.msra.mxu3 %v5727_v19  ;;  %v5737_v26 = vld [vmem:[#allocation75_spill] sm:$0xff]  ;;  %v5738_v19 = vld [vmem:[#allocation84_spill] sm:$0xff] }
 0x6d9   :  { %1971 = vmatpush.bf16.msra.mxu0 %v5728_v43  ;;  %1984 = vmatpush.bf16.msra.mxu1 %v5729_v23  ;;  %v5739_v43 = vld [vmem:[#allocation85_spill] sm:$0xff]  ;;  %v5740_v23 = vld [vmem:[#allocation78_spill] sm:$0xff] }
 0x6dc   :  { %1996 = vmatpush.bf16.msra.mxu2 %v5730_v8  ;;  %2009 = vmatpush.bf16.msra.mxu3 %v5731_v12  ;;  %v5741_v8 = vld [vmem:[#allocation79_spill] sm:$0xff]  ;;  %v5742_v12 = vld [vmem:[#allocation82_spill] sm:$0xff] }
 0x6dd   :  { %1972 = vmatpush.bf16.msra.mxu0 %v5732_v17  ;;  %1985 = vmatpush.bf16.msra.mxu1 %v5733_v16  ;;  %v5743_v17 = vld [vmem:[#allocation83_spill] sm:$0xff]  ;;  %v5744_v16 = vld [vmem:[#allocation88_spill] sm:$0xff] }
 0x6e0   :  { %1997 = vmatpush.bf16.msra.mxu2 %v5736_v49  ;;  %2010 = vmatpush.bf16.msra.mxu3 %v5737_v26  ;;  %v5747_v49 = vld [vmem:[#allocation87_spill] sm:$0xff]  ;;  %v5748_v26 = vld [vmem:[#allocation92_spill] sm:$0xff] }
 0x6e1   :  { %2017 = vmatpush.bf16.msrb.mxu0 %v5734_v22  ;;  %2030 = vmatpush.bf16.msrb.mxu1 %v5735_v41  ;;  %v5745_v22 = vld [vmem:[#allocation89_spill] sm:$0xff]  ;;  %v5746_v41 = vld [vmem:[#allocation86_spill] sm:$0xff] }
 0x6e4   :  { %1998 = vmatpush.bf16.msra.mxu2 %v5740_v23  ;;  %2011 = vmatpush.bf16.msra.mxu3 %v5741_v8  ;;  %v5751_v23 = vld [vmem:[#allocation91_spill] sm:$0xff]  ;;  %v5752_v8 = vld [vmem:[#allocation96_spill] sm:$0xff] }
 0x6e5   :  { %2018 = vmatpush.bf16.msrb.mxu0 %v5738_v19  ;;  %2031 = vmatpush.bf16.msrb.mxu1 %v5739_v43  ;;  %v5749_v19 = vld [vmem:[#allocation93_spill] sm:$0xff]  ;;  %v5750_v43 = vld [vmem:[#allocation90_spill] sm:$0xff] }
 0x6e8   :  { %2043 = vmatpush.bf16.msrb.mxu2 %v5742_v12  ;;  %2056 = vmatpush.bf16.msrb.mxu3 %v5743_v17  ;;  %v5753_v12 = vld [vmem:[#allocation97_spill] sm:$0xff]  ;;  %v5754_v17 = vld [vmem:[#allocation94_spill] sm:$0xff] }
 0x6e9   :  { %2019 = vmatpush.bf16.msrb.mxu0 %v5744_v16  ;;  %2032 = vmatpush.bf16.msrb.mxu1 %v5745_v22  ;;  %v5755_v16 = vld [vmem:[#allocation95_spill] sm:$0xff]  ;;  %v5756_v22 = vld [vmem:[#allocation100_spill] sm:$0xff] }
 0x6ec   :  { %2044 = vmatpush.bf16.msrb.mxu2 %v5746_v41  ;;  %2057 = vmatpush.bf16.msrb.mxu3 %v5747_v49  ;;  %v5757_v41 = vld [vmem:[#allocation101_spill] sm:$0xff]  ;;  %v5758_v49 = vld [vmem:[#allocation98_spill] sm:$0xff] }
 0x6ed   :  { %2020 = vmatpush.bf16.msrb.mxu0 %v5748_v26  ;;  %2033 = vmatpush.bf16.msrb.mxu1 %v5749_v19  ;;  %v5759_v26 = vld [vmem:[#allocation99_spill] sm:$0xff]  ;;  %v5760_v19 = vld [vmem:[#allocation104_spill] sm:$0xff] }
 0x6f0   :  { %2045 = vmatpush.bf16.msrb.mxu2 %v5750_v43  ;;  %2058 = vmatpush.bf16.msrb.mxu3 %v5751_v23  ;;  %v5761_v43 = vld [vmem:[#allocation105_spill] sm:$0xff]  ;;  %v5762_v23 = vld [vmem:[#allocation102_spill] sm:$0xff] }
 0x6f1   :  { %2021 = vmatpush.bf16.msrb.mxu0 %v5752_v8  ;;  %2034 = vmatpush.bf16.msrb.mxu1 %v5753_v12  ;;  %v5763_v8 = vld [vmem:[#allocation103_spill] sm:$0xff]  ;;  %v5764_v12 = vld [vmem:[#allocation108_spill] sm:$0xff] }
 0x6f4   :  { %2046 = vmatpush.bf16.msrb.mxu2 %v5754_v17  ;;  %2059 = vmatpush.bf16.msrb.mxu3 %v5755_v16  ;;  %v5765_v17 = vld [vmem:[#allocation109_spill] sm:$0xff]  ;;  %v5766_v16 = vld [vmem:[#allocation106_spill] sm:$0xff] }
 0x6f5   :  { %2022 = vmatpush.bf16.msrb.mxu0 %v5756_v22  ;;  %2035 = vmatpush.bf16.msrb.mxu1 %v5757_v41  ;;  %v5767_v22 = vld [vmem:[#allocation107_spill] sm:$0xff]  ;;  %v5768_v41 = vld [vmem:[#allocation110_spill] sm:$0xff] }
 0x6f8   :  { %2047 = vmatpush.bf16.msrb.mxu2 %v5758_v49  ;;  %2060 = vmatpush.bf16.msrb.mxu3 %v5759_v26  ;;  %v5769_v49 = vld [vmem:[#allocation111_spill] sm:$0xff] }
 0x6f9   :  { %2023 = vmatpush.bf16.msrb.mxu0 %v5760_v19  ;;  %2036 = vmatpush.bf16.msrb.mxu1 %v5761_v43 }
 0x6fc   :  { %2048 = vmatpush.bf16.msrb.mxu2 %v5762_v23  ;;  %2061 = vmatpush.bf16.msrb.mxu3 %v5763_v8 }
 0x6fd   :  { %2024 = vmatpush.bf16.msrb.mxu0 %v5764_v12  ;;  %2037 = vmatpush.bf16.msrb.mxu1 %v5765_v17 }
 0x700   :  { %2049 = vmatpush.bf16.msrb.mxu2 %v5766_v16  ;;  %2062 = vmatpush.bf16.msrb.mxu3 %v5767_v22 }
 0x704   :  { %2050 = vmatpush.bf16.msrb.mxu2 %v5768_v41  ;;  %2063 = vmatpush.bf16.msrb.mxu3 %v5769_v49 }
 0x73c   :  { %v1857_v26 = vpop.f32.mrf.mxu0  ;;  %v1870_v19 = vpop.f32.mrf.mxu1 }
 0x73d   :  { %v1858_v23 = vadd.f32 %v5654_v11, %v1857_v26 }
 0x73f   :  { %v1871_v24 = vadd.f32 %v1870_v19, %v1858_v23  ;;  %v5792_v23 = vld [vmem:[#allocation112_spill] sm:$0xff] }
 0x744   :  { %v1859_v13 = vpop.f32.mrf.mxu0  ;;  %v1872_v43 = vpop.f32.mrf.mxu1 }
 0x749   :  { %v1883_v40 = vpop.f32.mrf.mxu2  ;;  %v1896_v8 = vpop.f32.mrf.mxu3 }
 0x74a   :  { %v1884_v12 = vadd.f32 %v1883_v40, %v1871_v24 }
 0x74c   :  { %v1909_v20 = vpop.f32.mrf.mxu0  ;;  %v1922_v17 = vpop.f32.mrf.mxu1  ;;  %v1897_v25 = vadd.f32 %v1896_v8, %v1884_v12  ;;  %v5788_v8 = vld [vmem:[#allocation46_spill] sm:$0xff] }
 0x74e   :  { %v1910_v22 = vadd.f32 %v1909_v20, %v1897_v25  ;;  %v5787_v20 = vld [vmem:[#allocation51_spill] sm:$0xff] }
 0x750   :  { %v1923_v53 = vadd.f32 %v1922_v17, %v1910_v22  ;;  %v5790_v17 = vld [vmem:[#allocation56_spill] sm:$0xff] }
 0x751   :  { %v1885_v16 = vpop.f32.mrf.mxu2  ;;  %v1898_v55 = vpop.f32.mrf.mxu3 }
 0x752   :  { %v5789_v55 = vld [vmem:[#allocation47_spill] sm:$0xff]  ;;  %v5791_v16 = vld [vmem:[#allocation57_spill] sm:$0xff] }
 0x754   :  { %v1911_v34 = vpop.f32.mrf.mxu0  ;;  %v1924_v41 = vpop.f32.mrf.mxu1 }
 0x755   :  { %v5793_v41 = vld [vmem:[#allocation113_spill] sm:$0xff] }
 0x759   :  { %v1935_v49 = vpop.f32.mrf.mxu2  ;;  %v1948_v44 = vpop.f32.mrf.mxu3 }
 0x75a   :  { %v1936_v39 = vadd.f32 %v1935_v49, %v1923_v53  ;;  %v5794_v49 = vld [vmem:[#allocation114_spill] sm:$0xff] }
 0x75c   :  { %v1949_v13 = vadd.f32 %v1948_v44, %v1936_v39 }
 0x75e   :  { %v1952_v11 = vsel %vm277_vm0, %v1949_v13, -1e+30  ;;  %v5795_v13 = vld [vmem:[#allocation115_spill] sm:$0xff] }
 0x75f   :  { %1953 = vmax.xlane.f32.xlu2 %v1952_v11 }
 0x761   :  { %v1937_v26 = vpop.f32.mrf.mxu2  ;;  %v1950_v19 = vpop.f32.mrf.mxu3 }
 0x762   :  { %v5797_v26 = vld [vmem:[#allocation117_spill] sm:$0xff]  ;;  %v5798_v19 = vld [vmem:[#allocation118_spill] sm:$0xff] }
 0x7d2   :  { %v1954_v40 = vpop.xlane.xlu2 %1953 }
 0x7d3   :  { %v1955_v24 = vsub.f32 %v1952_v11, %v1954_v40  ;;  %v5796_v11 = vld [vmem:[#allocation116_spill] sm:$0xff]  ;;  %v5799_v40 = vld [vmem:[#allocation119_spill] sm:$0xff] }
 0x7d5   :  { %v1956_v43 = vmul.f32 1.442695, %v1955_v24  ;;  %v5800_v24 = vld [vmem:[#allocation120_spill] sm:$0xff] }
 0x7d7   :  { %3224 = vpow2.f32 %v1956_v43  ;;  %v5801_v43 = vld [vmem:[#allocation121_spill] sm:$0xff] }
 0x7dd   :  { %v3225_v12 = vpop.eup %3224 }
 0x7de   :  { %v1958_v34 = vsel %vm277_vm0, %v3225_v12, 0.0  ;;  %v5802_v12 = vld [vmem:[#allocation122_spill] sm:$0xff] }
 0x7df   :  { %1959 = vadd.xlane.f32.xlu0 %v1958_v34 }
 0x852   :  { %v1960_v22 = vpop.xlane.xlu0 %1959 }
 0x853   :  { %3226 = vrcp.f32 %v1960_v22  ;;  %v5804_v22 = vld [vmem:[#allocation124_spill] sm:$0xff] }
 0x859   :  { %v3227_v25 = vpop.eup %3226 }
 0x85a   :  { %v1962_v53 = vmul.f32 %v3227_v25, %v1958_v34  ;;  %v5803_v34 = vld [vmem:[#allocation123_spill] sm:$0xff]  ;;  %v5805_v25 = vld [vmem:[#allocation125_spill] sm:$0xff] }
 0x85c   :  { %v1963_v39 = vsub.f32 %v1962_v53, %v4015_v37  ;;  %v5806_v53 = vld [vmem:[#allocation126_spill] sm:$0xff] }
 0x85e   :  { %v1964_v44 = vpack.c.bf16 %v1963_v39, %v1963_v39  ;;  %v5807_v39 = vld [vmem:[#allocation127_spill] sm:$0xff] }
 0x860   :  { %1973 = vmatmul.bf16.vlgmr.msra.gmra.mxu0 %v1964_v44  ;;  %1986 = vmatmul.bf16.vlgmr.msra.gmra.mxu1 %v1964_v44 }
 0x861   :  { %1999 = vmatmul.bf16.vlgmr.msra.gmra.mxu2 %v1964_v44  ;;  %2012 = vmatmul.bf16.vlgmr.msra.gmra.mxu3 %v1964_v44 }
 0x862   :  { %2117 = vmatpush.bf16.msra.mxu0 %v4268_v60  ;;  %2130 = vmatpush.bf16.msra.mxu1 %v4271_v18  ;;  %v5770_v60 = vld [vmem:[#allocation38_spill] sm:$0xff]  ;;  %v5771_v18 = vld [vmem:[#allocation39_spill] sm:$0xff] }
 0x863   :  { %2143 = vmatpush.bf16.msra.mxu2 %v4274_v47  ;;  %2156 = vmatpush.bf16.msra.mxu3 %v4277_v61  ;;  %v5772_v47 = vld [vmem:[#allocation40_spill] sm:$0xff]  ;;  %v5773_v61 = vld [vmem:[#allocation41_spill] sm:$0xff] }
 0x866   :  { %2118 = vmatpush.bf16.msra.mxu0 %v4280_v4  ;;  %2131 = vmatpush.bf16.msra.mxu1 %v4283_v5  ;;  %v5774_v4 = vld [vmem:[#allocation42_spill] sm:$0xff]  ;;  %v5775_v5 = vld [vmem:[#allocation45_spill] sm:$0xff] }
 0x867   :  { %2144 = vmatpush.bf16.msra.mxu2 %v4286_v10  ;;  %2157 = vmatpush.bf16.msra.mxu3 %v4289_v51  ;;  %v5776_v10 = vld [vmem:[#allocation17_spill] sm:$0xff]  ;;  %v5777_v51 = vld [vmem:[#allocation19_spill] sm:$0xff] }
 0x86a   :  { %2119 = vmatpush.bf16.msra.mxu0 %v5655_v3  ;;  %2132 = vmatpush.bf16.msra.mxu1 %v5656_v63  ;;  %v5778_v3 = vld [vmem:[#allocation16_spill] sm:$0xff]  ;;  %v5779_v63 = vld [vmem:[#allocation18_spill] sm:$0xff] }
 0x86b   :  { %2145 = vmatpush.bf16.msra.mxu2 %v5657_v33  ;;  %2158 = vmatpush.bf16.msra.mxu3 %v5658_v36  ;;  %v5780_v33 = vld [vmem:[#allocation48_spill] sm:$0xff]  ;;  %v5781_v36 = vld [vmem:[#allocation49_spill] sm:$0xff] }
 0x86e   :  { %2120 = vmatpush.bf16.msra.mxu0 %v5659_v9  ;;  %2133 = vmatpush.bf16.msra.mxu1 %v5660_v59  ;;  %v5782_v9 = vld [vmem:[#allocation43_spill] sm:$0xff]  ;;  %v5783_v59 = vld [vmem:[#allocation44_spill] sm:$0xff] }
 0x86f   :  { %2146 = vmatpush.bf16.msra.mxu2 %v5661_v21  ;;  %2159 = vmatpush.bf16.msra.mxu3 %v5662_v48  ;;  %v5784_v21 = vld [vmem:[#allocation52_spill] sm:$0xff]  ;;  %v5785_v48 = vld [vmem:[#allocation53_spill] sm:$0xff] }
 0x870   :  { %2025 = vmatmul.bf16.vlgmr.msrb.gmra.mxu0 %v1964_v44  ;;  %2038 = vmatmul.bf16.vlgmr.msrb.gmra.mxu1 %v1964_v44 }
 0x871   :  { %2051 = vmatmul.bf16.vlgmr.msrb.gmra.mxu2 %v1964_v44  ;;  %2064 = vmatmul.bf16.vlgmr.msrb.gmra.mxu3 %v1964_v44  ;;  %v5808_v44 = vld [vmem:[#allocation128_spill] sm:$0xff] }
 0x872   :  { %2121 = vmatpush.bf16.msra.mxu0 %v5663_v56  ;;  %2134 = vmatpush.bf16.msra.mxu1 %v5770_v60  ;;  %v5786_v56 = vld [vmem:[#allocation50_spill] sm:$0xff]  ;;  %v5809_v60 = vld [vmem:[#allocation129_spill] sm:$0xff] }
 0x873   :  { %2147 = vmatpush.bf16.msra.mxu2 %v5771_v18  ;;  %2160 = vmatpush.bf16.msra.mxu3 %v5772_v47  ;;  %v5810_v18 = vld [vmem:[#allocation130_spill] sm:$0xff]  ;;  %v5811_v47 = vld [vmem:[#allocation131_spill] sm:$0xff] }
 0x876   :  { %2122 = vmatpush.bf16.msra.mxu0 %v5773_v61  ;;  %2135 = vmatpush.bf16.msra.mxu1 %v5774_v4  ;;  %v5812_v61 = vld [vmem:[#allocation132_spill] sm:$0xff]  ;;  %v5813_v4 = vld [vmem:[#allocation133_spill] sm:$0xff] }
 0x877   :  { %2148 = vmatpush.bf16.msra.mxu2 %v5775_v5  ;;  %2161 = vmatpush.bf16.msra.mxu3 %v5776_v10  ;;  %v5814_v5 = vld [vmem:[#allocation134_spill] sm:$0xff]  ;;  %v5815_v10 = vld [vmem:[#allocation135_spill] sm:$0xff] }
 0x87a   :  { %2123 = vmatpush.bf16.msra.mxu0 %v5777_v51  ;;  %2136 = vmatpush.bf16.msra.mxu1 %v5778_v3  ;;  %v5816_v51 = vld [vmem:[#allocation136_spill] sm:$0xff] }
 0x87b   :  { %2149 = vmatpush.bf16.msra.mxu2 %v5779_v63  ;;  %2162 = vmatpush.bf16.msra.mxu3 %v5780_v33 }
 0x87e   :  { %2124 = vmatpush.bf16.msra.mxu0 %v5781_v36  ;;  %2137 = vmatpush.bf16.msra.mxu1 %v5782_v9 }
 0x87f   :  { %2150 = vmatpush.bf16.msra.mxu2 %v5785_v48  ;;  %2163 = vmatpush.bf16.msra.mxu3 %v5786_v56 }
 0x882   :  { %2169 = vmatpush.bf16.msrb.mxu0 %v5783_v59  ;;  %2182 = vmatpush.bf16.msrb.mxu1 %v5784_v21 }
 0x883   :  { %2195 = vmatpush.bf16.msrb.mxu2 %v5787_v20  ;;  %2208 = vmatpush.bf16.msrb.mxu3 %v5788_v8 }
 0x886   :  { %2170 = vmatpush.bf16.msrb.mxu0 %v5789_v55  ;;  %2183 = vmatpush.bf16.msrb.mxu1 %v5790_v17 }
 0x887   :  { %2196 = vmatpush.bf16.msrb.mxu2 %v5791_v16  ;;  %2209 = vmatpush.bf16.msrb.mxu3 %v5792_v23 }
 0x88a   :  { %2171 = vmatpush.bf16.msrb.mxu0 %v5793_v41  ;;  %2184 = vmatpush.bf16.msrb.mxu1 %v5794_v49 }
 0x88b   :  { %2197 = vmatpush.bf16.msrb.mxu2 %v5795_v13  ;;  %2210 = vmatpush.bf16.msrb.mxu3 %v5796_v11 }
 0x88e   :  { %2172 = vmatpush.bf16.msrb.mxu0 %v5797_v26  ;;  %2185 = vmatpush.bf16.msrb.mxu1 %v5798_v19 }
 0x88f   :  { %2198 = vmatpush.bf16.msrb.mxu2 %v5799_v40  ;;  %2211 = vmatpush.bf16.msrb.mxu3 %v5800_v24 }
 0x892   :  { %2173 = vmatpush.bf16.msrb.mxu0 %v5801_v43  ;;  %2186 = vmatpush.bf16.msrb.mxu1 %v5802_v12 }
 0x893   :  { %2199 = vmatpush.bf16.msrb.mxu2 %v5803_v34  ;;  %2212 = vmatpush.bf16.msrb.mxu3 %v5804_v22 }
 0x896   :  { %2174 = vmatpush.bf16.msrb.mxu0 %v5805_v25  ;;  %2187 = vmatpush.bf16.msrb.mxu1 %v5806_v53  ;;  %v5818_v53 = vld [vmem:[#allocation21_spill] sm:$0xff] }
 0x897   :  { %2200 = vmatpush.bf16.msrb.mxu2 %v5807_v39  ;;  %2213 = vmatpush.bf16.msrb.mxu3 %v5808_v44  ;;  %v5819_v44 = vld [vmem:[#allocation22_spill] sm:$0xff] }
 0x89a   :  { %2175 = vmatpush.bf16.msrb.mxu0 %v5809_v60  ;;  %2188 = vmatpush.bf16.msrb.mxu1 %v5810_v18  ;;  %v5820_v18 = vld [vmem:[#allocation23_spill] sm:$0xff] }
 0x89b   :  { %2201 = vmatpush.bf16.msrb.mxu2 %v5811_v47  ;;  %2214 = vmatpush.bf16.msrb.mxu3 %v5812_v61  ;;  %v5821_v61 = vld [vmem:[#allocation54_spill] sm:$0xff] }
 0x89e   :  { %2176 = vmatpush.bf16.msrb.mxu0 %v5813_v4  ;;  %2189 = vmatpush.bf16.msrb.mxu1 %v5814_v5  ;;  %v5824_v4 = vld [vmem:[#allocation61_spill] sm:$0xff] }
 0x89f   :  { %2202 = vmatpush.bf16.msrb.mxu2 %v5815_v10  ;;  %2215 = vmatpush.bf16.msrb.mxu3 %v5816_v51 }
 0x8dd   :  { %v1974_v3 = vpop.f32.mrf.mxu0  ;;  %v1987_v63 = vpop.f32.mrf.mxu1 }
 0x8de   :  { %vm2069_vm15 = vcmp.ge.f32.partialorder %v1974_v3, 0.0  ;;  %vm2070_vm1 = vcmp.ge.f32.partialorder %v1987_v63, 0.0  ;;  %v5825_v63 = vld [vmem:[#allocation28_spill] sm:$0xff] }
 0x8df   :  { %v2077_v33 = vsel %vm2069_vm15, 0.007843138, %v5605_v29  ;;  %v2078_v36 = vsel %vm2070_vm1, 0.007843138, %v5605_v29 }
 0x8e0   :  { %v2085_v9 = vadd.f32 %v2077_v33, %v4665_v52  ;;  %v2086_v59 = vadd.f32 %v2078_v36, %v4668_v27  ;;  %v5826_v36 = vld [vmem:[#allocation29_spill] sm:$0xff] }
 0x8e2   :  { %v2093_v21 = vmax.f32 %v2085_v9, %v4087_v32  ;;  %v2094_v48 = vmax.f32 %v2086_v59, %v4089_v35  ;;  %v5827_v59 = vld [vmem:[#allocation24_spill] sm:$0xff] }
 0x8e4   :  { %v4863_v56 = vmin.f32 %v2093_v21, %v4093_v45  ;;  %v4866_v20 = vmin.f32 %v2094_v48, %v4095_v46  ;;  %v2000_v8 = vpop.f32.mrf.mxu2  ;;  %v2013_v55 = vpop.f32.mrf.mxu3  ;;  %v5828_v48 = vld [vmem:[#allocation25_spill] sm:$0xff] }
 0x8e5   :  { %vm2071_vm2 = vcmp.ge.f32.partialorder %v2000_v8, 0.0  ;;  %vm2072_vm3 = vcmp.ge.f32.partialorder %v2013_v55, 0.0  ;;  %v1976_v17 = vpop.f32.mrf.mxu0  ;;  %v1989_v16 = vpop.f32.mrf.mxu1  ;;  %v5829_v55 = vld [vmem:[#allocation58_spill] sm:$0xff] }
 0x8e6   :  { %v2109_v52 = vpack.c.bf16 %v4863_v56, %v4863_v56  ;;  %v2110_v27 = vpack.c.bf16 %v4866_v20, %v4866_v20  ;;  %v2079_v23 = vsel %vm2071_vm2, 0.007843138, %v5605_v29  ;;  %v2080_v41 = vsel %vm2072_vm3, 0.007843138, %v5605_v29  ;;  %v5830_v17 = vld [vmem:[#allocation59_spill] sm:$0xff]  ;;  %v5831_v16 = vld [vmem:[#allocation64_spill] sm:$0xff] }
 0x8e7   :  { %v2087_v49 = vadd.f32 %v2079_v23, %v4683_v57  ;;  %v2088_v13 = vadd.f32 %v2080_v41, %v4686_v2  ;;  %v5834_v41 = vld [vmem:[#allocation27_spill] sm:$0xff] }
 0x8e8   :  { %2125 = vmatmul.bf16.vlgmr.msra.gmra.mxu0 %v2109_v52  ;;  %2138 = vmatmul.bf16.vlgmr.msra.gmra.mxu1 %v2110_v27  ;;  %v5832_v52 = vld [vmem:[#allocation65_spill] sm:$0xff]  ;;  %v5833_v27 = vld [vmem:[#allocation26_spill] sm:$0xff] }
 0x8e9   :  { %v2095_v11 = vmax.f32 %v2087_v49, %v4111_v58  ;;  %v2096_v26 = vmax.f32 %v2088_v13, %v4113_v62  ;;  %2234 = vmatpush.bf16.msra.mxu0 %v5479_v14  ;;  %2247 = vmatpush.bf16.msra.mxu1 %v5480_v15 }
 0x8eb   :  { %v4881_v19 = vmin.f32 %v2095_v11, %v4121_v6  ;;  %v4884_v40 = vmin.f32 %v2096_v26, %v4123_v7 }
 0x8ec   :  { %v2002_v24 = vpop.f32.mrf.mxu2  ;;  %v2015_v57 = vpop.f32.mrf.mxu3 }
 0x8ed   :  { %v2111_v2 = vpack.c.bf16 %v4881_v19, %v4881_v19  ;;  %v2112_v43 = vpack.c.bf16 %v4884_v40, %v4884_v40  ;;  %v2026_v12 = vpop.f32.mrf.mxu0  ;;  %v2039_v34 = vpop.f32.mrf.mxu1  ;;  %2235 = vmatpush.bf16.msra.mxu0 %v5483_v30  ;;  %2248 = vmatpush.bf16.msra.mxu1 %v5484_v31  ;;  %v5817_v30 = vld [vmem:[#allocation20_spill] sm:$0xff]  ;;  %v5835_v57 = vld [vmem:[#allocation62_spill] sm:$0xff] }
 0x8ee   :  { %vm2073_vm4 = vcmp.ge.f32.partialorder %v2026_v12, 0.0  ;;  %vm2074_vm5 = vcmp.ge.f32.partialorder %v2039_v34, 0.0  ;;  %v5838_v12 = vld [vmem:[#allocation69_spill] sm:$0xff]  ;;  %v5839_v34 = vld [vmem:[#allocation66_spill] sm:$0xff] }
 0x8ef   :  { %v2081_v14 = vsel %vm2073_vm4, 0.007843138, %v5605_v29  ;;  %v2082_v15 = vsel %vm2074_vm5, 0.007843138, %v5605_v29  ;;  %2151 = vmatmul.bf16.vlgmr.msra.gmra.mxu2 %v2111_v2  ;;  %2164 = vmatmul.bf16.vlgmr.msra.gmra.mxu3 %v2112_v43  ;;  %v5836_v2 = vld [vmem:[#allocation63_spill] sm:$0xff]  ;;  %v5837_v43 = vld [vmem:[#allocation68_spill] sm:$0xff] }
 0x8f0   :  { %v2089_v22 = vadd.f32 %v2081_v14, %v4705_v28  ;;  %v2090_v25 = vadd.f32 %v2082_v15, %v4708_v38  ;;  %2260 = vmatpush.bf16.msra.mxu2 %v5489_v50  ;;  %2273 = vmatpush.bf16.msra.mxu3 %v5490_v42  ;;  %v5822_v50 = vld [vmem:[#allocation55_spill] sm:$0xff]  ;;  %v5841_v15 = vld [vmem:[#allocation72_spill] sm:$0xff] }
 0x8f1   :  { %2236 = vmatpush.bf16.msra.mxu0 %v5493_v0  ;;  %2249 = vmatpush.bf16.msra.mxu1 %v5494_v1  ;;  %v5823_v1 = vld [vmem:[#allocation60_spill] sm:$0xff]  ;;  %v5840_v14 = vld [vmem:[#allocation67_spill] sm:$0xff] }
 0x8f2   :  { %v2097_v31 = vmax.f32 %v2089_v22, %v5817_v30  ;;  %v2098_v39 = vmax.f32 %v2090_v25, %v5818_v53  ;;  %v5842_v22 = vld [vmem:[#allocation73_spill] sm:$0xff]  ;;  %v5843_v25 = vld [vmem:[#allocation70_spill] sm:$0xff] }
 0x8f4   :  { %v4903_v60 = vmin.f32 %v2097_v31, %v5819_v44  ;;  %v4906_v47 = vmin.f32 %v2098_v39, %v5820_v18  ;;  %v2052_v28 = vpop.f32.mrf.mxu2  ;;  %v2065_v38 = vpop.f32.mrf.mxu3  ;;  %2261 = vmatpush.bf16.msra.mxu2 %v5821_v61  ;;  %2274 = vmatpush.bf16.msra.mxu3 %v5822_v50  ;;  %v5844_v31 = vld [vmem:[#allocation71_spill] sm:$0xff]  ;;  %v5845_v39 = vld [vmem:[#allocation76_spill] sm:$0xff]  ;;  %v5848_v61 = vld [vmem:[#allocation81_spill] sm:$0xff] }
 0x8f5   :  { %vm2075_vm6 = vcmp.ge.f32.partialorder %v2052_v28, 0.0  ;;  %vm2076_vm7 = vcmp.ge.f32.partialorder %v2065_v38, 0.0  ;;  %v2028_v42 = vpop.f32.mrf.mxu0  ;;  %v2041_v0 = vpop.f32.mrf.mxu1  ;;  %2237 = vmatpush.bf16.msra.mxu0 %v5823_v1  ;;  %2250 = vmatpush.bf16.msra.mxu1 %v5824_v4  ;;  %v5846_v28 = vld [vmem:[#allocation77_spill] sm:$0xff]  ;;  %v5847_v38 = vld [vmem:[#allocation80_spill] sm:$0xff]  ;;  %v5849_v50 = vld [vmem:[#allocation74_spill] sm:$0xff] }
 0x8f6   :  { %v2113_v5 = vpack.c.bf16 %v4903_v60, %v4903_v60  ;;  %v2114_v10 = vpack.c.bf16 %v4906_v47, %v4906_v47  ;;  %v2083_v51 = vsel %vm2075_vm6, 0.007843138, %v5605_v29  ;;  %v2084_v3 = vsel %vm2076_vm7, 0.007843138, %v5605_v29  ;;  %v5850_v42 = vld [vmem:[#allocation75_spill] sm:$0xff]  ;;  %v5851_v0 = vld [vmem:[#allocation84_spill] sm:$0xff] }
 0x8f7   :  { %v2091_v33 = vadd.f32 %v2083_v51, %v5825_v63  ;;  %v2092_v9 = vadd.f32 %v2084_v3, %v5826_v36  ;;  %v5852_v1 = vld [vmem:[#allocation85_spill] sm:$0xff]  ;;  %v5853_v4 = vld [vmem:[#allocation78_spill] sm:$0xff]  ;;  %v5856_v51 = vld [vmem:[#allocation83_spill] sm:$0xff] }
 0x8f8   :  { %2177 = vmatmul.bf16.vlgmr.msrb.gmra.mxu0 %v2113_v5  ;;  %2190 = vmatmul.bf16.vlgmr.msrb.gmra.mxu1 %v2114_v10  ;;  %v5854_v5 = vld [vmem:[#allocation79_spill] sm:$0xff]  ;;  %v5855_v10 = vld [vmem:[#allocation82_spill] sm:$0xff]  ;;  %v5857_v3 = vld [vmem:[#allocation88_spill] sm:$0xff] }
 0x8f9   :  { %v2099_v21 = vmax.f32 %v2091_v33, %v5827_v59  ;;  %v2100_v8 = vmax.f32 %v2092_v9, %v5828_v48  ;;  %2262 = vmatpush.bf16.msra.mxu2 %v5829_v55  ;;  %2275 = vmatpush.bf16.msra.mxu3 %v5830_v17  ;;  %v5858_v63 = vld [vmem:[#allocation89_spill] sm:$0xff]  ;;  %v5859_v33 = vld [vmem:[#allocation86_spill] sm:$0xff]  ;;  %v5860_v36 = vld [vmem:[#allocation87_spill] sm:$0xff] }
 0x8fa   :  { %2238 = vmatpush.bf16.msra.mxu0 %v5831_v16  ;;  %2251 = vmatpush.bf16.msra.mxu1 %v5832_v52  ;;  %v5861_v9 = vld [vmem:[#allocation92_spill] sm:$0xff]  ;;  %v5864_v55 = vld [vmem:[#allocation91_spill] sm:$0xff]  ;;  %v5866_v16 = vld [vmem:[#allocation97_spill] sm:$0xff] }
 0x8fb   :  { %v4927_v23 = vmin.f32 %v2099_v21, %v5833_v27  ;;  %v4930_v49 = vmin.f32 %v2100_v8, %v5834_v41  ;;  %v5862_v21 = vld [vmem:[#allocation93_spill] sm:$0xff]  ;;  %v5863_v8 = vld [vmem:[#allocation90_spill] sm:$0xff]  ;;  %v5865_v17 = vld [vmem:[#allocation96_spill] sm:$0xff] }
 0x8fc   :  { %v2054_v13 = vpop.f32.mrf.mxu2  ;;  %v2067_v11 = vpop.f32.mrf.mxu3  ;;  %v5867_v52 = vld [vmem:[#allocation94_spill] sm:$0xff] }
 0x8fd   :  { %v2115_v26 = vpack.c.bf16 %v4927_v23, %v4927_v23  ;;  %v2116_v24 = vpack.c.bf16 %v4930_v49, %v4930_v49  ;;  %2263 = vmatpush.bf16.msra.mxu2 %v5835_v57  ;;  %2276 = vmatpush.bf16.msra.mxu3 %v5836_v2  ;;  %v5868_v13 = vld [vmem:[#allocation95_spill] sm:$0xff]  ;;  %v5869_v11 = vld [vmem:[#allocation100_spill] sm:$0xff] }
 0x8fe   :  { %2239 = vmatpush.bf16.msra.mxu0 %v5837_v43  ;;  %2252 = vmatpush.bf16.msra.mxu1 %v5838_v12  ;;  %v5872_v57 = vld [vmem:[#allocation99_spill] sm:$0xff]  ;;  %v5873_v2 = vld [vmem:[#allocation104_spill] sm:$0xff]  ;;  %v5874_v43 = vld [vmem:[#allocation105_spill] sm:$0xff] }
 0x8ff   :  { %2203 = vmatmul.bf16.vlgmr.msrb.gmra.mxu2 %v2115_v26  ;;  %2216 = vmatmul.bf16.vlgmr.msrb.gmra.mxu3 %v2116_v24  ;;  %v5870_v26 = vld [vmem:[#allocation101_spill] sm:$0xff]  ;;  %v5871_v24 = vld [vmem:[#allocation98_spill] sm:$0xff] }
 0x900   :  { %v5875_v12 = vld [vmem:[#allocation102_spill] sm:$0xff] }
 0x901   :  { %2264 = vmatpush.bf16.msra.mxu2 %v5839_v34  ;;  %2277 = vmatpush.bf16.msra.mxu3 %v5840_v14  ;;  %v5876_v34 = vld [vmem:[#allocation103_spill] sm:$0xff]  ;;  %v5877_v14 = vld [vmem:[#allocation108_spill] sm:$0xff] }
 0x902   :  { %2240 = vmatpush.bf16.msra.mxu0 %v5841_v15  ;;  %2253 = vmatpush.bf16.msra.mxu1 %v5842_v22  ;;  %v5878_v15 = vld [vmem:[#allocation109_spill] sm:$0xff]  ;;  %v5879_v22 = vld [vmem:[#allocation106_spill] sm:$0xff] }
 0x905   :  { %2265 = vmatpush.bf16.msra.mxu2 %v5843_v25  ;;  %2278 = vmatpush.bf16.msra.mxu3 %v5844_v31  ;;  %v5880_v25 = vld [vmem:[#allocation107_spill] sm:$0xff]  ;;  %v5881_v31 = vld [vmem:[#allocation110_spill] sm:$0xff] }
 0x906   :  { %2241 = vmatpush.bf16.msra.mxu0 %v5845_v39  ;;  %2254 = vmatpush.bf16.msra.mxu1 %v5846_v28  ;;  %v5882_v39 = vld [vmem:[#allocation111_spill] sm:$0xff] }
 0x909   :  { %2266 = vmatpush.bf16.msra.mxu2 %v5849_v50  ;;  %2279 = vmatpush.bf16.msra.mxu3 %v5850_v42  ;;  %v4987_v42 = vld [vmem:[%s5040_s3] ss:$0 sm:$0xff] }
 0x90a   :  { %2286 = vmatpush.bf16.msrb.mxu0 %v5847_v38  ;;  %2299 = vmatpush.bf16.msrb.mxu1 %v5848_v61 }
 0x90d   :  { %2267 = vmatpush.bf16.msra.mxu2 %v5853_v4  ;;  %2280 = vmatpush.bf16.msra.mxu3 %v5854_v5 }
 0x90e   :  { %2287 = vmatpush.bf16.msrb.mxu0 %v5851_v0  ;;  %2300 = vmatpush.bf16.msrb.mxu1 %v5852_v1 }
 0x911   :  { %2312 = vmatpush.bf16.msrb.mxu2 %v5855_v10  ;;  %2325 = vmatpush.bf16.msrb.mxu3 %v5856_v51 }
 0x912   :  { %2288 = vmatpush.bf16.msrb.mxu0 %v5857_v3  ;;  %2301 = vmatpush.bf16.msrb.mxu1 %v5858_v63 }
 0x915   :  { %2313 = vmatpush.bf16.msrb.mxu2 %v5859_v33  ;;  %2326 = vmatpush.bf16.msrb.mxu3 %v5860_v36 }
 0x916   :  { %2289 = vmatpush.bf16.msrb.mxu0 %v5861_v9  ;;  %2302 = vmatpush.bf16.msrb.mxu1 %v5862_v21 }
 0x919   :  { %2314 = vmatpush.bf16.msrb.mxu2 %v5863_v8  ;;  %2327 = vmatpush.bf16.msrb.mxu3 %v5864_v55 }
 0x91a   :  { %2290 = vmatpush.bf16.msrb.mxu0 %v5865_v17  ;;  %2303 = vmatpush.bf16.msrb.mxu1 %v5866_v16 }
 0x91d   :  { %2315 = vmatpush.bf16.msrb.mxu2 %v5867_v52  ;;  %2328 = vmatpush.bf16.msrb.mxu3 %v5868_v13 }
 0x91e   :  { %2291 = vmatpush.bf16.msrb.mxu0 %v5869_v11  ;;  %2304 = vmatpush.bf16.msrb.mxu1 %v5870_v26 }
 0x921   :  { %2316 = vmatpush.bf16.msrb.mxu2 %v5871_v24  ;;  %2329 = vmatpush.bf16.msrb.mxu3 %v5872_v57 }
 0x922   :  { %2292 = vmatpush.bf16.msrb.mxu0 %v5873_v2  ;;  %2305 = vmatpush.bf16.msrb.mxu1 %v5874_v43 }
 0x925   :  { %2317 = vmatpush.bf16.msrb.mxu2 %v5875_v12  ;;  %2330 = vmatpush.bf16.msrb.mxu3 %v5876_v34 }
 0x926   :  { %2293 = vmatpush.bf16.msrb.mxu0 %v5877_v14  ;;  %2306 = vmatpush.bf16.msrb.mxu1 %v5878_v15 }
 0x929   :  { %2318 = vmatpush.bf16.msrb.mxu2 %v5879_v22  ;;  %2331 = vmatpush.bf16.msrb.mxu3 %v5880_v25 }
 0x92d   :  { %2319 = vmatpush.bf16.msrb.mxu2 %v5881_v31  ;;  %2332 = vmatpush.bf16.msrb.mxu3 %v5882_v39  ;;  %v3300_v39 = vld [vmem:[#allocation5 + $0x38] sm:$0xff] }
 0x965   :  { %v2126_v28 = vpop.f32.mrf.mxu0  ;;  %v2139_v38 = vpop.f32.mrf.mxu1 }
 0x966   :  { %v2127_v0 = vadd.f32 %v4987_v42, %v2126_v28  ;;  %v3301_v28 = vld [vmem:[#allocation5 + $0x78] sm:$0xff] }
 0x968   :  { %v2140_v5 = vadd.f32 %v2139_v38, %v2127_v0  ;;  %v3302_v38 = vld [vmem:[#allocation5 + $0xb8] sm:$0xff]  ;;  %v3306_v0 = vld [vmem:[#allocation5 + $0xb0] sm:$0xff] }
 0x96d   :  { %v2128_v61 = vpop.f32.mrf.mxu0  ;;  %v2141_v50 = vpop.f32.mrf.mxu1 }
 0x96e   :  { %v3304_v61 = vld [vmem:[#allocation5 + $0x30] sm:$0xff] }
 0x96f   :  { %v3305_v50 = vld [vmem:[#allocation5 + $0x70] sm:$0xff] }
 0x972   :  { %v2152_v1 = vpop.f32.mrf.mxu2  ;;  %v2165_v4 = vpop.f32.mrf.mxu3 }
 0x973   :  { %v2153_v10 = vadd.f32 %v2152_v1, %v2140_v5  ;;  %v3308_v1 = vld [vmem:[#allocation5 + $0x28] sm:$0xff] }
 0x974   :  { %v3310_v5 = vld [vmem:[#allocation5 + $0xa8] sm:$0xff] }
 0x975   :  { %v2178_v51 = vpop.f32.mrf.mxu0  ;;  %v2191_v3 = vpop.f32.mrf.mxu1  ;;  %v2166_v63 = vadd.f32 %v2165_v4, %v2153_v10  ;;  %v3309_v4 = vld [vmem:[#allocation5 + $0x68] sm:$0xff] }
 0x976   :  { %v3311_v10 = vld [vmem:[#allocation5 + $0xe8] sm:$0xff] }
 0x977   :  { %v2179_v9 = vadd.f32 %v2178_v51, %v2166_v63  ;;  %v3312_v51 = vld [vmem:[#allocation5 + $0x20] sm:$0xff] }
 0x978   :  { %v3314_v63 = vld [vmem:[#allocation5 + $0xa0] sm:$0xff] }
 0x979   :  { %v2192_v55 = vadd.f32 %v2191_v3, %v2179_v9  ;;  %v3313_v3 = vld [vmem:[#allocation5 + $0x60] sm:$0xff]  ;;  %v3317_v9 = vld [vmem:[#allocation5 + $0x58] sm:$0xff] }
 0x97a   :  { %v2154_v33 = vpop.f32.mrf.mxu2  ;;  %v2167_v36 = vpop.f32.mrf.mxu3 }
 0x97b   :  { %v3315_v33 = vld [vmem:[#allocation5 + $0xe0] sm:$0xff]  ;;  %v3316_v36 = vld [vmem:[#allocation5 + $0x18] sm:$0xff] }
 0x97d   :  { %v2180_v21 = vpop.f32.mrf.mxu0  ;;  %v2193_v8 = vpop.f32.mrf.mxu1 }
 0x97e   :  { %v3318_v21 = vld [vmem:[#allocation5 + $0x98] sm:$0xff] }
 0x97f   :  { %v3319_v8 = vld [vmem:[#allocation5 + $0xd8] sm:$0xff] }
 0x982   :  { %v2204_v17 = vpop.f32.mrf.mxu2  ;;  %v2217_v16 = vpop.f32.mrf.mxu3 }
 0x983   :  { %v2205_v52 = vadd.f32 %v2204_v17, %v2192_v55  ;;  %v3320_v55 = vld [vmem:[#allocation5 + $0x10] sm:$0xff] }
 0x984   :  { %v3321_v17 = vld [vmem:[#allocation5 + $0x50] sm:$0xff] }
 0x985   :  { %v2218_v13 = vadd.f32 %v2217_v16, %v2205_v52  ;;  %v3322_v16 = vld [vmem:[#allocation5 + $0x90] sm:$0xff] }
 0x986   :  { %v3323_v52 = vld [vmem:[#allocation5 + $0xd0] sm:$0xff] }
 0x987   :  { %v2221_v11 = vsel %vm277_vm0, %v2218_v13, -1e+30  ;;  %v3324_v13 = vld [vmem:[#allocation5 + $0x8] sm:$0xff] }
 0x988   :  { %2222 = vmax.xlane.f32.xlu2 %v2221_v11 }
 0x98a   :  { %v2206_v26 = vpop.f32.mrf.mxu2  ;;  %v2219_v24 = vpop.f32.mrf.mxu3 }
 0x98b   :  { %v3326_v26 = vld [vmem:[#allocation5 + $0x88] sm:$0xff] }
 0x98c   :  { %v3327_v24 = vld [vmem:[#allocation5 + $0xc8] sm:$0xff] }
 0x9fb   :  { %v2223_v57 = vpop.xlane.xlu2 %2222 }
 0x9fc   :  { %v2224_v2 = vsub.f32 %v2221_v11, %v2223_v57  ;;  %v3325_v11 = vld [vmem:[#allocation5 + $0x48] sm:$0xff]  ;;  %v3328_v57 = vld [vmem:[#allocation5] sm:$0xff] }
 0x9fe   :  { %v2225_v43 = vmul.f32 1.442695, %v2224_v2  ;;  %v3329_v2 = vld [vmem:[#allocation5 + $0x40] sm:$0xff] }
 0xa00   :  { %3228 = vpow2.f32 %v2225_v43  ;;  %v3330_v43 = vld [vmem:[#allocation5 + $0x138] sm:$0xff] }
 0xa06   :  { %v3229_v12 = vpop.eup %3228 }
 0xa07   :  { %v2227_v34 = vsel %vm277_vm0, %v3229_v12, 0.0  ;;  %v3331_v12 = vld [vmem:[#allocation5 + $0x178] sm:$0xff] }
 0xa08   :  { %2228 = vadd.xlane.f32.xlu0 %v2227_v34 }
 0xa7b   :  { %v2229_v14 = vpop.xlane.xlu0 %2228 }
 0xa7c   :  { %3230 = vrcp.f32 %v2229_v14  ;;  %v3333_v14 = vld [vmem:[#allocation5 + $0xc0] sm:$0xff] }
 0xa82   :  { %v3231_v15 = vpop.eup %3230 }
 0xa83   :  { %v2231_v22 = vmul.f32 %v3231_v15, %v2227_v34  ;;  %v3332_v34 = vld [vmem:[#allocation5 + $0x80] sm:$0xff]  ;;  %v3334_v15 = vld [vmem:[#allocation5 + $0x1b8] sm:$0xff] }
 0xa85   :  { %v2232_v25 = vsub.f32 %v2231_v22, %v4015_v37  ;;  %v3307_v37 = vld [vmem:[#allocation5 + $0xf0] sm:$0xff]  ;;  %v3335_v22 = vld [vmem:[#allocation5 + $0x1f8] sm:$0xff] }
 0xa87   :  { %v2233_v31 = vpack.c.bf16 %v2232_v25, %v2232_v25  ;;  %v3336_v25 = vld [vmem:[#allocation5 + $0x130] sm:$0xff] }
 0xa89   :  { %2242 = vmatmul.bf16.vlgmr.msra.gmra.mxu0 %v2233_v31  ;;  %2255 = vmatmul.bf16.vlgmr.msra.gmra.mxu1 %v2233_v31 }
 0xa8a   :  { %2268 = vmatmul.bf16.vlgmr.msra.gmra.mxu2 %v2233_v31  ;;  %2281 = vmatmul.bf16.vlgmr.msra.gmra.mxu3 %v2233_v31 }
 0xa8b   :  { %2394 = vmatpush.bf16.msra.mxu0 %v3300_v39  ;;  %2407 = vmatpush.bf16.msra.mxu1 %v3301_v28  ;;  %v3338_v39 = vld [vmem:[#allocation5 + $0x1b0] sm:$0xff] }
 0xa8c   :  { %2420 = vmatpush.bf16.msra.mxu2 %v3302_v38  ;;  %2433 = vmatpush.bf16.msra.mxu3 %v3303_v54  ;;  %v3339_v28 = vld [vmem:[#allocation5 + $0x1f0] sm:$0xff]  ;;  %v3340_v38 = vld [vmem:[#allocation5 + $0x128] sm:$0xff] }
 0xa8d   :  { %v3341_v54 = vld [vmem:[#allocation5 + $0x168] sm:$0xff] }
 0xa8f   :  { %2395 = vmatpush.bf16.msra.mxu0 %v3304_v61  ;;  %2408 = vmatpush.bf16.msra.mxu1 %v3305_v50  ;;  %v3342_v61 = vld [vmem:[#allocation5 + $0x1a8] sm:$0xff] }
 0xa90   :  { %2421 = vmatpush.bf16.msra.mxu2 %v3306_v0  ;;  %2434 = vmatpush.bf16.msra.mxu3 %v3307_v37  ;;  %v3343_v50 = vld [vmem:[#allocation5 + $0x1e8] sm:$0xff]  ;;  %v3344_v0 = vld [vmem:[#allocation5 + $0x120] sm:$0xff] }
 0xa91   :  { %v3345_v37 = vld [vmem:[#allocation5 + $0x160] sm:$0xff] }
 0xa93   :  { %2396 = vmatpush.bf16.msra.mxu0 %v3308_v1  ;;  %2409 = vmatpush.bf16.msra.mxu1 %v3309_v4  ;;  %v3346_v1 = vld [vmem:[#allocation5 + $0x1a0] sm:$0xff] }
 0xa94   :  { %2422 = vmatpush.bf16.msra.mxu2 %v3310_v5  ;;  %2435 = vmatpush.bf16.msra.mxu3 %v3311_v10  ;;  %v3347_v4 = vld [vmem:[#allocation5 + $0x1e0] sm:$0xff]  ;;  %v3348_v5 = vld [vmem:[#allocation5 + $0x118] sm:$0xff] }
 0xa95   :  { %v3349_v10 = vld [vmem:[#allocation5 + $0x158] sm:$0xff] }
 0xa97   :  { %2397 = vmatpush.bf16.msra.mxu0 %v3312_v51  ;;  %2410 = vmatpush.bf16.msra.mxu1 %v3313_v3  ;;  %v3350_v51 = vld [vmem:[#allocation5 + $0x198] sm:$0xff] }
 0xa98   :  { %2423 = vmatpush.bf16.msra.mxu2 %v3314_v63  ;;  %2436 = vmatpush.bf16.msra.mxu3 %v3315_v33  ;;  %v3351_v3 = vld [vmem:[#allocation5 + $0x1d8] sm:$0xff]  ;;  %v3352_v63 = vld [vmem:[#allocation5 + $0x110] sm:$0xff] }
 0xa99   :  { %2294 = vmatmul.bf16.vlgmr.msrb.gmra.mxu0 %v2233_v31  ;;  %2307 = vmatmul.bf16.vlgmr.msrb.gmra.mxu1 %v2233_v31  ;;  %v3353_v33 = vld [vmem:[#allocation5 + $0x150] sm:$0xff] }
 0xa9a   :  { %2320 = vmatmul.bf16.vlgmr.msrb.gmra.mxu2 %v2233_v31  ;;  %2333 = vmatmul.bf16.vlgmr.msrb.gmra.mxu3 %v2233_v31  ;;  %v3337_v31 = vld [vmem:[#allocation5 + $0x170] sm:$0xff] }
 0xa9b   :  { %2398 = vmatpush.bf16.msra.mxu0 %v3316_v36  ;;  %2411 = vmatpush.bf16.msra.mxu1 %v3317_v9  ;;  %v3354_v36 = vld [vmem:[#allocation5 + $0x190] sm:$0xff] }
 0xa9c   :  { %2424 = vmatpush.bf16.msra.mxu2 %v3318_v21  ;;  %2437 = vmatpush.bf16.msra.mxu3 %v3319_v8  ;;  %v3355_v9 = vld [vmem:[#allocation5 + $0x1d0] sm:$0xff]  ;;  %v3356_v21 = vld [vmem:[#allocation5 + $0x108] sm:$0xff] }
 0xa9d   :  { %v3357_v8 = vld [vmem:[#allocation5 + $0x148] sm:$0xff] }
 0xa9f   :  { %2399 = vmatpush.bf16.msra.mxu0 %v3320_v55  ;;  %2412 = vmatpush.bf16.msra.mxu1 %v3321_v17  ;;  %v3358_v55 = vld [vmem:[#allocation5 + $0x188] sm:$0xff] }
 0xaa0   :  { %2425 = vmatpush.bf16.msra.mxu2 %v3322_v16  ;;  %2438 = vmatpush.bf16.msra.mxu3 %v3323_v52  ;;  %v3359_v17 = vld [vmem:[#allocation5 + $0x1c8] sm:$0xff]  ;;  %v3360_v16 = vld [vmem:[#allocation5 + $0x100] sm:$0xff] }
 0xaa1   :  { %v3361_v52 = vld [vmem:[#allocation5 + $0x140] sm:$0xff] }
 0xaa3   :  { %2400 = vmatpush.bf16.msra.mxu0 %v3324_v13  ;;  %2413 = vmatpush.bf16.msra.mxu1 %v3325_v11  ;;  %v3362_v13 = vld [vmem:[#allocation5 + $0x180] sm:$0xff] }
 0xaa4   :  { %2426 = vmatpush.bf16.msra.mxu2 %v3326_v26  ;;  %2439 = vmatpush.bf16.msra.mxu3 %v3327_v24  ;;  %v3363_v11 = vld [vmem:[#allocation5 + $0x1c0] sm:$0xff] }
 0xaa7   :  { %2401 = vmatpush.bf16.msra.mxu0 %v3328_v57  ;;  %2414 = vmatpush.bf16.msra.mxu1 %v3329_v2 }
 0xaa8   :  { %2427 = vmatpush.bf16.msra.mxu2 %v3332_v34  ;;  %2440 = vmatpush.bf16.msra.mxu3 %v3333_v14 }
 0xaab   :  { %2446 = vmatpush.bf16.msrb.mxu0 %v3330_v43  ;;  %2459 = vmatpush.bf16.msrb.mxu1 %v3331_v12 }
 0xaac   :  { %2472 = vmatpush.bf16.msrb.mxu2 %v3334_v15  ;;  %2485 = vmatpush.bf16.msrb.mxu3 %v3335_v22 }
 0xaaf   :  { %2447 = vmatpush.bf16.msrb.mxu0 %v3336_v25  ;;  %2460 = vmatpush.bf16.msrb.mxu1 %v3337_v31 }
 0xab0   :  { %2473 = vmatpush.bf16.msrb.mxu2 %v3338_v39  ;;  %2486 = vmatpush.bf16.msrb.mxu3 %v3339_v28 }
 0xab3   :  { %2448 = vmatpush.bf16.msrb.mxu0 %v3340_v38  ;;  %2461 = vmatpush.bf16.msrb.mxu1 %v3341_v54 }
 0xab4   :  { %2474 = vmatpush.bf16.msrb.mxu2 %v3342_v61  ;;  %2487 = vmatpush.bf16.msrb.mxu3 %v3343_v50 }
 0xab7   :  { %2449 = vmatpush.bf16.msrb.mxu0 %v3344_v0  ;;  %2462 = vmatpush.bf16.msrb.mxu1 %v3345_v37 }
 0xab8   :  { %2475 = vmatpush.bf16.msrb.mxu2 %v3346_v1  ;;  %2488 = vmatpush.bf16.msrb.mxu3 %v3347_v4 }
 0xabb   :  { %2450 = vmatpush.bf16.msrb.mxu0 %v3348_v5  ;;  %2463 = vmatpush.bf16.msrb.mxu1 %v3349_v10 }
 0xabc   :  { %2476 = vmatpush.bf16.msrb.mxu2 %v3350_v51  ;;  %2489 = vmatpush.bf16.msrb.mxu3 %v3351_v3 }
 0xabf   :  { %2451 = vmatpush.bf16.msrb.mxu0 %v3352_v63  ;;  %2464 = vmatpush.bf16.msrb.mxu1 %v3353_v33 }
 0xac0   :  { %2477 = vmatpush.bf16.msrb.mxu2 %v3354_v36  ;;  %2490 = vmatpush.bf16.msrb.mxu3 %v3355_v9 }
 0xac3   :  { %2452 = vmatpush.bf16.msrb.mxu0 %v3356_v21  ;;  %2465 = vmatpush.bf16.msrb.mxu1 %v3357_v8 }
 0xac4   :  { %2478 = vmatpush.bf16.msrb.mxu2 %v3358_v55  ;;  %2491 = vmatpush.bf16.msrb.mxu3 %v3359_v17 }
 0xac7   :  { %2453 = vmatpush.bf16.msrb.mxu0 %v3360_v16  ;;  %2466 = vmatpush.bf16.msrb.mxu1 %v3361_v52 }
 0xac8   :  { %2479 = vmatpush.bf16.msrb.mxu2 %v3362_v13  ;;  %2492 = vmatpush.bf16.msrb.mxu3 %v3363_v11 }
 0xb06   :  { %v2243_v26 = vpop.f32.mrf.mxu0  ;;  %v2256_v24 = vpop.f32.mrf.mxu1 }
 0xb07   :  { %vm2338_vm0 = vcmp.ge.f32.partialorder %v2243_v26, 0.0  ;;  %vm2339_vm8 = vcmp.ge.f32.partialorder %v2256_v24, 0.0 }
 0xb08   :  { %v2346_v57 = vsel %vm2338_vm0, 0.007843138, %v5605_v29  ;;  %v2347_v2 = vsel %vm2339_vm8, 0.007843138, %v5605_v29 }
 0xb09   :  { %v2354_v43 = vadd.f32 %v2346_v57, %v4863_v56  ;;  %v2355_v12 = vadd.f32 %v2347_v2, %v4866_v20 }
 0xb0b   :  { %v2362_v34 = vmax.f32 %v2354_v43, %v4087_v32  ;;  %v2363_v14 = vmax.f32 %v2355_v12, %v4089_v35 }
 0xb0d   :  { %v2370_v15 = vmin.f32 %v2362_v34, %v4093_v45  ;;  %v2371_v22 = vmin.f32 %v2363_v14, %v4095_v46  ;;  %v2269_v25 = vpop.f32.mrf.mxu2  ;;  %v2282_v31 = vpop.f32.mrf.mxu3 }
 0xb0e   :  { %vm2340_vm9 = vcmp.ge.f32.partialorder %v2269_v25, 0.0  ;;  %vm2341_vm10 = vcmp.ge.f32.partialorder %v2282_v31, 0.0  ;;  %v2245_v39 = vpop.f32.mrf.mxu0  ;;  %v2258_v28 = vpop.f32.mrf.mxu1 }
 0xb0f   :  { %2378 = vst [vmem:[#allocation11] sm:$0xff] %v2370_v15  ;;  %v2386_v38 = vpack.c.bf16 %v2370_v15, %v2370_v15  ;;  %v2387_v54 = vpack.c.bf16 %v2371_v22, %v2371_v22  ;;  %v2348_v56 = vsel %vm2340_vm9, 0.007843138, %v5605_v29  ;;  %v2349_v20 = vsel %vm2341_vm10, 0.007843138, %v5605_v29 }
 0xb10   :  { %2379 = vst [vmem:[#allocation11 + $0x8] sm:$0xff] %v2371_v22  ;;  %v2356_v32 = vadd.f32 %v2348_v56, %v4881_v19  ;;  %v2357_v35 = vadd.f32 %v2349_v20, %v4884_v40 }
 0xb11   :  { %2402 = vmatmul.bf16.vlgmr.msra.gmra.mxu0 %v2386_v38  ;;  %2415 = vmatmul.bf16.vlgmr.msra.gmra.mxu1 %v2387_v54 }
 0xb12   :  { %v2364_v45 = vmax.f32 %v2356_v32, %v4111_v58  ;;  %v2365_v46 = vmax.f32 %v2357_v35, %v4113_v62 }
 0xb14   :  { %v2372_v61 = vmin.f32 %v2364_v45, %v4121_v6  ;;  %v2373_v50 = vmin.f32 %v2365_v46, %v4123_v7 }
 0xb15   :  { %v2271_v0 = vpop.f32.mrf.mxu2  ;;  %v2284_v37 = vpop.f32.mrf.mxu3 }
 0xb16   :  { %2380 = vst [vmem:[#allocation11 + $0x10] sm:$0xff] %v2372_v61  ;;  %v2388_v1 = vpack.c.bf16 %v2372_v61, %v2372_v61  ;;  %v2389_v4 = vpack.c.bf16 %v2373_v50, %v2373_v50  ;;  %v2295_v5 = vpop.f32.mrf.mxu0  ;;  %v2308_v10 = vpop.f32.mrf.mxu1 }
 0xb17   :  { %2381 = vst [vmem:[#allocation11 + $0x18] sm:$0xff] %v2373_v50  ;;  %vm2342_vm11 = vcmp.ge.f32.partialorder %v2295_v5, 0.0  ;;  %vm2343_vm12 = vcmp.ge.f32.partialorder %v2308_v10, 0.0 }
 0xb18   :  { %v2350_v19 = vsel %vm2342_vm11, 0.007843138, %v5605_v29  ;;  %v2351_v58 = vsel %vm2343_vm12, 0.007843138, %v5605_v29  ;;  %2428 = vmatmul.bf16.vlgmr.msra.gmra.mxu2 %v2388_v1  ;;  %2441 = vmatmul.bf16.vlgmr.msra.gmra.mxu3 %v2389_v4 }
 0xb19   :  { %v2358_v62 = vadd.f32 %v2350_v19, %v4903_v60  ;;  %v2359_v6 = vadd.f32 %v2351_v58, %v4906_v47 }
 0xb1b   :  { %v2366_v7 = vmax.f32 %v2358_v62, %v5817_v30  ;;  %v2367_v40 = vmax.f32 %v2359_v6, %v5818_v53 }
 0xb1d   :  { %v2374_v51 = vmin.f32 %v2366_v7, %v5819_v44  ;;  %v2375_v3 = vmin.f32 %v2367_v40, %v5820_v18  ;;  %v2321_v63 = vpop.f32.mrf.mxu2  ;;  %v2334_v33 = vpop.f32.mrf.mxu3 }
 0xb1e   :  { %vm2344_vm13 = vcmp.ge.f32.partialorder %v2321_v63, 0.0  ;;  %vm2345_vm14 = vcmp.ge.f32.partialorder %v2334_v33, 0.0  ;;  %v2297_v36 = vpop.f32.mrf.mxu0  ;;  %v2310_v9 = vpop.f32.mrf.mxu1 }
 0xb1f   :  { %2382 = vst [vmem:[#allocation11 + $0x20] sm:$0xff] %v2374_v51  ;;  %v2390_v21 = vpack.c.bf16 %v2374_v51, %v2374_v51  ;;  %v2391_v8 = vpack.c.bf16 %v2375_v3, %v2375_v3  ;;  %v2352_v60 = vsel %vm2344_vm13, 0.007843138, %v5605_v29  ;;  %v2353_v47 = vsel %vm2345_vm14, 0.007843138, %v5605_v29 }
 0xb20   :  { %2383 = vst [vmem:[#allocation11 + $0x28] sm:$0xff] %v2375_v3  ;;  %v2360_v30 = vadd.f32 %v2352_v60, %v4927_v23  ;;  %v2361_v53 = vadd.f32 %v2353_v47, %v4930_v49 }
 0xb21   :  { %2454 = vmatmul.bf16.vlgmr.msrb.gmra.mxu0 %v2390_v21  ;;  %2467 = vmatmul.bf16.vlgmr.msrb.gmra.mxu1 %v2391_v8 }
 0xb22   :  { %v2368_v44 = vmax.f32 %v2360_v30, %v5827_v59  ;;  %v2369_v18 = vmax.f32 %v2361_v53, %v5828_v48 }
 0xb24   :  { %v2376_v55 = vmin.f32 %v2368_v44, %v5833_v27  ;;  %v2377_v17 = vmin.f32 %v2369_v18, %v5834_v41 }
 0xb25   :  { %v2323_v16 = vpop.f32.mrf.mxu2  ;;  %v2336_v52 = vpop.f32.mrf.mxu3 }
 0xb26   :  { %2384 = vst [vmem:[#allocation11 + $0x30] sm:$0xff] %v2376_v55  ;;  %v2392_v13 = vpack.c.bf16 %v2376_v55, %v2376_v55  ;;  %v2393_v29 = vpack.c.bf16 %v2377_v17, %v2377_v17 }
 0xb27   :  { %2385 = vst [vmem:[#allocation11 + $0x38] sm:$0xff] %v2377_v17 }
 0xb28   :  { %2480 = vmatmul.bf16.vlgmr.msrb.gmra.mxu2 %v2392_v13  ;;  %2493 = vmatmul.bf16.vlgmr.msrb.gmra.mxu3 %v2393_v29  ;;  %2531 = dma.vmem_to_hbm [thread:$0]  %s2527_s9, 1024, %s2529_s30, [#allocation10]  }
 0xb8e   :  { %v2403_v59 = vpop.f32.mrf.mxu0  ;;  %v2416_v48 = vpop.f32.mrf.mxu1 }
 0xb8f   :  { %v2404_v41 = vadd.f32 %v4987_v42, %v2403_v59 }
 0xb91   :  { %v2417_v26 = vadd.f32 %v2416_v48, %v2404_v41 }
 0xb96   :  { %v2405_v27 = vpop.f32.mrf.mxu0  ;;  %v2418_v23 = vpop.f32.mrf.mxu1 }
 0xb9b   :  { %v2429_v49 = vpop.f32.mrf.mxu2  ;;  %v2442_v11 = vpop.f32.mrf.mxu3 }
 0xb9c   :  { %v2430_v24 = vadd.f32 %v2429_v49, %v2417_v26 }
 0xb9e   :  { %v2455_v57 = vpop.f32.mrf.mxu0  ;;  %v2468_v2 = vpop.f32.mrf.mxu1  ;;  %v2443_v43 = vadd.f32 %v2442_v11, %v2430_v24 }
 0xba0   :  { %v2456_v14 = vadd.f32 %v2455_v57, %v2443_v43 }
 0xba2   :  { %v2469_v25 = vadd.f32 %v2468_v2, %v2456_v14 }
 0xba3   :  { %v2431_v12 = vpop.f32.mrf.mxu2  ;;  %v2444_v34 = vpop.f32.mrf.mxu3 }
 0xba6   :  { %v2457_v15 = vpop.f32.mrf.mxu0  ;;  %v2470_v22 = vpop.f32.mrf.mxu1 }
 0xbab   :  { %v2481_v31 = vpop.f32.mrf.mxu2  ;;  %v2494_v39 = vpop.f32.mrf.mxu3 }
 0xbac   :  { %v2482_v42 = vadd.f32 %v2481_v31, %v2469_v25 }
 0xbae   :  { %v2495_v28 = vadd.f32 %v2494_v39, %v2482_v42 }
 0xbb0   :  { %2498 = vst [vmem:[#allocation8] sm:$0xff] %v2495_v28 }
 0xbb1   :  { %2509 = dma.vmem_to_hbm [thread:$0]  %s2505_s7, 128, %s2507_s12, [#allocation4]  }
 0xbb3   :  { %v2483_v38 = vpop.f32.mrf.mxu2  ;;  %v2496_v54 = vpop.f32.mrf.mxu3 }
 0xbb4   :  { %3512 = dma.done.wait [#allocation4], 128  }
 0xbb5   :  { %3513 = vsyncadd [#allocation4], 4294967168 }
 0xbb6   :  { %3514 = dma.done.wait [#allocation10], 1152  }
 0xbb7   :  { %3515 = vsyncadd [#allocation10], 4294966144 }
 0xbb8   :  { %2544 = vsyncpa [#allocation3], 1 }
 0xbb9   :  { %2545 = vsyncpa [#allocation6], 1 }
 0xbba   :  { %2546 = vsyncpa [#allocation4], 1 }
 0xbbb   :  { %2547 = vsyncpa [#allocation10], 1 }

</bundles_post_ra>
